<compile_context>
chip_gen: v6e
topology: v6e:2x2x1
jax: 0.10.0
libtpu: 0.0.40
codegen_flags: <defaults>
</compile_context>

<pallas_src>
import functools

import jax
import jax.numpy as jnp
import numpy as np
from jax.experimental import pallas as pl
from jax.experimental.pallas import tpu as pltpu

EPS = 1e-5  # PyTorch BatchNorm2d default eps


def _round_up(x, m):
    return (x + m - 1) // m * m


# --------------------------- in-kernel helpers --------------------------------

def _reflect_pad_hw(x, H, W):
    """1-pixel reflect pad of an (H, W, C) VMEM value (PyTorch 'reflect')."""
    x = jnp.concatenate([x[1:2], x, x[H - 2:H - 1]], axis=0)        # (H+2, W, C)
    x = jnp.concatenate([x[:, 1:2], x, x[:, W - 2:W - 1]], axis=1)  # (H+2, W+2, C)
    return x


def _conv3x3_im2col(xp, w_ref, H, W, C):
    """3x3 conv as ONE matmul: im2col patch (H*W, Kp) @ weights (Kp, Np).

    xp: (H+2, W+2, C) reflect-padded value in compute dtype.
    w_ref: (Kp, Np); rows ordered (kh, kw, cin), zero-padded to
           Kp = round_up(9*C, 128); cols are cout padded to Np = round_up(Cout, 128).
    Returns f32 (H*W, Np).
    """
    Kp = w_ref.shape[0]
    cols = [xp[dy:dy + H, dx:dx + W, :].reshape(H * W, C)
            for dy in range(3) for dx in range(3)]
    if Kp > 9 * C:
        cols.append(jnp.zeros((H * W, Kp - 9 * C), xp.dtype))
    patch = jnp.concatenate(cols, axis=-1)                          # (H*W, Kp)
    return jnp.dot(patch, w_ref[...], preferred_element_type=jnp.float32)


def _stats_rows(acc):
    """Per-block channel sum / sum-of-squares: (H*W, C) f32 -> (1, 2, C)."""
    s = jnp.sum(acc, axis=0, keepdims=True)
    s2 = jnp.sum(acc * acc, axis=0, keepdims=True)
    return jnp.concatenate([s, s2], axis=0)[None]


# --------------------------- Pallas kernels ------------------------------------

def _conv_stats_kernel(x_ref, w_ref, y_ref, stats_ref):
    # conv1 + per-block BN1 statistics.  x_ref: (1, H, W, Cin) compute dtype.
    _, H, W, Cin = x_ref.shape
    Cout = y_ref.shape[3]
    xp = _reflect_pad_hw(x_ref[0], H, W)
    acc = _conv3x3_im2col(xp, w_ref, H, W, Cin)[:, :Cout]           # f32 (H*W, Cout)
    y_ref[...] = acc.reshape(1, H, W, Cout).astype(y_ref.dtype)
    stats_ref[...] = _stats_rows(acc)


def _bn_relu_conv_stats_kernel(y1_ref, scale_ref, shift_ref, w_ref,
                               y_ref, stats_ref):
    # Fused BN1 + ReLU + conv2 + per-block BN2 statistics.
    _, H, W, C = y1_ref.shape
    Cout = y_ref.shape[3]
    a = jnp.maximum(y1_ref[0].astype(jnp.float32) * scale_ref[...]
                    + shift_ref[...], 0.0)
    xp = _reflect_pad_hw(a.astype(w_ref.dtype), H, W)
    acc = _conv3x3_im2col(xp, w_ref, H, W, C)[:, :Cout]             # f32 (H*W, Cout)
    y_ref[...] = acc.reshape(1, H, W, Cout).astype(y_ref.dtype)
    stats_ref[...] = _stats_rows(acc)


def _bn_add_kernel(y_ref, scale_ref, shift_ref, res_ref, o_ref):
    # BN2 (folded scale/shift) + residual add, all f32.
    o_ref[...] = (y_ref[...].astype(jnp.float32) * scale_ref[...]
                  + shift_ref[...] + res_ref[...])


# --------------------------- pallas_call wrappers ------------------------------

def _conv_call(x, w, N, H, W, Cout, store_dtype):
    Cin = x.shape[-1]
    Kp, Np = w.shape
    return pl.pallas_call(
        _conv_stats_kernel,
        out_shape=(jax.ShapeDtypeStruct((N, H, W, Cout), store_dtype),
                   jax.ShapeDtypeStruct((N, 2, Cout), jnp.float32)),
        grid=(N,),
        in_specs=[
            pl.BlockSpec((1, H, W, Cin), lambda n: (n, 0, 0, 0)),
            pl.BlockSpec((Kp, Np), lambda n: (0, 0)),
        ],
        out_specs=(
            pl.BlockSpec((1, H, W, Cout), lambda n: (n, 0, 0, 0)),
            pl.BlockSpec((1, 2, Cout), lambda n: (n, 0, 0)),  # per-block stats
        ),
        compiler_params=pltpu.CompilerParams(
            dimension_semantics=("parallel",)),               # megacore-shardable
    )(x, w)


def _bn_relu_conv_call(y1, scale, shift, w, N, H, W, Cout, store_dtype):
    C = y1.shape[-1]
    Kp, Np = w.shape
    return pl.pallas_call(
        _bn_relu_conv_stats_kernel,
        out_shape=(jax.ShapeDtypeStruct((N, H, W, Cout), store_dtype),
                   jax.ShapeDtypeStruct((N, 2, Cout), jnp.float32)),
        grid=(N,),
        in_specs=[
            pl.BlockSpec((1, H, W, C), lambda n: (n, 0, 0, 0)),
            pl.BlockSpec((1, C), lambda n: (0, 0)),
            pl.BlockSpec((1, C), lambda n: (0, 0)),
            pl.BlockSpec((Kp, Np), lambda n: (0, 0)),
        ],
        out_specs=(
            pl.BlockSpec((1, H, W, Cout), lambda n: (n, 0, 0, 0)),
            pl.BlockSpec((1, 2, Cout), lambda n: (n, 0, 0)),  # per-block stats
        ),
        compiler_params=pltpu.CompilerParams(
            dimension_semantics=("parallel",)),
    )(y1, scale, shift, w)


def _bn_add_call(y, scale, shift, res, N, H, W, C):
    TH = 8 if H % 8 == 0 else H                 # row-band grid for pipeline depth
    return pl.pallas_call(
        _bn_add_kernel,
        out_shape=jax.ShapeDtypeStruct((N, H, W, C), jnp.float32),
        grid=(N, H // TH),
        in_specs=[
            pl.BlockSpec((1, TH, W, C), lambda n, h: (n, h, 0, 0)),
            pl.BlockSpec((1, C), lambda n, h: (0, 0)),
            pl.BlockSpec((1, C), lambda n, h: (0, 0)),
            pl.BlockSpec((1, TH, W, C), lambda n, h: (n, h, 0, 0)),
        ],
        out_specs=pl.BlockSpec((1, TH, W, C), lambda n, h: (n, h, 0, 0)),
        input_output_aliases={3: 0},            # write the result over the residual
        compiler_params=pltpu.CompilerParams(
            dimension_semantics=("parallel", "parallel")),
    )(y, scale, shift, res)


# --------------------------- host-side glue ------------------------------------

def _fold_bn(stats, gamma, beta, count):
    # stats: (N_blocks, 2, C) f32 per-block sum / sum-of-squares -> global fold.
    tot = jnp.sum(stats, axis=0)                                 # (2, C)
    mean = tot[0] / count
    var = jnp.maximum(tot[1] / count - mean * mean, 0.0)         # biased (training)
    scale = gamma * jax.lax.rsqrt(var + EPS)
    shift = beta - mean * scale
    return scale.reshape(1, -1), shift.reshape(1, -1)


@functools.partial(jax.jit, static_argnames=("compute_dtype",))
def res_block_forward(x_nchw, params, compute_dtype=jnp.float32):
    """ResBlock.forward: conv-bn-relu-conv-bn + input.  x_nchw: (N, C, H, W)."""
    w1, g1, b1, w2, g2, b2 = params
    N, Cin, H, W = x_nchw.shape
    Cout = w1.shape[0]
    assert Cout == Cin, "residual add requires filters == in_channels"
    count = jnp.float32(N * H * W)

    # NHWC, un-padded in HBM; keep an f32 copy for the residual / BN math.
    x_nhwc = jnp.transpose(x_nchw, (0, 2, 3, 1)).astype(jnp.float32)
    x_in = x_nhwc.astype(compute_dtype)

    # PyTorch conv weight (Cout, Cin, 3, 3) -> (Kp, Np) im2col matrix:
    # rows ordered (kh, kw, cin) padded to Kp, cols = cout padded to Np.
    def pack_w(w, cin, cout):
        kp = _round_up(9 * cin, 128)
        np_ = _round_up(cout, 128)
        wt = jnp.transpose(w, (2, 3, 1, 0)).reshape(9 * cin, cout).astype(jnp.float32)
        wt = jnp.pad(wt, ((0, kp - 9 * cin), (0, np_ - cout)))
        return wt.astype(compute_dtype)

    w1p = pack_w(w1, Cin, Cout)
    w2p = pack_w(w2, Cout, Cout)

    # conv1 (+ per-block BN1 statistics, folded on host).
    y1, stats1 = _conv_call(x_in, w1p, N, H, W, Cout, compute_dtype)
    scale1, shift1 = _fold_bn(stats1, g1.astype(jnp.float32),
                              b1.astype(jnp.float32), count)

    # BN1 + ReLU fused into conv2 (+ per-block BN2 statistics).
    y2, stats2 = _bn_relu_conv_call(y1, scale1, shift1, w2p, N, H, W, Cout,
                                    compute_dtype)
    scale2, shift2 = _fold_bn(stats2, g2.astype(jnp.float32),
                              b2.astype(jnp.float32), count)

    # BN2 + residual add (f32), back to NCHW.
    out = _bn_add_call(y2, scale2, shift2, x_nhwc, N, H, W, Cout)
    return jnp.transpose(out, (0, 3, 1, 2))


# --------------------------- pure-JAX reference --------------------------------

def res_block_reference(x_nchw, params):
    w1, g1, b1, w2, g2, b2 = params
    x = jnp.transpose(x_nchw, (0, 2, 3, 1)).astype(jnp.float32)

    def conv(inp, w):
        wh = jnp.transpose(w, (2, 3, 1, 0))  # HWIO
        pad = jnp.pad(inp, ((0, 0), (1, 1), (1, 1), (0, 0)), mode="reflect")
        return jax.lax.conv_general_dilated(
            pad, wh, (1, 1), "VALID",
            dimension_numbers=("NHWC", "HWIO", "NHWC"))

    def bn(y, g, b):
        m = jnp.mean(y, axis=(0, 1, 2), keepdims=True)
        v = jnp.mean(jnp.square(y - m), axis=(0, 1, 2), keepdims=True)
        return (y - m) * jax.lax.rsqrt(v + EPS) * g + b

    y = jnp.maximum(bn(conv(x, w1), g1, b1), 0.0)
    y = bn(conv(y, w2), g2, b2) + x
    return jnp.transpose(y, (0, 3, 1, 2))


# --------------------------------- main ----------------------------------------

if __name__ == "__main__":
    # ResBlock(in_channels=4, filters=4): residual add requires filters == in_channels.
    N, C, H, W = 2, 4, 16, 16
    key = jax.random.PRNGKey(0)
    kx, kw1, kw2, kg1, kb1, kg2, kb2 = jax.random.split(key, 7)

    x = jax.random.normal(kx, (N, C, H, W), dtype=jnp.float32)
    w1 = jax.random.normal(kw1, (C, C, 3, 3), dtype=jnp.float32) * 0.2
    w2 = jax.random.normal(kw2, (C, C, 3, 3), dtype=jnp.float32) * 0.2
    g1 = 1.0 + 0.1 * jax.random.normal(kg1, (C,), dtype=jnp.float32)
    b1 = 0.1 * jax.random.normal(kb1, (C,), dtype=jnp.float32)
    g2 = 1.0 + 0.1 * jax.random.normal(kg2, (C,), dtype=jnp.float32)
    b2 = 0.1 * jax.random.normal(kb2, (C,), dtype=jnp.float32)
    params = (w1, g1, b1, w2, g2, b2)

    ref = jax.block_until_ready(res_block_reference(x, params))

    # f32 path: tight tolerance against the f32 reference.
    out = jax.block_until_ready(res_block_forward(x, params, jnp.float32))
    assert out.shape == (N, C, H, W) and out.dtype == jnp.float32
    np.testing.assert_allclose(np.asarray(out), np.asarray(ref), rtol=1e-4, atol=1e-4)

    # bf16 MXU fast path (v6e/v7x): bf16 matmul inputs AND bf16 intermediate
    # activation storage; BN stats / normalization / residual stay f32.
    out_bf16 = jax.block_until_ready(res_block_forward(x, params, jnp.bfloat16))
    np.testing.assert_allclose(np.asarray(out_bf16), np.asarray(ref),
                               rtol=1e-1, atol=1e-1)

    print("KERNEL_OK")
</pallas_src>

<mosaic_0001>
module attributes {stable_mosaic.version = 11 : i64} {
  func.func @_conv_stats_kernel(%arg0: i32, %arg1: memref<1x16x16x4xf32, #tpu.memory_space<vmem>>, %arg2: memref<128x128xf32, #tpu.memory_space<vmem>>, %arg3: memref<1x16x16x4xf32, #tpu.memory_space<vmem>>, %arg4: memref<1x2x4xf32, #tpu.memory_space<vmem>>) attributes {dimension_semantics = [#tpu.dimension_semantics<parallel>], iteration_bounds = array<i64: 2>, scalar_prefetch = 0 : i64, scratch_operands = 0 : i64, tpu.core_type = #tpu.core_type<tc>, window_params = [{transform_indices = @transform_0, window_bounds = array<i64: 1, 16, 16, 4>}, {pipeline_mode = #tpu.pipeline_mode<synchronous>, transform_indices = @transform_1, window_bounds = array<i64: 128, 128>}, {transform_indices = @transform_2, window_bounds = array<i64: 1, 16, 16, 4>}, {transform_indices = @transform_3, window_bounds = array<i64: 1, 2, 4>}]} {
    %c0 = arith.constant 0 : index
    %c0_0 = arith.constant 0 : index
    %c0_1 = arith.constant 0 : index
    %c0_2 = arith.constant 0 : index
    %0 = vector.load %arg1[%c0, %c0_0, %c0_1, %c0_2] : memref<1x16x16x4xf32, #tpu.memory_space<vmem>>, vector<1x16x16x4xf32>
    %1 = vector.shape_cast %0 : vector<1x16x16x4xf32> to vector<16x16x4xf32>
    %2 = vector.extract_strided_slice %1 {offsets = [1, 0, 0], sizes = [1, 16, 4], strides = [1, 1, 1]} : vector<16x16x4xf32> to vector<1x16x4xf32>
    %3 = vector.extract_strided_slice %1 {offsets = [14, 0, 0], sizes = [1, 16, 4], strides = [1, 1, 1]} : vector<16x16x4xf32> to vector<1x16x4xf32>
    %4 = tpu.concatenate %2, %1, %3 in 0 : vector<1x16x4xf32>, vector<16x16x4xf32>, vector<1x16x4xf32> -> vector<18x16x4xf32>
    %5 = vector.extract_strided_slice %4 {offsets = [0, 1, 0], sizes = [18, 1, 4], strides = [1, 1, 1]} : vector<18x16x4xf32> to vector<18x1x4xf32>
    %6 = vector.extract_strided_slice %4 {offsets = [0, 14, 0], sizes = [18, 1, 4], strides = [1, 1, 1]} : vector<18x16x4xf32> to vector<18x1x4xf32>
    %7 = tpu.concatenate %5, %4, %6 in 1 : vector<18x1x4xf32>, vector<18x16x4xf32>, vector<18x1x4xf32> -> vector<18x18x4xf32>
    %8 = vector.extract_strided_slice %7 {offsets = [0, 0, 0], sizes = [16, 16, 4], strides = [1, 1, 1]} : vector<18x18x4xf32> to vector<16x16x4xf32>
    %9 = vector.shape_cast %8 : vector<16x16x4xf32> to vector<256x4xf32>
    %10 = vector.extract_strided_slice %7 {offsets = [0, 1, 0], sizes = [16, 16, 4], strides = [1, 1, 1]} : vector<18x18x4xf32> to vector<16x16x4xf32>
    %11 = vector.shape_cast %10 : vector<16x16x4xf32> to vector<256x4xf32>
    %12 = vector.extract_strided_slice %7 {offsets = [0, 2, 0], sizes = [16, 16, 4], strides = [1, 1, 1]} : vector<18x18x4xf32> to vector<16x16x4xf32>
    %13 = vector.shape_cast %12 : vector<16x16x4xf32> to vector<256x4xf32>
    %14 = vector.extract_strided_slice %7 {offsets = [1, 0, 0], sizes = [16, 16, 4], strides = [1, 1, 1]} : vector<18x18x4xf32> to vector<16x16x4xf32>
    %15 = vector.shape_cast %14 : vector<16x16x4xf32> to vector<256x4xf32>
    %16 = vector.extract_strided_slice %7 {offsets = [1, 1, 0], sizes = [16, 16, 4], strides = [1, 1, 1]} : vector<18x18x4xf32> to vector<16x16x4xf32>
    %17 = vector.shape_cast %16 : vector<16x16x4xf32> to vector<256x4xf32>
    %18 = vector.extract_strided_slice %7 {offsets = [1, 2, 0], sizes = [16, 16, 4], strides = [1, 1, 1]} : vector<18x18x4xf32> to vector<16x16x4xf32>
    %19 = vector.shape_cast %18 : vector<16x16x4xf32> to vector<256x4xf32>
    %20 = vector.extract_strided_slice %7 {offsets = [2, 0, 0], sizes = [16, 16, 4], strides = [1, 1, 1]} : vector<18x18x4xf32> to vector<16x16x4xf32>
    %21 = vector.shape_cast %20 : vector<16x16x4xf32> to vector<256x4xf32>
    %22 = vector.extract_strided_slice %7 {offsets = [2, 1, 0], sizes = [16, 16, 4], strides = [1, 1, 1]} : vector<18x18x4xf32> to vector<16x16x4xf32>
    %23 = vector.shape_cast %22 : vector<16x16x4xf32> to vector<256x4xf32>
    %24 = vector.extract_strided_slice %7 {offsets = [2, 2, 0], sizes = [16, 16, 4], strides = [1, 1, 1]} : vector<18x18x4xf32> to vector<16x16x4xf32>
    %25 = vector.shape_cast %24 : vector<16x16x4xf32> to vector<256x4xf32>
    %cst = arith.constant 0.000000e+00 : f32
    %26 = vector.broadcast %cst : f32 to vector<256x92xf32>
    %27 = tpu.concatenate %9, %11, %13, %15, %17, %19, %21, %23, %25, %26 in 1 : vector<256x4xf32>, vector<256x4xf32>, vector<256x4xf32>, vector<256x4xf32>, vector<256x4xf32>, vector<256x4xf32>, vector<256x4xf32>, vector<256x4xf32>, vector<256x4xf32>, vector<256x92xf32> -> vector<256x128xf32>
    %c0_3 = arith.constant 0 : index
    %c0_4 = arith.constant 0 : index
    %28 = vector.load %arg2[%c0_3, %c0_4] : memref<128x128xf32, #tpu.memory_space<vmem>>, vector<128x128xf32>
    %cst_5 = arith.constant dense<0.000000e+00> : vector<256x128xf32>
    %29 = tpu.matmul %27, %28, %cst_5 {dimension_numbers = #tpu.dot_dimension_numbers<[1], [0], [0], [1], [0, 0, 1, 1], [], []>} : vector<256x128xf32>, vector<128x128xf32>, vector<256x128xf32> -> vector<256x128xf32>
    %30 = vector.extract_strided_slice %29 {offsets = [0, 0], sizes = [256, 4], strides = [1, 1]} : vector<256x128xf32> to vector<256x4xf32>
    %31 = vector.shape_cast %30 : vector<256x4xf32> to vector<1x16x16x4xf32>
    %c0_6 = arith.constant 0 : index
    %c0_7 = arith.constant 0 : index
    %c0_8 = arith.constant 0 : index
    %c0_9 = arith.constant 0 : index
    %32 = vector.load %arg3[%c0_6, %c0_7, %c0_8, %c0_9] : memref<1x16x16x4xf32, #tpu.memory_space<vmem>>, vector<1x16x16x4xf32>
    tpu.vector_store %arg3[%c0_6, %c0_7, %c0_8, %c0_9], %31 {strides = array<i32>} : memref<1x16x16x4xf32, #tpu.memory_space<vmem>>, vector<1x16x16x4xf32>,
    %cst_10 = arith.constant dense<0.000000e+00> : vector<4xf32>
    %33 = vector.multi_reduction <add>, %30, %cst_10 [0] : vector<256x4xf32> to vector<4xf32>
    %34 = vector.shape_cast %33 : vector<4xf32> to vector<1x4xf32>
    %35 = arith.mulf %30, %30 : vector<256x4xf32>
    %cst_11 = arith.constant dense<0.000000e+00> : vector<4xf32>
    %36 = vector.multi_reduction <add>, %35, %cst_11 [0] : vector<256x4xf32> to vector<4xf32>
    %37 = vector.shape_cast %36 : vector<4xf32> to vector<1x4xf32>
    %38 = tpu.concatenate %34, %37 in 0 : vector<1x4xf32>, vector<1x4xf32> -> vector<2x4xf32>
    %39 = vector.shape_cast %38 : vector<2x4xf32> to vector<1x2x4xf32>
    %c0_12 = arith.constant 0 : index
    %c0_13 = arith.constant 0 : index
    %c0_14 = arith.constant 0 : index
    %40 = vector.load %arg4[%c0_12, %c0_13, %c0_14] : memref<1x2x4xf32, #tpu.memory_space<vmem>>, vector<1x2x4xf32>
    tpu.vector_store %arg4[%c0_12, %c0_13, %c0_14], %39 {strides = array<i32>} : memref<1x2x4xf32, #tpu.memory_space<vmem>>, vector<1x2x4xf32>,
    return
  }
  func.func @transform_0(%arg0: i32) -> (i32, i32, i32, i32) {
    %c0_i32 = arith.constant 0 : i32
    %c0_i32_0 = arith.constant 0 : i32
    %c0_i32_1 = arith.constant 0 : i32
    %c0_i32_2 = arith.constant 0 : i32
    return %arg0, %c0_i32, %c0_i32_0, %c0_i32_1 : i32, i32, i32, i32
  }
  func.func @transform_1(%arg0: i32) -> (i32, i32) {
    %c0_i32 = arith.constant 0 : i32
    %c0_i32_0 = arith.constant 0 : i32
    %c0_i32_1 = arith.constant 0 : i32
    return %c0_i32, %c0_i32_0 : i32, i32
  }
  func.func @transform_2(%arg0: i32) -> (i32, i32, i32, i32) {
    %c0_i32 = arith.constant 0 : i32
    %c0_i32_0 = arith.constant 0 : i32
    %c0_i32_1 = arith.constant 0 : i32
    %c0_i32_2 = arith.constant 0 : i32
    return %arg0, %c0_i32, %c0_i32_0, %c0_i32_1 : i32, i32, i32, i32
  }
  func.func @transform_3(%arg0: i32) -> (i32, i32, i32) {
    %c0_i32 = arith.constant 0 : i32
    %c0_i32_0 = arith.constant 0 : i32
    %c0_i32_1 = arith.constant 0 : i32
    return %arg0, %c0_i32, %c0_i32_0 : i32, i32, i32
  }
}

module attributes {stable_mosaic.version = 11 : i64} {
  func.func @_bn_add_kernel(%arg0: i32, %arg1: i32, %arg2: memref<1x8x16x4xf32, #tpu.memory_space<vmem>>, %arg3: memref<1x4xf32, #tpu.memory_space<vmem>>, %arg4: memref<1x4xf32, #tpu.memory_space<vmem>>, %arg5: memref<1x8x16x4xf32, #tpu.memory_space<vmem>>, %arg6: memref<1x8x16x4xf32, #tpu.memory_space<vmem>>) attributes {dimension_semantics = [#tpu.dimension_semantics<parallel>, #tpu.dimension_semantics<parallel>], iteration_bounds = array<i64: 2, 2>, scalar_prefetch = 0 : i64, scratch_operands = 0 : i64, tpu.core_type = #tpu.core_type<tc>, window_params = [{transform_indices = @transform_0, window_bounds = array<i64: 1, 8, 16, 4>}, {pipeline_mode = #tpu.pipeline_mode<synchronous>, transform_indices = @transform_1, window_bounds = array<i64: 1, 4>}, {pipeline_mode = #tpu.pipeline_mode<synchronous>, transform_indices = @transform_2, window_bounds = array<i64: 1, 4>}, {transform_indices = @transform_3, window_bounds = array<i64: 1, 8, 16, 4>}, {transform_indices = @transform_4, window_bounds = array<i64: 1, 8, 16, 4>}]} {
    %c0 = arith.constant 0 : index
    %c0_0 = arith.constant 0 : index
    %c0_1 = arith.constant 0 : index
    %c0_2 = arith.constant 0 : index
    %0 = vector.load %arg2[%c0, %c0_0, %c0_1, %c0_2] : memref<1x8x16x4xf32, #tpu.memory_space<vmem>>, vector<1x8x16x4xf32>
    %c0_3 = arith.constant 0 : index
    %c0_4 = arith.constant 0 : index
    %1 = vector.load %arg3[%c0_3, %c0_4] : memref<1x4xf32, #tpu.memory_space<vmem>>, vector<1x4xf32>
    %2 = vector.shape_cast %1 : vector<1x4xf32> to vector<1x1x1x4xf32>
    %3 = vector.broadcast %2 : vector<1x1x1x4xf32> to vector<1x8x16x4xf32>
    %4 = arith.mulf %0, %3 : vector<1x8x16x4xf32>
    %c0_5 = arith.constant 0 : index
    %c0_6 = arith.constant 0 : index
    %5 = vector.load %arg4[%c0_5, %c0_6] : memref<1x4xf32, #tpu.memory_space<vmem>>, vector<1x4xf32>
    %6 = vector.shape_cast %5 : vector<1x4xf32> to vector<1x1x1x4xf32>
    %7 = vector.broadcast %6 : vector<1x1x1x4xf32> to vector<1x8x16x4xf32>
    %8 = arith.addf %4, %7 : vector<1x8x16x4xf32>
    %c0_7 = arith.constant 0 : index
    %c0_8 = arith.constant 0 : index
    %c0_9 = arith.constant 0 : index
    %c0_10 = arith.constant 0 : index
    %9 = vector.load %arg5[%c0_7, %c0_8, %c0_9, %c0_10] : memref<1x8x16x4xf32, #tpu.memory_space<vmem>>, vector<1x8x16x4xf32>
    %10 = arith.addf %8, %9 : vector<1x8x16x4xf32>
    %c0_11 = arith.constant 0 : index
    %c0_12 = arith.constant 0 : index
    %c0_13 = arith.constant 0 : index
    %c0_14 = arith.constant 0 : index
    %11 = vector.load %arg6[%c0_11, %c0_12, %c0_13, %c0_14] : memref<1x8x16x4xf32, #tpu.memory_space<vmem>>, vector<1x8x16x4xf32>
    tpu.vector_store %arg6[%c0_11, %c0_12, %c0_13, %c0_14], %10 {strides = array<i32>} : memref<1x8x16x4xf32, #tpu.memory_space<vmem>>, vector<1x8x16x4xf32>,
    return
  }
  func.func @transform_0(%arg0: i32, %arg1: i32) -> (i32, i32, i32, i32) {
    %c0_i32 = arith.constant 0 : i32
    %c0_i32_0 = arith.constant 0 : i32
    %c0_i32_1 = arith.constant 0 : i32
    return %arg0, %arg1, %c0_i32, %c0_i32_0 : i32, i32, i32, i32
  }
  func.func @transform_1(%arg0: i32, %arg1: i32) -> (i32, i32) {
    %c0_i32 = arith.constant 0 : i32
    %c0_i32_0 = arith.constant 0 : i32
    %c0_i32_1 = arith.constant 0 : i32
    return %c0_i32, %c0_i32_0 : i32, i32
  }
  func.func @transform_2(%arg0: i32, %arg1: i32) -> (i32, i32) {
    %c0_i32 = arith.constant 0 : i32
    %c0_i32_0 = arith.constant 0 : i32
    %c0_i32_1 = arith.constant 0 : i32
    return %c0_i32, %c0_i32_0 : i32, i32
  }
  func.func @transform_3(%arg0: i32, %arg1: i32) -> (i32, i32, i32, i32) {
    %c0_i32 = arith.constant 0 : i32
    %c0_i32_0 = arith.constant 0 : i32
    %c0_i32_1 = arith.constant 0 : i32
    return %arg0, %arg1, %c0_i32, %c0_i32_0 : i32, i32, i32, i32
  }
  func.func @transform_4(%arg0: i32, %arg1: i32) -> (i32, i32, i32, i32) {
    %c0_i32 = arith.constant 0 : i32
    %c0_i32_0 = arith.constant 0 : i32
    %c0_i32_1 = arith.constant 0 : i32
    return %arg0, %arg1, %c0_i32, %c0_i32_0 : i32, i32, i32, i32
  }
}

module attributes {stable_mosaic.version = 11 : i64} {
  func.func @_bn_relu_conv_stats_kernel(%arg0: i32, %arg1: memref<1x16x16x4xf32, #tpu.memory_space<vmem>>, %arg2: memref<1x4xf32, #tpu.memory_space<vmem>>, %arg3: memref<1x4xf32, #tpu.memory_space<vmem>>, %arg4: memref<128x128xf32, #tpu.memory_space<vmem>>, %arg5: memref<1x16x16x4xf32, #tpu.memory_space<vmem>>, %arg6: memref<1x2x4xf32, #tpu.memory_space<vmem>>) attributes {dimension_semantics = [#tpu.dimension_semantics<parallel>], iteration_bounds = array<i64: 2>, scalar_prefetch = 0 : i64, scratch_operands = 0 : i64, tpu.core_type = #tpu.core_type<tc>, window_params = [{transform_indices = @transform_0, window_bounds = array<i64: 1, 16, 16, 4>}, {pipeline_mode = #tpu.pipeline_mode<synchronous>, transform_indices = @transform_1, window_bounds = array<i64: 1, 4>}, {pipeline_mode = #tpu.pipeline_mode<synchronous>, transform_indices = @transform_2, window_bounds = array<i64: 1, 4>}, {pipeline_mode = #tpu.pipeline_mode<synchronous>, transform_indices = @transform_3, window_bounds = array<i64: 128, 128>}, {transform_indices = @transform_4, window_bounds = array<i64: 1, 16, 16, 4>}, {transform_indices = @transform_5, window_bounds = array<i64: 1, 2, 4>}]} {
    %c0 = arith.constant 0 : index
    %c0_0 = arith.constant 0 : index
    %c0_1 = arith.constant 0 : index
    %c0_2 = arith.constant 0 : index
    %0 = vector.load %arg1[%c0, %c0_0, %c0_1, %c0_2] : memref<1x16x16x4xf32, #tpu.memory_space<vmem>>, vector<1x16x16x4xf32>
    %1 = vector.shape_cast %0 : vector<1x16x16x4xf32> to vector<16x16x4xf32>
    %c0_3 = arith.constant 0 : index
    %c0_4 = arith.constant 0 : index
    %2 = vector.load %arg2[%c0_3, %c0_4] : memref<1x4xf32, #tpu.memory_space<vmem>>, vector<1x4xf32>
    %3 = vector.shape_cast %2 : vector<1x4xf32> to vector<1x1x4xf32>
    %4 = vector.broadcast %3 : vector<1x1x4xf32> to vector<16x16x4xf32>
    %5 = arith.mulf %1, %4 : vector<16x16x4xf32>
    %c0_5 = arith.constant 0 : index
    %c0_6 = arith.constant 0 : index
    %6 = vector.load %arg3[%c0_5, %c0_6] : memref<1x4xf32, #tpu.memory_space<vmem>>, vector<1x4xf32>
    %7 = vector.shape_cast %6 : vector<1x4xf32> to vector<1x1x4xf32>
    %8 = vector.broadcast %7 : vector<1x1x4xf32> to vector<16x16x4xf32>
    %9 = arith.addf %5, %8 : vector<16x16x4xf32>
    %cst = arith.constant 0.000000e+00 : f32
    %10 = vector.broadcast %cst : f32 to vector<16x16x4xf32>
    %11 = arith.maximumf %9, %10 : vector<16x16x4xf32>
    %12 = vector.extract_strided_slice %11 {offsets = [1, 0, 0], sizes = [1, 16, 4], strides = [1, 1, 1]} : vector<16x16x4xf32> to vector<1x16x4xf32>
    %13 = vector.extract_strided_slice %11 {offsets = [14, 0, 0], sizes = [1, 16, 4], strides = [1, 1, 1]} : vector<16x16x4xf32> to vector<1x16x4xf32>
    %14 = tpu.concatenate %12, %11, %13 in 0 : vector<1x16x4xf32>, vector<16x16x4xf32>, vector<1x16x4xf32> -> vector<18x16x4xf32>
    %15 = vector.extract_strided_slice %14 {offsets = [0, 1, 0], sizes = [18, 1, 4], strides = [1, 1, 1]} : vector<18x16x4xf32> to vector<18x1x4xf32>
    %16 = vector.extract_strided_slice %14 {offsets = [0, 14, 0], sizes = [18, 1, 4], strides = [1, 1, 1]} : vector<18x16x4xf32> to vector<18x1x4xf32>
    %17 = tpu.concatenate %15, %14, %16 in 1 : vector<18x1x4xf32>, vector<18x16x4xf32>, vector<18x1x4xf32> -> vector<18x18x4xf32>
    %18 = vector.extract_strided_slice %17 {offsets = [0, 0, 0], sizes = [16, 16, 4], strides = [1, 1, 1]} : vector<18x18x4xf32> to vector<16x16x4xf32>
    %19 = vector.shape_cast %18 : vector<16x16x4xf32> to vector<256x4xf32>
    %20 = vector.extract_strided_slice %17 {offsets = [0, 1, 0], sizes = [16, 16, 4], strides = [1, 1, 1]} : vector<18x18x4xf32> to vector<16x16x4xf32>
    %21 = vector.shape_cast %20 : vector<16x16x4xf32> to vector<256x4xf32>
    %22 = vector.extract_strided_slice %17 {offsets = [0, 2, 0], sizes = [16, 16, 4], strides = [1, 1, 1]} : vector<18x18x4xf32> to vector<16x16x4xf32>
    %23 = vector.shape_cast %22 : vector<16x16x4xf32> to vector<256x4xf32>
    %24 = vector.extract_strided_slice %17 {offsets = [1, 0, 0], sizes = [16, 16, 4], strides = [1, 1, 1]} : vector<18x18x4xf32> to vector<16x16x4xf32>
    %25 = vector.shape_cast %24 : vector<16x16x4xf32> to vector<256x4xf32>
    %26 = vector.extract_strided_slice %17 {offsets = [1, 1, 0], sizes = [16, 16, 4], strides = [1, 1, 1]} : vector<18x18x4xf32> to vector<16x16x4xf32>
    %27 = vector.shape_cast %26 : vector<16x16x4xf32> to vector<256x4xf32>
    %28 = vector.extract_strided_slice %17 {offsets = [1, 2, 0], sizes = [16, 16, 4], strides = [1, 1, 1]} : vector<18x18x4xf32> to vector<16x16x4xf32>
    %29 = vector.shape_cast %28 : vector<16x16x4xf32> to vector<256x4xf32>
    %30 = vector.extract_strided_slice %17 {offsets = [2, 0, 0], sizes = [16, 16, 4], strides = [1, 1, 1]} : vector<18x18x4xf32> to vector<16x16x4xf32>
    %31 = vector.shape_cast %30 : vector<16x16x4xf32> to vector<256x4xf32>
    %32 = vector.extract_strided_slice %17 {offsets = [2, 1, 0], sizes = [16, 16, 4], strides = [1, 1, 1]} : vector<18x18x4xf32> to vector<16x16x4xf32>
    %33 = vector.shape_cast %32 : vector<16x16x4xf32> to vector<256x4xf32>
    %34 = vector.extract_strided_slice %17 {offsets = [2, 2, 0], sizes = [16, 16, 4], strides = [1, 1, 1]} : vector<18x18x4xf32> to vector<16x16x4xf32>
    %35 = vector.shape_cast %34 : vector<16x16x4xf32> to vector<256x4xf32>
    %cst_7 = arith.constant 0.000000e+00 : f32
    %36 = vector.broadcast %cst_7 : f32 to vector<256x92xf32>
    %37 = tpu.concatenate %19, %21, %23, %25, %27, %29, %31, %33, %35, %36 in 1 : vector<256x4xf32>, vector<256x4xf32>, vector<256x4xf32>, vector<256x4xf32>, vector<256x4xf32>, vector<256x4xf32>, vector<256x4xf32>, vector<256x4xf32>, vector<256x4xf32>, vector<256x92xf32> -> vector<256x128xf32>
    %c0_8 = arith.constant 0 : index
    %c0_9 = arith.constant 0 : index
    %38 = vector.load %arg4[%c0_8, %c0_9] : memref<128x128xf32, #tpu.memory_space<vmem>>, vector<128x128xf32>
    %cst_10 = arith.constant dense<0.000000e+00> : vector<256x128xf32>
    %39 = tpu.matmul %37, %38, %cst_10 {dimension_numbers = #tpu.dot_dimension_numbers<[1], [0], [0], [1], [0, 0, 1, 1], [], []>} : vector<256x128xf32>, vector<128x128xf32>, vector<256x128xf32> -> vector<256x128xf32>
    %40 = vector.extract_strided_slice %39 {offsets = [0, 0], sizes = [256, 4], strides = [1, 1]} : vector<256x128xf32> to vector<256x4xf32>
    %41 = vector.shape_cast %40 : vector<256x4xf32> to vector<1x16x16x4xf32>
    %c0_11 = arith.constant 0 : index
    %c0_12 = arith.constant 0 : index
    %c0_13 = arith.constant 0 : index
    %c0_14 = arith.constant 0 : index
    %42 = vector.load %arg5[%c0_11, %c0_12, %c0_13, %c0_14] : memref<1x16x16x4xf32, #tpu.memory_space<vmem>>, vector<1x16x16x4xf32>
    tpu.vector_store %arg5[%c0_11, %c0_12, %c0_13, %c0_14], %41 {strides = array<i32>} : memref<1x16x16x4xf32, #tpu.memory_space<vmem>>, vector<1x16x16x4xf32>,
    %cst_15 = arith.constant dense<0.000000e+00> : vector<4xf32>
    %43 = vector.multi_reduction <add>, %40, %cst_15 [0] : vector<256x4xf32> to vector<4xf32>
    %44 = vector.shape_cast %43 : vector<4xf32> to vector<1x4xf32>
    %45 = arith.mulf %40, %40 : vector<256x4xf32>
    %cst_16 = arith.constant dense<0.000000e+00> : vector<4xf32>
    %46 = vector.multi_reduction <add>, %45, %cst_16 [0] : vector<256x4xf32> to vector<4xf32>
    %47 = vector.shape_cast %46 : vector<4xf32> to vector<1x4xf32>
    %48 = tpu.concatenate %44, %47 in 0 : vector<1x4xf32>, vector<1x4xf32> -> vector<2x4xf32>
    %49 = vector.shape_cast %48 : vector<2x4xf32> to vector<1x2x4xf32>
    %c0_17 = arith.constant 0 : index
    %c0_18 = arith.constant 0 : index
    %c0_19 = arith.constant 0 : index
    %50 = vector.load %arg6[%c0_17, %c0_18, %c0_19] : memref<1x2x4xf32, #tpu.memory_space<vmem>>, vector<1x2x4xf32>
    tpu.vector_store %arg6[%c0_17, %c0_18, %c0_19], %49 {strides = array<i32>} : memref<1x2x4xf32, #tpu.memory_space<vmem>>, vector<1x2x4xf32>,
    return
  }
  func.func @transform_0(%arg0: i32) -> (i32, i32, i32, i32) {
    %c0_i32 = arith.constant 0 : i32
    %c0_i32_0 = arith.constant 0 : i32
    %c0_i32_1 = arith.constant 0 : i32
    %c0_i32_2 = arith.constant 0 : i32
    return %arg0, %c0_i32, %c0_i32_0, %c0_i32_1 : i32, i32, i32, i32
  }
  func.func @transform_1(%arg0: i32) -> (i32, i32) {
    %c0_i32 = arith.constant 0 : i32
    %c0_i32_0 = arith.constant 0 : i32
    %c0_i32_1 = arith.constant 0 : i32
    return %c0_i32, %c0_i32_0 : i32, i32
  }
  func.func @transform_2(%arg0: i32) -> (i32, i32) {
    %c0_i32 = arith.constant 0 : i32
    %c0_i32_0 = arith.constant 0 : i32
    %c0_i32_1 = arith.constant 0 : i32
    return %c0_i32, %c0_i32_0 : i32, i32
  }
  func.func @transform_3(%arg0: i32) -> (i32, i32) {
    %c0_i32 = arith.constant 0 : i32
    %c0_i32_0 = arith.constant 0 : i32
    %c0_i32_1 = arith.constant 0 : i32
    return %c0_i32, %c0_i32_0 : i32, i32
  }
  func.func @transform_4(%arg0: i32) -> (i32, i32, i32, i32) {
    %c0_i32 = arith.constant 0 : i32
    %c0_i32_0 = arith.constant 0 : i32
    %c0_i32_1 = arith.constant 0 : i32
    %c0_i32_2 = arith.constant 0 : i32
    return %arg0, %c0_i32, %c0_i32_0, %c0_i32_1 : i32, i32, i32, i32
  }
  func.func @transform_5(%arg0: i32) -> (i32, i32, i32) {
    %c0_i32 = arith.constant 0 : i32
    %c0_i32_0 = arith.constant 0 : i32
    %c0_i32_1 = arith.constant 0 : i32
    return %arg0, %c0_i32, %c0_i32_0 : i32, i32, i32
  }
}

</mosaic_0001>

<bundles_post_ra>
// kernel: res_block_forward.5
= control target key start
LH: loop header
LB: loop body
LE: loop exit
PB: predicated region body
PF: predicated region fallthrough
CT: control target
= control target key end

     0   :  { %s638_s15 = smov 0   ;;  %s640_s16 = smov 0   ;;  %s773_s0 = inlined_call_operand.vmem [shape: f32[2,16,16,4], index: 0, kind: input, shape index: {}]   ;;  %s774_s1 = inlined_call_operand.vmem [shape: f32[1,4], index: 1, kind: input, shape index: {}]   ;;  %s775_s2 = inlined_call_operand.vmem [shape: f32[1,4], index: 2, kind: input, shape index: {}]   ;;  %s776_s3 = inlined_call_operand.vmem [shape: f32[2,16,16,4], index: 3, kind: input, shape index: {}, may-alias: {3,4}]   ;;  %s777_s4 = inlined_call_operand.vmem [shape: f32[2,16,16,4], index: 4, kind: output, shape index: {}, may-alias: {3,4}]  }
   0x1   :  { %s642_s17 = smov 0   ;;  %s644_s18 = smov 0  }
   0x2   :  { %s646_s19 = smov 0  }
   0x3 LB: > { %s23_s20 = sadd.s32 1, %s603_s17  ;;  %s26_s21 = sadd.s32 1, %s607_s18  ;;  %s611_s19 = sphi %s646_s19, %s14_s19   ;;  %s607_s18 = sphi %s644_s18, %s781_s18   ;;  %s603_s17 = sphi %s642_s17, %s780_s17   ;;  %s599_s16 = sphi %s640_s16, %s779_s16   ;;  %s595_s15 = sphi %s638_s15, %s778_s15  }
   0x4   : > { %p24_p0 = scmp.ge.s32.totalorder %s23_s20, 2  ;;  %p516_p1 = scmp.ge.s32.totalorder %s611_s19, 1 }
   0x5   : > { %p202_p2 = scmp.lt.s32.totalorder %s611_s19, 5 }
   0x6   : > { %s783_s20 = smov (%p24_p0, %s23_s20), 0  ;;  %s785_s21 = smov (!%p24_p0, %s26_s21), %s607_s18 }
   0x7   : > { %p203_p3 = pnand %p516_p1, %p202_p2  ;;  %p28_p4 = scmp.ge.s32.totalorder %s785_s21, 2 }
   0x8   : > { %s517_s22 = sshll.u32 (!%p203_p3), %s595_s15, 3  ;;  %p249_p5 = scmp.lt.s32.totalorder (!%p203_p3), %s599_s16, 1 }
   0x9   : > { %s787_s21 = smov (%p28_p4, %s785_s21), 0  ;;  %206 = sbr.rel (%p203_p3) target bundleno = 39 (0x27), region = 36 }
   0xa   : > { %p251_p6 = scmp.lt.s32.totalorder (!%p203_p3), %s517_s22, 15 }
   0xe   : > { %s789_s16 = smov (!%p249_p5, %s599_s16), 1  ;;  %s791_s22 = smov (!%p251_p6, %s517_s22), 15  ;;  %v529_v0 = vld [vmem:[%s774_s1] ss:$0 sm:$0xff]  ;;  %vm375_vm0 = vcmask 31744  }
   0xf   : > { %s519_s23 = sshll.u32 %s789_s16, 5  ;;  %s518_s24 = sshll.u32 %s791_s22, 1  ;;  %v530_v1 = vld [vmem:[%s775_s2] ss:$0 sm:$0xff] }
  0x10   : > { %s255_s25 = sadd.s32 %s519_s23, %s518_s24 }
  0x11   : > { %s668_s26 = sshll.u32 %s255_s25, 3 }
  0x12   : > { %s677_s5 = scalar_lea.vmem %s773_s0, %s668_s26  ;;  %s692_s10 = scalar_lea.vmem %s776_s3, %s668_s26 }
  0x13   : > { %v281_v2 = vld [vmem:[%s677_s5] sm:$0xff]  ;;  %v282_v3 = vld [vmem:[%s677_s5 + $0x8] sm:$0xff]  ;;  %v283_v4 = vld [vmem:[%s677_s5 + $0x10] sm:$0xff]  ;;  %s716_s13 = scalar_lea.vmem %s777_s4, %s668_s26 }
  0x14   : > { %v284_v5 = vld [vmem:[%s677_s5 + $0x18] sm:$0xff]  ;;  %v285_v6 = vld [vmem:[%s677_s5 + $0x20] sm:$0xff]  ;;  %v286_v7 = vld [vmem:[%s677_s5 + $0x28] sm:$0xff]  ;;  %v304_v8 = vmul.f32 %v529_v0, %v281_v2  ;;  %v305_v9 = vmul.f32 %v529_v0, %v282_v3  ;;  %v306_v10 = vmul.f32 %v529_v0, %v283_v4 }
  0x15   : > { %v287_v11 = vld [vmem:[%s677_s5 + $0x30] sm:$0xff]  ;;  %v288_v12 = vld [vmem:[%s677_s5 + $0x38] sm:$0xff]  ;;  %v289_v13 = vld [vmem:[%s677_s5 + $0x40] sm:$0xff]  ;;  %v307_v14 = vmul.f32 %v529_v0, %v284_v5  ;;  %v308_v15 = vmul.f32 %v529_v0, %v285_v6  ;;  %v309_v16 = vmul.f32 %v529_v0, %v286_v7 }
  0x16   : > { %v290_v17 = vld [vmem:[%s677_s5 + $0x48] sm:$0xff]  ;;  %v291_v18 = vld [vmem:[%s677_s5 + $0x50] sm:$0xff]  ;;  %v292_v19 = vld [vmem:[%s677_s5 + $0x58] sm:$0xff]  ;;  %v310_v20 = vmul.f32 %v529_v0, %v287_v11  ;;  %v311_v21 = vmul.f32 %v529_v0, %v288_v12  ;;  %v312_v22 = vmul.f32 %v529_v0, %v289_v13  ;;  %v327_v23 = vadd.f32 %v530_v1, %v304_v8 }
  0x17   : > { %v293_v24 = vld [vmem:[%s677_s5 + $0x60] sm:$0xff]  ;;  %v294_v25 = vld [vmem:[%s677_s5 + $0x68] sm:$0xff]  ;;  %v295_v26 = vld [vmem:[%s677_s5 + $0x70] sm:$0xff]  ;;  %v313_v27 = vmul.f32 %v529_v0, %v290_v17  ;;  %v314_v28 = vmul.f32 %v529_v0, %v291_v18  ;;  %v315_v29 = vmul.f32 %v529_v0, %v292_v19  ;;  %v328_v30 = vadd.f32 %v530_v1, %v305_v9 }
  0x18   : > { %v296_v31 = vld [vmem:[%s677_s5 + $0x78] sm:$0xff]  ;;  %v316_v32 = vmul.f32 %v529_v0, %v293_v24  ;;  %v317_v33 = vmul.f32 %v529_v0, %v294_v25  ;;  %v318_v34 = vmul.f32 %v529_v0, %v295_v26  ;;  %v329_v35 = vadd.f32 %v530_v1, %v306_v10  ;;  %v343_v36 = vld [vmem:[%s692_s10] sm:$0xff]  ;;  %v344_v37 = vld [vmem:[%s692_s10 + $0x8] sm:$0xff] }
  0x19   : > { %v319_v38 = vmul.f32 %v529_v0, %v296_v31  ;;  %v330_v39 = vadd.f32 %v530_v1, %v307_v14  ;;  %v331_v40 = vadd.f32 %v530_v1, %v308_v15  ;;  %v332_v41 = vadd.f32 %v530_v1, %v309_v16  ;;  %v345_v42 = vld [vmem:[%s692_s10 + $0x10] sm:$0xff]  ;;  %v346_v43 = vld [vmem:[%s692_s10 + $0x18] sm:$0xff]  ;;  %v347_v44 = vld [vmem:[%s692_s10 + $0x20] sm:$0xff] }
  0x1a   : > { %v333_v45 = vadd.f32 %v530_v1, %v310_v20  ;;  %v334_v46 = vadd.f32 %v530_v1, %v311_v21  ;;  %v335_v47 = vadd.f32 %v530_v1, %v312_v22  ;;  %v336_v48 = vadd.f32 %v530_v1, %v313_v27  ;;  %v348_v49 = vld [vmem:[%s692_s10 + $0x28] sm:$0xff]  ;;  %v349_v50 = vld [vmem:[%s692_s10 + $0x30] sm:$0xff]  ;;  %v350_v51 = vld [vmem:[%s692_s10 + $0x38] sm:$0xff] }
  0x1b   : > { %v337_v52 = vadd.f32 %v530_v1, %v314_v28  ;;  %v338_v53 = vadd.f32 %v530_v1, %v315_v29  ;;  %v339_v54 = vadd.f32 %v530_v1, %v316_v32  ;;  %v340_v55 = vadd.f32 %v530_v1, %v317_v33  ;;  %v351_v56 = vld [vmem:[%s692_s10 + $0x40] sm:$0xff]  ;;  %v352_v57 = vld [vmem:[%s692_s10 + $0x48] sm:$0xff]  ;;  %v353_v58 = vld [vmem:[%s692_s10 + $0x50] sm:$0xff] }
  0x1c   : > { %v341_v59 = vadd.f32 %v530_v1, %v318_v34  ;;  %v342_v60 = vadd.f32 %v530_v1, %v319_v38  ;;  %v354_v61 = vld [vmem:[%s692_s10 + $0x58] sm:$0xff]  ;;  %v355_v62 = vld [vmem:[%s692_s10 + $0x60] sm:$0xff]  ;;  %v356_v63 = vld [vmem:[%s692_s10 + $0x68] sm:$0xff]  ;;  %v359_v0 = vadd.f32 %v343_v36, %v327_v23  ;;  %v360_v2 = vadd.f32 %v344_v37, %v328_v30 }
  0x1d   : > { %v357_v3 = vld [vmem:[%s692_s10 + $0x70] sm:$0xff]  ;;  %v358_v4 = vld [vmem:[%s692_s10 + $0x78] sm:$0xff]  ;;  %v361_v5 = vadd.f32 %v345_v42, %v329_v35  ;;  %v362_v6 = vadd.f32 %v346_v43, %v330_v39  ;;  %v363_v7 = vadd.f32 %v347_v44, %v331_v40  ;;  %v364_v8 = vadd.f32 %v348_v49, %v332_v41 }
  0x1e   : > { %v365_v9 = vadd.f32 %v349_v50, %v333_v45  ;;  %v366_v1 = vadd.f32 %v350_v51, %v334_v46  ;;  %v367_v10 = vadd.f32 %v351_v56, %v335_v47  ;;  %v368_v11 = vadd.f32 %v352_v57, %v336_v48  ;;  %376 = vst.msk [vmem:[%s716_s13] sm:$0xff] %vm375_vm0, %v359_v0 }
  0x1f   : > { %377 = vst.msk [vmem:[%s716_s13 + $0x8] sm:$0xff] %vm375_vm0, %v360_v2  ;;  %v369_v12 = vadd.f32 %v353_v58, %v337_v52  ;;  %v370_v13 = vadd.f32 %v354_v61, %v338_v53  ;;  %v371_v14 = vadd.f32 %v355_v62, %v339_v54  ;;  %v372_v15 = vadd.f32 %v356_v63, %v340_v55 }
  0x20   : > { %378 = vst.msk [vmem:[%s716_s13 + $0x10] sm:$0xff] %vm375_vm0, %v361_v5  ;;  %379 = vst.msk [vmem:[%s716_s13 + $0x18] sm:$0xff] %vm375_vm0, %v362_v6  ;;  %v373_v16 = vadd.f32 %v357_v3, %v341_v59  ;;  %v374_v17 = vadd.f32 %v358_v4, %v342_v60 }
  0x21   : > { %380 = vst.msk [vmem:[%s716_s13 + $0x20] sm:$0xff] %vm375_vm0, %v363_v7  ;;  %381 = vst.msk [vmem:[%s716_s13 + $0x28] sm:$0xff] %vm375_vm0, %v364_v8 }
  0x22   : > { %382 = vst.msk [vmem:[%s716_s13 + $0x30] sm:$0xff] %vm375_vm0, %v365_v9  ;;  %383 = vst.msk [vmem:[%s716_s13 + $0x38] sm:$0xff] %vm375_vm0, %v366_v1 }
  0x23   : > { %384 = vst.msk [vmem:[%s716_s13 + $0x40] sm:$0xff] %vm375_vm0, %v367_v10  ;;  %385 = vst.msk [vmem:[%s716_s13 + $0x48] sm:$0xff] %vm375_vm0, %v368_v11 }
  0x24   : > { %386 = vst.msk [vmem:[%s716_s13 + $0x50] sm:$0xff] %vm375_vm0, %v369_v12  ;;  %387 = vst.msk [vmem:[%s716_s13 + $0x58] sm:$0xff] %vm375_vm0, %v370_v13 }
  0x25   : > { %388 = vst.msk [vmem:[%s716_s13 + $0x60] sm:$0xff] %vm375_vm0, %v371_v14  ;;  %389 = vst.msk [vmem:[%s716_s13 + $0x68] sm:$0xff] %vm375_vm0, %v372_v15 }
  0x26   : > { %390 = vst.msk [vmem:[%s716_s13 + $0x70] sm:$0xff] %vm375_vm0, %v373_v16  ;;  %391 = vst.msk [vmem:[%s716_s13 + $0x78] sm:$0xff] %vm375_vm0, %v374_v17 }
  0x27 PF: > { %s14_s19 = sadd.s32 1, %s611_s19   ;;  %s778_s15 = smov %s603_s17 }
  0x28   : > { %p11_p7 = scmp.ge.s32.totalorder %s14_s19, 6   ;;  %s779_s16 = smov %s607_s18 }
  0x29   : > { %s780_s17 = smov %s783_s20  ;;  %s781_s18 = smov %s787_s21 }
  0x2a   :  { %13 = sbr.rel (!%p11_p7) target bundleno = 3 (0x3), region = 69 }

// kernel: res_block_forward.3
= control target key start
LH: loop header
LB: loop body
LE: loop exit
PB: predicated region body
PF: predicated region fallthrough
CT: control target
= control target key end

     0   :  { %s2453_s12 = smov 0   ;;  %s4181_s0 = inlined_call_operand.vmem [shape: f32[2,16,16,4], index: 0, kind: input, shape index: {}]   ;;  %s4182_s1 = inlined_call_operand.vmem [shape: f32[128,128], index: 1, kind: input, shape index: {}]   ;;  %s4183_s2 = inlined_call_operand.vmem [shape: f32[2,16,16,4], index: 2, kind: output, shape index: {0}]   ;;  %s4184_s3 = inlined_call_operand.vmem [shape: f32[2,2,4], index: 3, kind: output, shape index: {1}]  }
   0x1 LB: > { %s2195_s13 = sadd.s32 4294967295, %s2423_s12   ;;  %p2199_p0 = scmp.ge.s32.totalorder %s2423_s12, 1  ;;  %s2423_s12 = sphi %s2453_s12, %s14_s12  }
   0x2   : > { %p140_p1 = scmp.lt.s32.totalorder %s2423_s12, 3 }
   0x4   : > { %p141_p2 = pnand %p2199_p0, %p140_p1 }
   0x6   : > { %144 = sbr.rel (%p141_p2) target bundleno = 847 (0x34f), region = 28 }
   0xb   : > { %p168_p3 = scmp.lt.s32.totalorder %s2195_s13, 1  ;;  %vm278_vm0 = vcmask 1040384   ;;  %vm468_vm1 = vcmask 1046528   ;;  %s2425_s18 = smov 4   ;;  %vm544_vm2 = vcmask 1045504   ;;  %vm1370_vm3 = vcmask 31744  }
   0xc   : > { %s2426_s19 = smov 8   ;;  %s2427_s20 = smov 12   ;;  %vm1401_vm4 = vcmask 64512   ;;  %vm1432_vm5 = vcmask 97280   ;;  %vm1465_vm6 = vcmask 130048   ;;  %vm1498_vm7 = vcmask 162816  }
   0xd   : > { %s4479_s13 = smov (!%p168_p3, %s2195_s13), 1  ;;  %s2428_s21 = smov 16   ;;  %vm1531_vm8 = vcmask 195584   ;;  %vm1564_vm9 = vcmask 228352   ;;  %vm1597_vm10 = vcmask 261120   ;;  %vm1630_vm11 = vcmask 293888  }
   0xe   : > { %s2239_s14 = sshll.u32 %s4479_s13, 8  ;;  %s2429_s26 = smov 20   ;;  %vm2107_vm12 = vcmask 25600  }
   0xf   : > { %s2469_s17 = scalar_lea.vmem %s4181_s0, %s2239_s14  ;;  %s2430_s4 = smov 24  }
  0x10   : > { %v184_v0 = vld [vmem:[%s2469_s17 + $0x10] sm:$0xff]  ;;  %v185_v1 = vld [vmem:[%s2469_s17 + $0x18] sm:$0xff]  ;;  %v182_v2 = vld [vmem:[%s2469_s17] sm:$0xff]  ;;  %s2431_s7 = smov 28   ;;  %s2432_s8 = smov 32  }
  0x11   : > { %v230_v3 = vrot.slane %v184_v0, 1  ;;  %v279_v4 = vrot.slane %v184_v0, 7  ;;  %v280_v5 = vrot.slane %v185_v1, 7  ;;  %v183_v6 = vld [vmem:[%s2469_s17 + $0x8] sm:$0xff]  ;;  %v231_v7 = vrot.slane %v182_v2, 1  ;;  %v186_v8 = vld [vmem:[%s2469_s17 + $0x20] sm:$0xff]  ;;  %s3858_s9 = scalar_lea.vmem %s4183_s2, %s2239_s14 }
  0x12   : > { %v282_v9 = vrot.slane %v182_v2, 7  ;;  %v283_v10 = vrot.slane %v183_v6, 7  ;;  %v374_v11 = vrot.slane %v185_v1, 5  ;;  %v375_v12 = vrot.slane %v183_v6, 5  ;;  %v187_v15 = vld [vmem:[%s2469_s17 + $0x28] sm:$0xff]  ;;  %v188_v22 = vld [vmem:[%s2469_s17 + $0x30] sm:$0xff] }
  0x13   : > { %v2477_v13 = vsel %vm278_vm0, %v279_v4, %v280_v5  ;;  %v2480_v14 = vsel %vm278_vm0, %v230_v3, %v279_v4  ;;  %v232_v16 = vrot.slane %v186_v8, 1  ;;  %v285_v17 = vrot.slane %v186_v8, 7  ;;  %v189_v31 = vld [vmem:[%s2469_s17 + $0x38] sm:$0xff]  ;;  %v190_v36 = vld [vmem:[%s2469_s17 + $0x40] sm:$0xff]  ;;  %v191_v41 = vld [vmem:[%s2469_s17 + $0x48] sm:$0xff]  ;;  %s2204_s14 = sshll.u32 %s4479_s13, 1 }
  0x14   : > { %v469_v18 = vrot.slane %v2480_v14, 1  ;;  %v470_v19 = vrot.slane %v2477_v13, 1  ;;  %v2486_v20 = vsel %vm278_vm0, %v282_v9, %v283_v10  ;;  %v2489_v21 = vsel %vm278_vm0, %v231_v7, %v282_v9  ;;  %v192_v54 = vld [vmem:[%s2469_s17 + $0x50] sm:$0xff]  ;;  %v193_v59 = vld [vmem:[%s2469_s17 + $0x58] sm:$0xff]  ;;  %v194_v0 = vld [vmem:[%s2469_s17 + $0x60] sm:$0xff]  ;;  %s181_s15 = scalar_lea.vmem %s4184_s3, %s2204_s14 }
  0x15   : > { %v474_v23 = vrot.slane %v2489_v21, 1  ;;  %v475_v24 = vrot.slane %v2486_v20, 1  ;;  %v2495_v25 = vsel %vm278_vm0, %v280_v5, %v374_v11  ;;  %v2498_v26 = vsel %vm278_vm0, %v283_v10, %v375_v12  ;;  %v195_v4 = vld [vmem:[%s2469_s17 + $0x68] sm:$0xff] }
  0x16   : > { %v2501_v27 = vsel %vm468_vm1, %v469_v18, %v470_v19  ;;  %v472_v28 = vrot.slane %v2495_v25, 1  ;;  %v477_v29 = vrot.slane %v2498_v26, 1  ;;  %v286_v30 = vrot.slane %v187_v15, 7 }
  0x17   : > { %632 = vrot.lane.b32.xlu0 %v2501_v27, %s2425_s18  ;;  %v2509_v32 = vsel %vm468_vm1, %v474_v23, %v475_v24  ;;  %v2512_v33 = vsel %vm278_vm0, %v232_v16, %v285_v17  ;;  %v376_v34 = vrot.slane %v187_v15, 5  ;;  %v233_v35 = vrot.slane %v188_v22, 1  ;;  %v197_v23 = vld [vmem:[%s2469_s17 + $0x78] sm:$0xff] }
  0x18   : > { %636 = vrot.lane.b32.xlu1 %v2509_v32, %s2425_s18  ;;  %v2518_v37 = vsel %vm468_vm1, %v470_v19, %v472_v28  ;;  %v2521_v38 = vsel %vm468_vm1, %v475_v24, %v477_v29  ;;  %v2524_v39 = vsel %vm278_vm0, %v285_v17, %v286_v30  ;;  %v479_v40 = vrot.slane %v2512_v33, 1 }
  0x19   : > { %v480_v42 = vrot.slane %v2524_v39, 1  ;;  %v2530_v43 = vsel %vm278_vm0, %v286_v30, %v376_v34  ;;  %v288_v44 = vrot.slane %v188_v22, 7  ;;  %v289_v45 = vrot.slane %v189_v31, 7  ;;  %v196_v22 = vld [vmem:[%s2469_s17 + $0x70] sm:$0xff]  ;;  %v198_v30 = vld [vmem:[%s2469_s17 + $0x80] sm:$0xff] }
  0x1a   : > { %v482_v46 = vrot.slane %v2530_v43, 1  ;;  %v377_v47 = vrot.slane %v189_v31, 5  ;;  %v234_v48 = vrot.slane %v190_v36, 1  ;;  %v291_v49 = vrot.slane %v190_v36, 7 }
  0x1b   : > { %634 = vrot.lane.b32.xlu0 %v2518_v37, %s2425_s18  ;;  %v2536_v50 = vsel %vm468_vm1, %v479_v40, %v480_v42  ;;  %v2539_v51 = vsel %vm278_vm0, %v288_v44, %v289_v45  ;;  %v2542_v52 = vsel %vm278_vm0, %v233_v35, %v288_v44  ;;  %v292_v53 = vrot.slane %v191_v41, 7  ;;  %v199_v40 = vld [vmem:[%s2469_s17 + $0x88] sm:$0xff] }
  0x1c   : > { %638 = vrot.lane.b32.xlu1 %v2521_v38, %s2425_s18  ;;  %v2548_v55 = vsel %vm468_vm1, %v480_v42, %v482_v46  ;;  %v484_v56 = vrot.slane %v2542_v52, 1  ;;  %v485_v57 = vrot.slane %v2539_v51, 1  ;;  %v2553_v58 = vsel %vm278_vm0, %v289_v45, %v377_v47 }
  0x1d   : > { %4280 = vst [vmem:[#allocation2_spill] sm:$0xff] %v2548_v55  ;;  %v487_v60 = vrot.slane %v2553_v58, 1  ;;  %v2558_v61 = vsel %vm278_vm0, %v291_v49, %v292_v53  ;;  %v2561_v62 = vsel %vm278_vm0, %v234_v48, %v291_v49  ;;  %v378_v63 = vrot.slane %v191_v41, 5 }
  0x1e   : > { %4281 = vst [vmem:[#allocation3_spill] sm:$0xff] %v2558_v61  ;;  %v2565_v1 = vsel %vm468_vm1, %v484_v56, %v485_v57  ;;  %v489_v2 = vrot.slane %v2561_v62, 1  ;;  %v235_v3 = vrot.slane %v192_v54, 1  ;;  %v490_v5 = vrot.slane %v2558_v61, 1 }
  0x1f   : > { %4282 = vst [vmem:[#allocation4_spill] sm:$0xff] %v2565_v1  ;;  %640 = vrot.lane.b32.xlu0 %v2536_v50, %s2425_s18  ;;  %v2573_v6 = vsel %vm278_vm0, %v292_v53, %v378_v63  ;;  %v294_v7 = vrot.slane %v192_v54, 7  ;;  %v295_v8 = vrot.slane %v193_v59, 7  ;;  %v2578_v9 = vsel %vm468_vm1, %v485_v57, %v487_v60  ;;  %v201_v60 = vld [vmem:[%s2469_s17 + $0x98] sm:$0xff] }
  0x20   : > { %642 = vrot.lane.b32.xlu1 %v2548_v55, %s2425_s18  ;;  %4283 = vst [vmem:[#allocation5_spill] sm:$0xff] %v2578_v9  ;;  %v492_v10 = vrot.slane %v2573_v6, 1  ;;  %v379_v11 = vrot.slane %v193_v59, 5  ;;  %v236_v12 = vrot.slane %v194_v0, 1  ;;  %v297_v17 = vrot.slane %v194_v0, 7  ;;  %v200_v59 = vld [vmem:[%s2469_s17 + $0x90] sm:$0xff] }
  0x21   : > { %v2582_v15 = vsel %vm278_vm0, %v294_v7, %v295_v8  ;;  %v2585_v16 = vsel %vm278_vm0, %v235_v3, %v294_v7  ;;  %v298_v18 = vrot.slane %v195_v4, 7  ;;  %v2595_v24 = vsel %vm468_vm1, %v489_v2, %v490_v5 }
  0x22   : > { %4284 = vst [vmem:[#allocation6_spill] sm:$0xff] %v2582_v15  ;;  %4285 = vst [vmem:[#allocation7_spill] sm:$0xff] %v2585_v16  ;;  %v2588_v19 = vsel %vm278_vm0, %v295_v8, %v379_v11  ;;  %v2598_v28 = vsel %vm468_vm1, %v490_v5, %v492_v10  ;;  %v380_v29 = vrot.slane %v195_v4, 5  ;;  %v494_v31 = vrot.slane %v2585_v16, 1 }
  0x23   : > { %644 = vrot.lane.b32.xlu0 %v2565_v1, %s2425_s18  ;;  %4286 = vst [vmem:[#allocation8_spill] sm:$0xff] %v2595_v24  ;;  %4287 = vst [vmem:[#allocation9_spill] sm:$0xff] %v2598_v28  ;;  %v495_v34 = vrot.slane %v2582_v15, 1  ;;  %v497_v35 = vrot.slane %v2588_v19, 1  ;;  %v2607_v36 = vsel %vm278_vm0, %v297_v17, %v298_v18  ;;  %v2611_v41 = vsel %vm278_vm0, %v236_v12, %v297_v17  ;;  %v202_v17 = vld [vmem:[%s2469_s17 + $0xa0] sm:$0xff] }
  0x24   : > { %646 = vrot.lane.b32.xlu1 %v2578_v9, %s2425_s18  ;;  %4288 = vst [vmem:[#allocation10_spill] sm:$0xff] %v2607_v36  ;;  %4289 = vst [vmem:[#allocation11_spill] sm:$0xff] %v2611_v41  ;;  %v237_v42 = vrot.slane %v196_v22, 1  ;;  %v300_v44 = vrot.slane %v196_v22, 7  ;;  %v301_v45 = vrot.slane %v197_v23, 7  ;;  %v2614_v46 = vsel %vm278_vm0, %v298_v18, %v380_v29  ;;  %v203_v29 = vld [vmem:[%s2469_s17 + $0xa8] sm:$0xff] }
  0x25   : > { %v381_v47 = vrot.slane %v197_v23, 5  ;;  %v238_v48 = vrot.slane %v198_v30, 1  ;;  %v303_v49 = vrot.slane %v198_v30, 7  ;;  %v304_v53 = vrot.slane %v199_v40, 7  ;;  %v210_v9 = vld [vmem:[%s2469_s17 + $0xe0] sm:$0xff] }
  0x26   : > { %v2621_v54 = vsel %vm468_vm1, %v494_v31, %v495_v34  ;;  %v499_v56 = vrot.slane %v2611_v41, 1  ;;  %v500_v57 = vrot.slane %v2607_v36, 1  ;;  %v2628_v63 = vsel %vm468_vm1, %v495_v34, %v497_v35 }
  0x27   : > { %648 = vrot.lane.b32.xlu0 %v2595_v24, %s2425_s18  ;;  %4290 = vst [vmem:[#allocation12_spill] sm:$0xff] %v2621_v54  ;;  %4291 = vst [vmem:[#allocation13_spill] sm:$0xff] %v2628_v63  ;;  %v502_v0 = vrot.slane %v2614_v46, 1  ;;  %v2632_v2 = vsel %vm278_vm0, %v300_v44, %v301_v45  ;;  %v2635_v3 = vsel %vm278_vm0, %v237_v42, %v300_v44  ;;  %v382_v7 = vrot.slane %v199_v40, 5  ;;  %v209_v24 = vld [vmem:[%s2469_s17 + $0xd8] sm:$0xff] }
  0x28   : > { %650 = vrot.lane.b32.xlu1 %v2598_v28, %s2425_s18  ;;  %v2638_v4 = vsel %vm278_vm0, %v301_v45, %v381_v47  ;;  %v2641_v5 = vsel %vm278_vm0, %v238_v48, %v303_v49  ;;  %v2646_v8 = vsel %vm278_vm0, %v303_v49, %v304_v53  ;;  %v239_v10 = vrot.slane %v200_v59, 1  ;;  %v208_v28 = vld [vmem:[%s2469_s17 + $0xd0] sm:$0xff] }
  0x29   : > { %4292 = vst [vmem:[#allocation14_spill] sm:$0xff] %v2646_v8  ;;  %v306_v11 = vrot.slane %v200_v59, 7  ;;  %v307_v12 = vrot.slane %v201_v60, 7  ;;  %v2652_v18 = vsel %vm468_vm1, %v499_v56, %v500_v57  ;;  %v504_v22 = vrot.slane %v2635_v3, 1 }
  0x2a   : > { %4293 = vst [vmem:[#allocation15_spill] sm:$0xff] %v2652_v18  ;;  %v505_v23 = vrot.slane %v2632_v2, 1  ;;  %v2658_v30 = vsel %vm468_vm1, %v500_v57, %v502_v0  ;;  %v507_v31 = vrot.slane %v2638_v4, 1  ;;  %v509_v34 = vrot.slane %v2641_v5, 1  ;;  %v205_v0 = vld [vmem:[%s2469_s17 + $0xb8] sm:$0xff] }
  0x2b   : > { %652 = vrot.lane.b32.xlu0 %v2621_v54, %s2425_s18  ;;  %4294 = vst [vmem:[#allocation16_spill] sm:$0xff] %v2658_v30  ;;  %v510_v35 = vrot.slane %v2646_v8, 1  ;;  %v2664_v40 = vsel %vm278_vm0, %v304_v53, %v382_v7  ;;  %v383_v42 = vrot.slane %v201_v60, 5  ;;  %v240_v44 = vrot.slane %v202_v17, 1  ;;  %v204_v60 = vld [vmem:[%s2469_s17 + $0xb0] sm:$0xff] }
  0x2c   : > { %654 = vrot.lane.b32.xlu1 %v2628_v63, %s2425_s18  ;;  %v2669_v45 = vsel %vm278_vm0, %v306_v11, %v307_v12  ;;  %v2672_v47 = vsel %vm278_vm0, %v239_v10, %v306_v11  ;;  %v309_v48 = vrot.slane %v202_v17, 7  ;;  %v310_v49 = vrot.slane %v203_v29, 7  ;;  %v207_v63 = vld [vmem:[%s2469_s17 + $0xc8] sm:$0xff] }
  0x2d   : > { %4295 = vst [vmem:[#allocation17_spill] sm:$0xff] %v2669_v45  ;;  %v2677_v56 = vsel %vm468_vm1, %v504_v22, %v505_v23  ;;  %v384_v53 = vrot.slane %v203_v29, 5  ;;  %v2680_v57 = vsel %vm468_vm1, %v505_v23, %v507_v31  ;;  %v512_v59 = vrot.slane %v2664_v40, 1 }
  0x2e   : > { %4296 = vst [vmem:[#allocation18_spill] sm:$0xff] %v2677_v56  ;;  %4297 = vst [vmem:[#allocation19_spill] sm:$0xff] %v2680_v57  ;;  %v514_v7 = vrot.slane %v2672_v47, 1  ;;  %v515_v10 = vrot.slane %v2669_v45, 1  ;;  %v2688_v11 = vsel %vm278_vm0, %v307_v12, %v383_v42  ;;  %v2693_v17 = vsel %vm468_vm1, %v509_v34, %v510_v35 }
  0x2f   : > { %656 = vrot.lane.b32.xlu0 %v2652_v18, %s2425_s18  ;;  %4298 = vst [vmem:[#allocation20_spill] sm:$0xff] %v2693_v17  ;;  %v2696_v22 = vsel %vm278_vm0, %v309_v48, %v310_v49  ;;  %v2699_v23 = vsel %vm278_vm0, %v240_v44, %v309_v48  ;;  %v2704_v29 = vsel %vm278_vm0, %v310_v49, %v384_v53  ;;  %v241_v12 = vrot.slane %v204_v60, 1 }
  0x30   : > { %658 = vrot.lane.b32.xlu1 %v2658_v30, %s2425_s18  ;;  %4299 = vst [vmem:[#allocation21_spill] sm:$0xff] %v2696_v22  ;;  %v312_v31 = vrot.slane %v204_v60, 7  ;;  %v313_v42 = vrot.slane %v205_v0, 7  ;;  %v206_v30 = vld [vmem:[%s2469_s17 + $0xc0] sm:$0xff]  ;;  %v517_v34 = vrot.slane %v2688_v11, 1  ;;  %v385_v18 = vrot.slane %v205_v0, 5 }
  0x31   : > { %v2713_v44 = vsel %vm468_vm1, %v514_v7, %v515_v10  ;;  %v519_v48 = vrot.slane %v2699_v23, 1  ;;  %v520_v49 = vrot.slane %v2696_v22, 1  ;;  %v522_v53 = vrot.slane %v2704_v29, 1 }
  0x32   : > { %4301 = vst [vmem:[#allocation23_spill] sm:$0xff] %v2713_v44  ;;  %v2726_v60 = vsel %vm278_vm0, %v241_v12, %v312_v31  ;;  %v315_v0 = vrot.slane %v206_v30, 7  ;;  %v316_v7 = vrot.slane %v207_v63, 7  ;;  %v386_v54 = vrot.slane %v207_v63, 5 }
  0x33   : > { %660 = vrot.lane.b32.xlu0 %v2677_v56, %s2425_s18  ;;  %v2708_v56 = vsel %vm468_vm1, %v510_v35, %v512_v59  ;;  %v242_v35 = vrot.slane %v206_v30, 1  ;;  %v2723_v59 = vsel %vm278_vm0, %v312_v31, %v313_v42  ;;  %v524_v30 = vrot.slane %v2726_v60, 1 }
  0x34   : > { %662 = vrot.lane.b32.xlu1 %v2680_v57, %s2425_s18  ;;  %4300 = vst [vmem:[#allocation22_spill] sm:$0xff] %v2708_v56  ;;  %4302 = vst [vmem:[#allocation24_spill] sm:$0xff] %v2723_v59  ;;  %v2732_v57 = vsel %vm278_vm0, %v313_v42, %v385_v18  ;;  %v525_v12 = vrot.slane %v2723_v59, 1  ;;  %v2746_v18 = vsel %vm468_vm1, %v520_v49, %v522_v53  ;;  %v387_v1 = vrot.slane %v209_v24, 5 }
  0x35   : > { %4305 = vst [vmem:[#allocation27_spill] sm:$0xff] %v2746_v18  ;;  %v527_v63 = vrot.slane %v2732_v57, 1  ;;  %v2753_v31 = vsel %vm278_vm0, %v242_v35, %v315_v0  ;;  %v2756_v42 = vsel %vm278_vm0, %v316_v7, %v386_v54 }
  0x36   : > { %4307 = vst [vmem:[#allocation29_spill] sm:$0xff] %v2753_v31  ;;  %v529_v53 = vrot.slane %v2753_v31, 1  ;;  %v532_v35 = vrot.slane %v2756_v42, 1 }
  0x37   : > { %664 = vrot.lane.b32.xlu0 %v2693_v17, %s2425_s18  ;;  %v2729_v17 = vsel %vm468_vm1, %v515_v10, %v517_v34  ;;  %v2750_v10 = vsel %vm278_vm0, %v315_v0, %v316_v7  ;;  %v243_v34 = vrot.slane %v208_v28, 1  ;;  %v2769_v54 = vsel %vm468_vm1, %v525_v12, %v527_v63 }
  0x38   : > { %666 = vrot.lane.b32.xlu1 %v2708_v56, %s2425_s18  ;;  %4303 = vst [vmem:[#allocation25_spill] sm:$0xff] %v2729_v17  ;;  %v2739_v56 = vsel %vm468_vm1, %v519_v48, %v520_v49  ;;  %4306 = vst [vmem:[#allocation28_spill] sm:$0xff] %v2750_v10  ;;  %v318_v48 = vrot.slane %v208_v28, 7  ;;  %v2763_v49 = vsel %vm468_vm1, %v524_v30, %v525_v12  ;;  %v530_v28 = vrot.slane %v2750_v10, 1 }
  0x39   : > { %4304 = vst [vmem:[#allocation26_spill] sm:$0xff] %v2739_v56  ;;  %4308 = vst [vmem:[#allocation30_spill] sm:$0xff] %v2763_v49  ;;  %v321_v30 = vrot.slane %v210_v9, 7 }
  0x3a   : > { %4309 = vst [vmem:[#allocation31_spill] sm:$0xff] %v2769_v54  ;;  %v2777_v7 = vsel %vm278_vm0, %v243_v34, %v318_v48  ;;  %v2787_v12 = vsel %vm468_vm1, %v529_v53, %v530_v28 }
  0x3b   : > { %668 = vrot.lane.b32.xlu0 %v2713_v44, %s2425_s18  ;;  %v319_v44 = vrot.slane %v209_v24, 7  ;;  %v244_v24 = vrot.slane %v210_v9, 1  ;;  %4311 = vst [vmem:[#allocation33_spill] sm:$0xff] %v2777_v7  ;;  %4312 = vst [vmem:[#allocation34_spill] sm:$0xff] %v2787_v12  ;;  %v534_v63 = vrot.slane %v2777_v7, 1  ;;  %v2792_v9 = vsel %vm468_vm1, %v530_v28, %v532_v35 }
  0x3c   : > { %670 = vrot.lane.b32.xlu1 %v2729_v17, %s2425_s18  ;;  %v211_v17 = vld [vmem:[%s2469_s17 + $0xe8] sm:$0xff]  ;;  %4313 = vst [vmem:[#allocation35_spill] sm:$0xff] %v2792_v9 }
  0x3d   : > { %v2774_v0 = vsel %vm278_vm0, %v318_v48, %v319_v44  ;;  %v2780_v55 = vsel %vm278_vm0, %v319_v44, %v387_v1  ;;  %v2799_v44 = vsel %vm278_vm0, %v244_v24, %v321_v30 }
  0x3e   : > { %4310 = vst [vmem:[#allocation32_spill] sm:$0xff] %v2774_v0  ;;  %v535_v34 = vrot.slane %v2774_v0, 1  ;;  %v537_v1 = vrot.slane %v2780_v55, 1  ;;  %4315 = vst [vmem:[#allocation37_spill] sm:$0xff] %v2799_v44  ;;  %v539_v28 = vrot.slane %v2799_v44, 1 }
  0x3f   : > { %672 = vrot.lane.b32.xlu0 %v2739_v56, %s2425_s18  ;;  %v322_v56 = vrot.slane %v211_v17, 7 }
  0x40   : > { %674 = vrot.lane.b32.xlu1 %v2746_v18, %s2425_s18  ;;  %v388_v18 = vrot.slane %v211_v17, 5  ;;  %v2809_v53 = vsel %vm468_vm1, %v534_v63, %v535_v34 }
  0x41   : > { %v2796_v17 = vsel %vm278_vm0, %v321_v30, %v322_v56  ;;  %4316 = vst [vmem:[#allocation38_spill] sm:$0xff] %v2809_v53  ;;  %v546_v30 = vrot.slane %v2477_v13, 2 }
  0x42   : > { %4314 = vst [vmem:[#allocation36_spill] sm:$0xff] %v2796_v17  ;;  %v2802_v48 = vsel %vm278_vm0, %v322_v56, %v388_v18  ;;  %v540_v35 = vrot.slane %v2796_v17, 1  ;;  %v545_v18 = vrot.slane %v2480_v14, 2 }
  0x43   : > { %676 = vrot.lane.b32.xlu0 %v2763_v49, %s2425_s18  ;;  %v542_v24 = vrot.slane %v2802_v48, 1 }
  0x44   : > { %678 = vrot.lane.b32.xlu1 %v2769_v54, %s2425_s18  ;;  %v2814_v54 = vsel %vm468_vm1, %v535_v34, %v537_v1  ;;  %v2822_v56 = vsel %vm468_vm1, %v539_v28, %v540_v35  ;;  %v548_v34 = vrot.slane %v2495_v25, 2  ;;  %v2835_v1 = vsel %vm544_vm2, %v545_v18, %v546_v30 }
  0x45   : > { %4317 = vst [vmem:[#allocation39_spill] sm:$0xff] %v2814_v54  ;;  %4318 = vst [vmem:[#allocation40_spill] sm:$0xff] %v2822_v56  ;;  %v2827_v63 = vsel %vm468_vm1, %v540_v35, %v542_v24  ;;  %v550_v28 = vrot.slane %v2489_v21, 2  ;;  %v553_v35 = vrot.slane %v2498_v26, 2  ;;  %v555_v24 = vrot.slane %v2512_v33, 2 }
  0x46   : > { %4319 = vst [vmem:[#allocation41_spill] sm:$0xff] %v2827_v63  ;;  %v556_v18 = vrot.slane %v2524_v39, 2 }
  0x47   : > { %680 = vrot.lane.b32.xlu0 %v2787_v12, %s2425_s18 }
  0x48   : > { %682 = vrot.lane.b32.xlu1 %v2792_v9, %s2425_s18  ;;  %v2861_v26 = vsel %vm544_vm2, %v555_v24, %v556_v18  ;;  %v566_v24 = vrot.slane %v2558_v61, 2 }
  0x4b   : > { %684 = vrot.lane.b32.xlu0 %v2809_v53, %s2425_s18  ;;  %v2840_v53 = vsel %vm544_vm2, %v546_v30, %v548_v34  ;;  %v558_v30 = vrot.slane %v2530_v43, 2  ;;  %v560_v34 = vrot.slane %v2542_v52, 2 }
  0x4c   : > { %686 = vrot.lane.b32.xlu1 %v2814_v54, %s2425_s18  ;;  %v551_v54 = vrot.slane %v2486_v20, 2 }
  0x4e   : > { %v2848_v25 = vsel %vm544_vm2, %v550_v28, %v551_v54  ;;  %v561_v28 = vrot.slane %v2539_v51, 2 }
  0x4f   : > { %688 = vrot.lane.b32.xlu0 %v2822_v56, %s2425_s18  ;;  %v2866_v56 = vsel %vm544_vm2, %v556_v18, %v558_v30  ;;  %v568_v18 = vrot.slane %v2573_v6, 2  ;;  %v570_v30 = vrot.slane %v2585_v16, 2 }
  0x50   : > { %690 = vrot.lane.b32.xlu1 %v2827_v63, %s2425_s18  ;;  %v2853_v63 = vsel %vm544_vm2, %v551_v54, %v553_v35  ;;  %v563_v54 = vrot.slane %v2553_v58, 2  ;;  %v2874_v43 = vsel %vm544_vm2, %v560_v34, %v561_v28  ;;  %v565_v35 = vrot.slane %v2561_v62, 2 }
  0x51   : > { %v571_v34 = vrot.slane %v2582_v15, 2  ;;  %v2892_v12 = vsel %vm544_vm2, %v566_v24, %v568_v18  ;;  %v580_v18 = vrot.slane %v2635_v3, 2 }
  0x52   : > { %v2879_v9 = vsel %vm544_vm2, %v561_v28, %v563_v54  ;;  %v2887_v58 = vsel %vm544_vm2, %v565_v35, %v566_v24  ;;  %4320 = vst [vmem:[#allocation42_spill] sm:$0xff] %v2892_v12  ;;  %v573_v28 = vrot.slane %v2588_v19, 2  ;;  %v575_v54 = vrot.slane %v2611_v41, 2 }
  0x53   : > { %722 = vrot.lane.b32.xlu0 %v2835_v1, %s2426_s19  ;;  %v2900_v6 = vsel %vm544_vm2, %v570_v30, %v571_v34  ;;  %v576_v35 = vrot.slane %v2607_v36, 2  ;;  %v578_v24 = vrot.slane %v2614_v46, 2  ;;  %v581_v30 = vrot.slane %v2632_v2, 2 }
  0x54   : > { %724 = vrot.lane.b32.xlu1 %v2840_v53, %s2426_s19  ;;  %v2905_v49 = vsel %vm544_vm2, %v571_v34, %v573_v28  ;;  %v583_v34 = vrot.slane %v2638_v4, 2  ;;  %v585_v28 = vrot.slane %v2641_v5, 2 }
  0x55   : > { %4321 = vst [vmem:[#allocation43_spill] sm:$0xff] %v2905_v49  ;;  %v2913_v19 = vsel %vm544_vm2, %v575_v54, %v576_v35  ;;  %v2926_v46 = vsel %vm544_vm2, %v580_v18, %v581_v30  ;;  %v586_v54 = vrot.slane %v2646_v8, 2  ;;  %v591_v18 = vrot.slane %v2669_v45, 2 }
  0x57   : > { %726 = vrot.lane.b32.xlu0 %v2848_v25, %s2426_s19  ;;  %v2939_v4 = vsel %vm544_vm2, %v585_v28, %v586_v54  ;;  %v596_v28 = vrot.slane %v2696_v22, 2 }
  0x58   : > { %728 = vrot.lane.b32.xlu1 %v2853_v63, %s2426_s19 }
  0x5b   : > { %730 = vrot.lane.b32.xlu0 %v2861_v26, %s2426_s19 }
  0x5c   : > { %732 = vrot.lane.b32.xlu1 %v2866_v56, %s2426_s19 }
  0x5f   : > { %734 = vrot.lane.b32.xlu0 %v2874_v43, %s2426_s19 }
  0x60   : > { %736 = vrot.lane.b32.xlu1 %v2879_v9, %s2426_s19 }
  0x63   : > { %738 = vrot.lane.b32.xlu0 %v2887_v58, %s2426_s19 }
  0x64   : > { %740 = vrot.lane.b32.xlu1 %v2892_v12, %s2426_s19  ;;  %v2918_v12 = vsel %vm544_vm2, %v576_v35, %v578_v24  ;;  %v588_v35 = vrot.slane %v2664_v40, 2  ;;  %v590_v24 = vrot.slane %v2672_v47, 2 }
  0x66   : > { %v2944_v8 = vsel %vm544_vm2, %v586_v54, %v588_v35  ;;  %v2952_v40 = vsel %vm544_vm2, %v590_v24, %v591_v18  ;;  %v598_v54 = vrot.slane %v2704_v29, 2  ;;  %v600_v35 = vrot.slane %v2726_v60, 2 }
  0x67   : > { %742 = vrot.lane.b32.xlu0 %v2900_v6, %s2426_s19  ;;  %v601_v24 = vrot.slane %v2723_v59, 2 }
  0x68   : > { %744 = vrot.lane.b32.xlu1 %v2905_v49, %s2426_s19  ;;  %v2931_v49 = vsel %vm544_vm2, %v581_v30, %v583_v34  ;;  %v593_v30 = vrot.slane %v2688_v11, 2  ;;  %v595_v34 = vrot.slane %v2699_v23, 2  ;;  %v2970_v22 = vsel %vm544_vm2, %v596_v28, %v598_v54 }
  0x69   : > { %v2978_v29 = vsel %vm544_vm2, %v600_v35, %v601_v24  ;;  %v610_v54 = vrot.slane %v2777_v7, 2  ;;  %v611_v35 = vrot.slane %v2774_v0, 2 }
  0x6a   : > { %v2957_v45 = vsel %vm544_vm2, %v591_v18, %v593_v30  ;;  %v2965_v11 = vsel %vm544_vm2, %v595_v34, %v596_v28  ;;  %v603_v18 = vrot.slane %v2732_v57, 2  ;;  %4322 = vst [vmem:[#allocation44_spill] sm:$0xff] %v2978_v29  ;;  %v605_v30 = vrot.slane %v2753_v31, 2 }
  0x6b   : > { %746 = vrot.lane.b32.xlu0 %v2913_v19, %s2426_s19  ;;  %v606_v34 = vrot.slane %v2750_v10, 2  ;;  %v608_v28 = vrot.slane %v2756_v42, 2  ;;  %v3004_v42 = vsel %vm544_vm2, %v610_v54, %v611_v35 }
  0x6c   : > { %748 = vrot.lane.b32.xlu1 %v2918_v12, %s2426_s19  ;;  %v2983_v59 = vsel %vm544_vm2, %v601_v24, %v603_v18  ;;  %v613_v24 = vrot.slane %v2780_v55, 2  ;;  %4326 = vst [vmem:[#allocation48_spill] sm:$0xff] %v3004_v42  ;;  %v615_v18 = vrot.slane %v2799_v44, 2  ;;  %v1678_v44 = vld [vmem:[%s4182_s1 + $0x78] sm:$0xff] }
  0x6d   : > { %4323 = vst [vmem:[#allocation45_spill] sm:$0xff] %v2983_v59  ;;  %v2991_v57 = vsel %vm544_vm2, %v605_v30, %v606_v34  ;;  %v2996_v10 = vsel %vm544_vm2, %v606_v34, %v608_v28  ;;  %v616_v30 = vrot.slane %v2796_v17, 2  ;;  %v618_v34 = vrot.slane %v2802_v48, 2  ;;  %2289 = vmatprep.subr.mxu0 %v1678_v44  ;;  %2369 = vmatprep.subr.mxu1 %v1678_v44 }
  0x6e   : > { %4324 = vst [vmem:[#allocation46_spill] sm:$0xff] %v2991_v57  ;;  %4325 = vst [vmem:[#allocation47_spill] sm:$0xff] %v2996_v10  ;;  %v3009_v0 = vsel %vm544_vm2, %v611_v35, %v613_v24  ;;  %2290 = vmatpush3.msra.mxu0 %v1678_v44  ;;  %2385 = vmatpush3.msra.mxu1 %v1678_v44 }
  0x6f   : > { %750 = vrot.lane.b32.xlu0 %v2926_v46, %s2426_s19  ;;  %4327 = vst [vmem:[#allocation49_spill] sm:$0xff] %v3009_v0  ;;  %v3017_v55 = vsel %vm544_vm2, %v615_v18, %v616_v30  ;;  %v3022_v54 = vsel %vm544_vm2, %v616_v30, %v618_v34 }
  0x70   : > { %752 = vrot.lane.b32.xlu1 %v2931_v49, %s2426_s19  ;;  %4328 = vst [vmem:[#allocation50_spill] sm:$0xff] %v3017_v55  ;;  %4329 = vst [vmem:[#allocation51_spill] sm:$0xff] %v3022_v54 }
  0x73   : > { %754 = vrot.lane.b32.xlu0 %v2939_v4, %s2426_s19 }
  0x74   : > { %756 = vrot.lane.b32.xlu1 %v2944_v8, %s2426_s19 }
  0x77   : > { %758 = vrot.lane.b32.xlu0 %v2952_v40, %s2426_s19 }
  0x78   : > { %760 = vrot.lane.b32.xlu1 %v2957_v45, %s2426_s19 }
  0x7b   : > { %762 = vrot.lane.b32.xlu0 %v2965_v11, %s2426_s19 }
  0x7c   : > { %764 = vrot.lane.b32.xlu1 %v2970_v22, %s2426_s19 }
  0x7f   : > { %766 = vrot.lane.b32.xlu0 %v2978_v29, %s2426_s19 }
  0x80   : > { %768 = vrot.lane.b32.xlu1 %v2983_v59, %s2426_s19 }
  0x83   : > { %770 = vrot.lane.b32.xlu0 %v2991_v57, %s2426_s19  ;;  %v1675_v57 = vld [vmem:[%s4182_s1 + $0x60] sm:$0xff] }
  0x84   : > { %772 = vrot.lane.b32.xlu1 %v2996_v10, %s2426_s19  ;;  %v1676_v10 = vld [vmem:[%s4182_s1 + $0x68] sm:$0xff] }
  0x87   : > { %774 = vrot.lane.b32.xlu0 %v3004_v42, %s2426_s19 }
  0x88   : > { %776 = vrot.lane.b32.xlu1 %v3009_v0, %s2426_s19  ;;  %v1677_v0 = vld [vmem:[%s4182_s1 + $0x70] sm:$0xff] }
  0x89   : > { %v3019_v28 = vpop.permute.xlu0 %632  ;;  %2291 = vmatprep.subr.mxu0 %v1677_v0  ;;  %2370 = vmatprep.subr.mxu1 %v1677_v0 }
  0x8a   : > { %v3024_v17 = vpop.permute.xlu1 %636  ;;  %2292 = vmatpush3.msra.mxu0 %v1677_v0  ;;  %2386 = vmatpush3.msra.mxu1 %v1677_v0 }
  0x8b   : > { %778 = vrot.lane.b32.xlu0 %v3017_v55, %s2426_s19  ;;  %2293 = vmatprep.subr.mxu0 %v1676_v10 }
  0x8c   : > { %780 = vrot.lane.b32.xlu1 %v3022_v54, %s2426_s19  ;;  %2294 = vmatpush3.msra.mxu0 %v1676_v10 }
  0x8d   : > { %v3030_v48 = vpop.permute.xlu0 %634  ;;  %2295 = vmatprep.subr.mxu0 %v1675_v57  ;;  %2371 = vmatprep.subr.mxu1 %v1676_v10 }
  0x8e   : > { %v3032_v35 = vpop.permute.xlu1 %638  ;;  %2296 = vmatpush3.msra.mxu0 %v1675_v57  ;;  %2387 = vmatpush3.msra.mxu1 %v1676_v10 }
  0x8f   : > { %812 = vrot.lane.b32.xlu0 %v2489_v21, %s2427_s20  ;;  %2372 = vmatprep.subr.mxu1 %v1675_v57 }
  0x90   : > { %814 = vrot.lane.b32.xlu1 %v2486_v20, %s2427_s20  ;;  %2388 = vmatpush3.msra.mxu1 %v1675_v57 }
  0x91   : > { %v3038_v24 = vpop.permute.xlu0 %640 }
  0x92   : > { %v3040_v18 = vpop.permute.xlu1 %642 }
  0x93   : > { %816 = vrot.lane.b32.xlu0 %v2480_v14, %s2427_s20 }
  0x94   : > { %818 = vrot.lane.b32.xlu1 %v2477_v13, %s2427_s20 }
  0x95   : > { %v3046_v30 = vpop.permute.xlu0 %644 }
  0x96   : > { %v3048_v34 = vpop.permute.xlu1 %646 }
  0x97   : > { %820 = vrot.lane.b32.xlu0 %v2512_v33, %s2427_s20 }
  0x98   : > { %822 = vrot.lane.b32.xlu1 %v2524_v39, %s2427_s20 }
  0x99   : > { %v3054_v54 = vpop.permute.xlu0 %648 }
  0x9a   : > { %v3056_v55 = vpop.permute.xlu1 %650 }
  0x9b   : > { %4330 = vst [vmem:[#allocation52_spill] sm:$0xff] %v3056_v55  ;;  %824 = vrot.lane.b32.xlu0 %v2542_v52, %s2427_s20 }
  0x9c   : > { %826 = vrot.lane.b32.xlu1 %v2539_v51, %s2427_s20 }
  0x9d   : > { %v3068_v42 = vpop.permute.xlu0 %652 }
  0x9e   : > { %4331 = vst [vmem:[#allocation53_spill] sm:$0xff] %v3068_v42  ;;  %v3070_v7 = vpop.permute.xlu1 %654 }
  0x9f   : > { %4332 = vst [vmem:[#allocation54_spill] sm:$0xff] %v3070_v7  ;;  %828 = vrot.lane.b32.xlu0 %v2561_v62, %s2427_s20  ;;  %v1674_v7 = vld [vmem:[%s4182_s1 + $0x58] sm:$0xff] }
  0xa0   : > { %830 = vrot.lane.b32.xlu1 %v2558_v61, %s2427_s20  ;;  %2297 = vmatprep.subr.mxu0 %v1674_v7 }
  0xa1   : > { %v3082_v42 = vpop.permute.xlu0 %656  ;;  %2298 = vmatpush3.msra.mxu0 %v1674_v7  ;;  %2373 = vmatprep.subr.mxu1 %v1674_v7 }
  0xa2   : > { %4333 = vst [vmem:[#allocation55_spill] sm:$0xff] %v3082_v42  ;;  %v3084_v44 = vpop.permute.xlu1 %658  ;;  %v1673_v42 = vld [vmem:[%s4182_s1 + $0x50] sm:$0xff]  ;;  %2389 = vmatpush3.msra.mxu1 %v1674_v7 }
  0xa3   : > { %4334 = vst [vmem:[#allocation56_spill] sm:$0xff] %v3084_v44  ;;  %832 = vrot.lane.b32.xlu0 %v2585_v16, %s2427_s20  ;;  %2299 = vmatprep.subr.mxu0 %v1673_v42  ;;  %v1672_v44 = vld [vmem:[%s4182_s1 + $0x48] sm:$0xff] }
  0xa4   : > { %834 = vrot.lane.b32.xlu1 %v2582_v15, %s2427_s20  ;;  %2300 = vmatpush3.msra.mxu0 %v1673_v42 }
  0xa5   : > { %v3096_v31 = vpop.permute.xlu0 %660  ;;  %2301 = vmatprep.subr.mxu0 %v1672_v44  ;;  %2374 = vmatprep.subr.mxu1 %v1673_v42 }
  0xa6   : > { %4335 = vst [vmem:[#allocation57_spill] sm:$0xff] %v3096_v31  ;;  %v3098_v0 = vpop.permute.xlu1 %662  ;;  %v1671_v31 = vld [vmem:[%s4182_s1 + $0x40] sm:$0xff]  ;;  %2302 = vmatpush3.msra.mxu0 %v1672_v44  ;;  %2390 = vmatpush3.msra.mxu1 %v1673_v42 }
  0xa7   : > { %4336 = vst [vmem:[#allocation58_spill] sm:$0xff] %v3098_v0  ;;  %836 = vrot.lane.b32.xlu0 %v2611_v41, %s2427_s20  ;;  %2303 = vmatprep.subr.mxu0 %v1671_v31  ;;  %v1670_v0 = vld [vmem:[%s4182_s1 + $0x38] sm:$0xff] }
  0xa8   : > { %838 = vrot.lane.b32.xlu1 %v2607_v36, %s2427_s20  ;;  %2304 = vmatpush3.msra.mxu0 %v1671_v31 }
  0xa9   : > { %v3110_v59 = vpop.permute.xlu0 %664  ;;  %2305 = vmatprep.subr.mxu0 %v1670_v0  ;;  %2375 = vmatprep.subr.mxu1 %v1672_v44 }
  0xaa   : > { %4337 = vst [vmem:[#allocation59_spill] sm:$0xff] %v3110_v59  ;;  %v3112_v10 = vpop.permute.xlu1 %666  ;;  %v1669_v59 = vld [vmem:[%s4182_s1 + $0x30] sm:$0xff]  ;;  %2306 = vmatpush3.msra.mxu0 %v1670_v0  ;;  %2391 = vmatpush3.msra.mxu1 %v1672_v44 }
  0xab   : > { %4338 = vst [vmem:[#allocation60_spill] sm:$0xff] %v3112_v10  ;;  %840 = vrot.lane.b32.xlu0 %v2635_v3, %s2427_s20  ;;  %2307 = vmatprep.subr.mxu0 %v1669_v59  ;;  %v1668_v10 = vld [vmem:[%s4182_s1 + $0x28] sm:$0xff] }
  0xac   : > { %842 = vrot.lane.b32.xlu1 %v2632_v2, %s2427_s20  ;;  %2308 = vmatpush3.msra.mxu0 %v1669_v59 }
  0xad   : > { %v3124_v29 = vpop.permute.xlu0 %668  ;;  %2309 = vmatprep.subr.mxu0 %v1668_v10  ;;  %2376 = vmatprep.subr.mxu1 %v1671_v31 }
  0xae   : > { %4339 = vst [vmem:[#allocation61_spill] sm:$0xff] %v3124_v29  ;;  %v3126_v57 = vpop.permute.xlu1 %670  ;;  %v1667_v29 = vld [vmem:[%s4182_s1 + $0x20] sm:$0xff]  ;;  %2310 = vmatpush3.msra.mxu0 %v1668_v10  ;;  %2392 = vmatpush3.msra.mxu1 %v1671_v31 }
  0xaf   : > { %4340 = vst [vmem:[#allocation62_spill] sm:$0xff] %v3126_v57  ;;  %844 = vrot.lane.b32.xlu0 %v2641_v5, %s2427_s20  ;;  %2311 = vmatprep.subr.mxu0 %v1667_v29 }
  0xb0   : > { %908 = vrot.lane.b32.xlu1 %v2509_v32, %s2428_s21  ;;  %2312 = vmatpush3.msra.mxu0 %v1667_v29  ;;  %v1666_v32 = vld [vmem:[%s4182_s1 + $0x18] sm:$0xff] }
  0xb1   : > { %v3138_v57 = vpop.permute.xlu0 %672  ;;  %2313 = vmatprep.subr.mxu0 %v1666_v32  ;;  %2377 = vmatprep.subr.mxu1 %v1670_v0 }
  0xb2   : > { %4341 = vst [vmem:[#allocation63_spill] sm:$0xff] %v3138_v57  ;;  %v3140_v7 = vpop.permute.xlu1 %674  ;;  %v1665_v57 = vld [vmem:[%s4182_s1 + $0x10] sm:$0xff]  ;;  %2314 = vmatpush3.msra.mxu0 %v1666_v32  ;;  %2393 = vmatpush3.msra.mxu1 %v1670_v0 }
  0xb3   : > { %4342 = vst [vmem:[#allocation64_spill] sm:$0xff] %v3140_v7  ;;  %910 = vrot.lane.b32.xlu0 %v2521_v38, %s2428_s21  ;;  %2315 = vmatprep.subr.mxu0 %v1665_v57  ;;  %v1664_v38 = vld [vmem:[%s4182_s1 + $0x8] sm:$0xff] }
  0xb4   : > { %1004 = vrot.lane.b32.xlu1 %v2848_v25, %s2429_s26  ;;  %2316 = vmatpush3.msra.mxu0 %v1665_v57  ;;  %v1663_v25 = vld [vmem:[%s4182_s1] sm:$0xff] }
  0xb5   : > { %v3152_v7 = vpop.permute.xlu0 %676  ;;  %2317 = vmatprep.subr.mxu0 %v1664_v38  ;;  %2378 = vmatprep.subr.mxu1 %v1669_v59 }
  0xb6   : > { %4343 = vst [vmem:[#allocation65_spill] sm:$0xff] %v3152_v7  ;;  %v3154_v42 = vpop.permute.xlu1 %678  ;;  %2318 = vmatpush3.msra.mxu0 %v1664_v38  ;;  %2394 = vmatpush3.msra.mxu1 %v1669_v59 }
  0xb7   : > { %4344 = vst [vmem:[#allocation66_spill] sm:$0xff] %v3154_v42  ;;  %1006 = vrot.lane.b32.xlu0 %v2853_v63, %s2429_s26  ;;  %2319 = vmatprep.subr.mxu0 %v1663_v25 }
  0xb8   : > { %1100 = vrot.lane.b32.xlu1 %v2480_v14, %s2430_s4  ;;  %2320 = vmatpush3.msra.mxu0 %v1663_v25 }
  0xb9   : > { %v3166_v42 = vpop.permute.xlu0 %680  ;;  %2379 = vmatprep.subr.mxu1 %v1668_v10 }
  0xba   : > { %4345 = vst [vmem:[#allocation67_spill] sm:$0xff] %v3166_v42  ;;  %v3168_v44 = vpop.permute.xlu1 %682  ;;  %2395 = vmatpush3.msra.mxu1 %v1668_v10 }
  0xbb   : > { %4346 = vst [vmem:[#allocation68_spill] sm:$0xff] %v3168_v44  ;;  %1102 = vrot.lane.b32.xlu0 %v2477_v13, %s2430_s4  ;;  %2380 = vmatprep.subr.mxu1 %v1667_v29 }
  0xbc   : > { %1190 = vrot.lane.b32.xlu1 %v2501_v27, %s2431_s7  ;;  %2396 = vmatpush3.msra.mxu1 %v1667_v29 }
  0xbd   : > { %v3174_v63 = vpop.permute.xlu0 %684  ;;  %2381 = vmatprep.subr.mxu1 %v1666_v32 }
  0xbe   : > { %4347 = vst [vmem:[#allocation69_spill] sm:$0xff] %v3174_v63  ;;  %v3176_v7 = vpop.permute.xlu1 %686  ;;  %2397 = vmatpush3.msra.mxu1 %v1666_v32 }
  0xbf   : > { %4348 = vst [vmem:[#allocation70_spill] sm:$0xff] %v3176_v7  ;;  %912 = vrot.lane.b32.xlu0 %v2501_v27, %s2428_s21  ;;  %2382 = vmatprep.subr.mxu1 %v1665_v57 }
  0xc0   : > { %1192 = vrot.lane.b32.xlu1 %v2518_v37, %s2431_s7  ;;  %2398 = vmatpush3.msra.mxu1 %v1665_v57 }
  0xc1   : > { %v3182_v31 = vpop.permute.xlu0 %688  ;;  %2383 = vmatprep.subr.mxu1 %v1664_v38 }
  0xc2   : > { %4349 = vst [vmem:[#allocation71_spill] sm:$0xff] %v3182_v31  ;;  %v3184_v44 = vpop.permute.xlu1 %690  ;;  %2399 = vmatpush3.msra.mxu1 %v1664_v38 }
  0xc3   : > { %4350 = vst [vmem:[#allocation72_spill] sm:$0xff] %v3184_v44  ;;  %1280 = vrot.lane.b32.xlu0 %v2835_v1, %s2432_s8  ;;  %2384 = vmatprep.subr.mxu1 %v1663_v25 }
  0xc4   : > { %914 = vrot.lane.b32.xlu1 %v2518_v37, %s2428_s21  ;;  %2400 = vmatpush3.msra.mxu1 %v1663_v25 }
  0xc5   : > { %v3190_v27 = vpop.permute.xlu0 %722 }
  0xc6   : > { %v3192_v59 = vpop.permute.xlu1 %724 }
  0xc7   : > { %1008 = vrot.lane.b32.xlu0 %v2835_v1, %s2429_s26 }
  0xc8   : > { %1282 = vrot.lane.b32.xlu1 %v2840_v53, %s2432_s8 }
  0xc9   : > { %v3198_v0 = vpop.permute.xlu0 %726 }
  0xca   : > { %v3200_v29 = vpop.permute.xlu1 %728 }
  0xcb   : > { %1010 = vrot.lane.b32.xlu0 %v2840_v53, %s2429_s26  ;;  %v4351_v53 = vld [vmem:[#allocation2_spill] sm:$0xff] }
  0xcc   : > { %1104 = vrot.lane.b32.xlu1 %v2512_v33, %s2430_s4 }
  0xcd   : > { %v3206_v37 = vpop.permute.xlu0 %730 }
  0xce   : > { %v3208_v1 = vpop.permute.xlu1 %732 }
  0xcf   : > { %1106 = vrot.lane.b32.xlu0 %v2524_v39, %s2430_s4 }
  0xd0   : > { %1194 = vrot.lane.b32.xlu1 %v2536_v50, %s2431_s7 }
  0xd1   : > { %v3214_v10 = vpop.permute.xlu0 %734 }
  0xd2   : > { %v3216_v57 = vpop.permute.xlu1 %736 }
  0xd3   : > { %916 = vrot.lane.b32.xlu0 %v2536_v50, %s2428_s21 }
  0xd4   : > { %1196 = vrot.lane.b32.xlu1 %v4351_v53, %s2431_s7 }
  0xd5   : > { %v3222_v32 = vpop.permute.xlu0 %738 }
  0xd6   : > { %v3224_v38 = vpop.permute.xlu1 %740 }
  0xd7   : > { %4352 = vst [vmem:[#allocation2_spill] sm:$0xff] %v3224_v38  ;;  %1284 = vrot.lane.b32.xlu0 %v2861_v26, %s2432_s8 }
  0xd8   : > { %918 = vrot.lane.b32.xlu1 %v4351_v53, %s2428_s21 }
  0xd9   : > { %v3230_v25 = vpop.permute.xlu0 %742 }
  0xda   : > { %4353 = vst [vmem:[#allocation73_spill] sm:$0xff] %v3230_v25  ;;  %v3232_v44 = vpop.permute.xlu1 %744 }
  0xdb   : > { %4354 = vst [vmem:[#allocation74_spill] sm:$0xff] %v3232_v44  ;;  %1012 = vrot.lane.b32.xlu0 %v2861_v26, %s2429_s26  ;;  %v4359_v26 = vld [vmem:[#allocation4_spill] sm:$0xff] }
  0xdc   : > { %1286 = vrot.lane.b32.xlu1 %v2866_v56, %s2432_s8 }
  0xdd   : > { %v3238_v50 = vpop.permute.xlu0 %746 }
  0xde   : > { %4355 = vst [vmem:[#allocation75_spill] sm:$0xff] %v3238_v50  ;;  %v3240_v31 = vpop.permute.xlu1 %748 }
  0xdf   : > { %4356 = vst [vmem:[#allocation76_spill] sm:$0xff] %v3240_v31  ;;  %1014 = vrot.lane.b32.xlu0 %v2866_v56, %s2429_s26  ;;  %v4362_v56 = vld [vmem:[#allocation5_spill] sm:$0xff] }
  0xe0   : > { %1108 = vrot.lane.b32.xlu1 %v2542_v52, %s2430_s4 }
  0xe1   : > { %v3246_v53 = vpop.permute.xlu0 %750 }
  0xe2   : > { %4357 = vst [vmem:[#allocation77_spill] sm:$0xff] %v3246_v53  ;;  %v3248_v7 = vpop.permute.xlu1 %752 }
  0xe3   : > { %4358 = vst [vmem:[#allocation78_spill] sm:$0xff] %v3248_v7  ;;  %1110 = vrot.lane.b32.xlu0 %v2539_v51, %s2430_s4 }
  0xe4   : > { %1198 = vrot.lane.b32.xlu1 %v4359_v26, %s2431_s7 }
  0xe5   : > { %v3254_v63 = vpop.permute.xlu0 %754 }
  0xe6   : > { %4360 = vst [vmem:[#allocation4_spill] sm:$0xff] %v3254_v63  ;;  %v3256_v42 = vpop.permute.xlu1 %756 }
  0xe7   : > { %4361 = vst [vmem:[#allocation79_spill] sm:$0xff] %v3256_v42  ;;  %920 = vrot.lane.b32.xlu0 %v4359_v26, %s2428_s21 }
  0xe8   : > { %1200 = vrot.lane.b32.xlu1 %v4362_v56, %s2431_s7 }
  0xe9   : > { %v3262_v31 = vpop.permute.xlu0 %758 }
  0xea   : > { %4363 = vst [vmem:[#allocation5_spill] sm:$0xff] %v3262_v31  ;;  %v3264_v53 = vpop.permute.xlu1 %760 }
  0xeb   : > { %4364 = vst [vmem:[#allocation80_spill] sm:$0xff] %v3264_v53  ;;  %1288 = vrot.lane.b32.xlu0 %v2874_v43, %s2432_s8 }
  0xec   : > { %922 = vrot.lane.b32.xlu1 %v4362_v56, %s2428_s21 }
  0xed   : > { %v3270_v7 = vpop.permute.xlu0 %762 }
  0xee   : > { %4365 = vst [vmem:[#allocation81_spill] sm:$0xff] %v3270_v7  ;;  %v3272_v63 = vpop.permute.xlu1 %764 }
  0xef   : > { %4366 = vst [vmem:[#allocation82_spill] sm:$0xff] %v3272_v63  ;;  %1016 = vrot.lane.b32.xlu0 %v2874_v43, %s2429_s26  ;;  %v4371_v43 = vld [vmem:[#allocation8_spill] sm:$0xff] }
  0xf0   : > { %1290 = vrot.lane.b32.xlu1 %v2879_v9, %s2432_s8 }
  0xf1   : > { %v3278_v26 = vpop.permute.xlu0 %766 }
  0xf2   : > { %4367 = vst [vmem:[#allocation83_spill] sm:$0xff] %v3278_v26  ;;  %v3280_v31 = vpop.permute.xlu1 %768 }
  0xf3   : > { %4368 = vst [vmem:[#allocation84_spill] sm:$0xff] %v3280_v31  ;;  %1018 = vrot.lane.b32.xlu0 %v2879_v9, %s2429_s26  ;;  %v4374_v9 = vld [vmem:[#allocation9_spill] sm:$0xff] }
  0xf4   : > { %1112 = vrot.lane.b32.xlu1 %v2561_v62, %s2430_s4 }
  0xf5   : > { %v3286_v56 = vpop.permute.xlu0 %770 }
  0xf6   : > { %4369 = vst [vmem:[#allocation85_spill] sm:$0xff] %v3286_v56  ;;  %v3288_v7 = vpop.permute.xlu1 %772 }
  0xf7   : > { %4370 = vst [vmem:[#allocation86_spill] sm:$0xff] %v3288_v7  ;;  %1114 = vrot.lane.b32.xlu0 %v2558_v61, %s2430_s4 }
  0xf8   : > { %1202 = vrot.lane.b32.xlu1 %v4371_v43, %s2431_s7 }
  0xf9   : > { %v3294_v63 = vpop.permute.xlu0 %774 }
  0xfa   : > { %4372 = vst [vmem:[#allocation8_spill] sm:$0xff] %v3294_v63  ;;  %v3296_v26 = vpop.permute.xlu1 %776 }
  0xfb   : > { %4373 = vst [vmem:[#allocation87_spill] sm:$0xff] %v3296_v26  ;;  %924 = vrot.lane.b32.xlu0 %v4371_v43, %s2428_s21  ;;  %v4377_v43 = vld [vmem:[#allocation42_spill] sm:$0xff] }
  0xfc   : > { %1204 = vrot.lane.b32.xlu1 %v4374_v9, %s2431_s7 }
  0xfd   : > { %v3302_v31 = vpop.permute.xlu0 %778 }
  0xfe   : > { %4375 = vst [vmem:[#allocation9_spill] sm:$0xff] %v3302_v31  ;;  %v3304_v56 = vpop.permute.xlu1 %780 }
  0xff   : > { %4376 = vst [vmem:[#allocation88_spill] sm:$0xff] %v3304_v56  ;;  %1292 = vrot.lane.b32.xlu0 %v2887_v58, %s2432_s8 }
 0x100   : > { %926 = vrot.lane.b32.xlu1 %v4374_v9, %s2428_s21 }
 0x101   : > { %v813_v7 = vpop.permute.xlu0 %812 }
 0x102   : > { %v3310_v63 = vpop.permute.xlu1 %814 }
 0x103   : > { %1020 = vrot.lane.b32.xlu0 %v2887_v58, %s2429_s26  ;;  %v4378_v58 = vld [vmem:[#allocation12_spill] sm:$0xff] }
 0x104   : > { %1294 = vrot.lane.b32.xlu1 %v4377_v43, %s2432_s8 }
 0x105   : > { %v3316_v26 = vpop.permute.xlu0 %816 }
 0x106   : > { %v3318_v31 = vpop.permute.xlu1 %818 }
 0x107   : > { %1022 = vrot.lane.b32.xlu0 %v4377_v43, %s2429_s26  ;;  %v4379_v43 = vld [vmem:[#allocation13_spill] sm:$0xff] }
 0x108   : > { %1116 = vrot.lane.b32.xlu1 %v2585_v16, %s2430_s4 }
 0x109   : > { %v3324_v9 = vpop.permute.xlu0 %820 }
 0x10a   : > { %v3326_v56 = vpop.permute.xlu1 %822 }
 0x10b   : > { %1118 = vrot.lane.b32.xlu0 %v2582_v15, %s2430_s4 }
 0x10c   : > { %1206 = vrot.lane.b32.xlu1 %v4378_v58, %s2431_s7 }
 0x10d   : > { %v3332_v53 = vpop.permute.xlu0 %824 }
 0x10e   : > { %v3334_v42 = vpop.permute.xlu1 %826 }
 0x10f   : > { %928 = vrot.lane.b32.xlu0 %v4378_v58, %s2428_s21  ;;  %v4382_v58 = vld [vmem:[#allocation43_spill] sm:$0xff] }
 0x110   : > { %1208 = vrot.lane.b32.xlu1 %v4379_v43, %s2431_s7 }
 0x111   : > { %v3340_v50 = vpop.permute.xlu0 %828 }
 0x112   : > { %v3342_v44 = vpop.permute.xlu1 %830 }
 0x113   : > { %1296 = vrot.lane.b32.xlu0 %v2900_v6, %s2432_s8 }
 0x114   : > { %930 = vrot.lane.b32.xlu1 %v4379_v43, %s2428_s21 }
 0x115   : > { %v3348_v15 = vpop.permute.xlu0 %832 }
 0x116   : > { %4380 = vst [vmem:[#allocation42_spill] sm:$0xff] %v3348_v15  ;;  %v3350_v25 = vpop.permute.xlu1 %834 }
 0x117   : > { %4381 = vst [vmem:[#allocation12_spill] sm:$0xff] %v3350_v25  ;;  %1024 = vrot.lane.b32.xlu0 %v2900_v6, %s2429_s26  ;;  %v4387_v6 = vld [vmem:[#allocation15_spill] sm:$0xff] }
 0x118   : > { %1298 = vrot.lane.b32.xlu1 %v4382_v58, %s2432_s8 }
 0x119   : > { %v3356_v16 = vpop.permute.xlu0 %836 }
 0x11a   : > { %4383 = vst [vmem:[#allocation13_spill] sm:$0xff] %v3356_v16  ;;  %v3358_v38 = vpop.permute.xlu1 %838 }
 0x11b   : > { %4384 = vst [vmem:[#allocation43_spill] sm:$0xff] %v3358_v38  ;;  %1026 = vrot.lane.b32.xlu0 %v4382_v58, %s2429_s26  ;;  %v4389_v58 = vld [vmem:[#allocation16_spill] sm:$0xff] }
 0x11c   : > { %1120 = vrot.lane.b32.xlu1 %v2611_v41, %s2430_s4 }
 0x11d   : > { %v3364_v43 = vpop.permute.xlu0 %840 }
 0x11e   : > { %4385 = vst [vmem:[#allocation89_spill] sm:$0xff] %v3364_v43  ;;  %v3366_v61 = vpop.permute.xlu1 %842  ;;  %v1371_v43 = vsel %vm1370_vm3, %v2480_v14, %v3019_v28 }
 0x11f   : > { %4386 = vst [vmem:[#allocation90_spill] sm:$0xff] %v3366_v61  ;;  %1122 = vrot.lane.b32.xlu0 %v2607_v36, %s2430_s4 }
 0x120   : > { %1210 = vrot.lane.b32.xlu1 %v4387_v6, %s2431_s7 }
 0x121   : > { %v3372_v25 = vpop.permute.xlu0 %844 }
 0x122   : > { %4388 = vst [vmem:[#allocation15_spill] sm:$0xff] %v3372_v25  ;;  %v909_v16 = vpop.permute.xlu1 %908 }
 0x123   : > { %932 = vrot.lane.b32.xlu0 %v4387_v6, %s2428_s21 }
 0x124   : > { %1212 = vrot.lane.b32.xlu1 %v4389_v58, %s2431_s7 }
 0x125   : > { %v911_v41 = vpop.permute.xlu0 %910 }
 0x126   : > { %v1005_v38 = vpop.permute.xlu1 %1004 }
 0x127   : > { %1300 = vrot.lane.b32.xlu0 %v2913_v19, %s2432_s8 }
 0x128   : > { %934 = vrot.lane.b32.xlu1 %v4389_v58, %s2428_s21  ;;  %v3393_v58 = vsel %vm1401_vm4, %v1371_v43, %v3190_v27 }
 0x129   : > { %v1007_v61 = vpop.permute.xlu0 %1006 }
 0x12a   : > { %v1101_v36 = vpop.permute.xlu1 %1100 }
 0x12b   : > { %1028 = vrot.lane.b32.xlu0 %v2913_v19, %s2429_s26  ;;  %v1433_v19 = vsel %vm1432_vm5, %v3393_v58, %v813_v7  ;;  %v4390_v7 = vld [vmem:[#allocation18_spill] sm:$0xff] }
 0x12c   : > { %1302 = vrot.lane.b32.xlu1 %v2918_v12, %s2432_s8  ;;  %v1466_v15 = vsel %vm1465_vm6, %v1433_v19, %v909_v16 }
 0x12d   : > { %v1103_v6 = vpop.permute.xlu0 %1102  ;;  %v1499_v28 = vsel %vm1498_vm7, %v1466_v15, %v1005_v38 }
 0x12e   : > { %v1191_v25 = vpop.permute.xlu1 %1190  ;;  %v1532_v27 = vsel %vm1531_vm8, %v1499_v28, %v1101_v36 }
 0x12f   : > { %1030 = vrot.lane.b32.xlu0 %v2918_v12, %s2429_s26  ;;  %v1372_v12 = vsel %vm1370_vm3, %v2477_v13, %v3030_v48  ;;  %v1565_v15 = vsel %vm1564_vm9, %v1532_v27, %v1191_v25 }
 0x130   : > { %1124 = vrot.lane.b32.xlu1 %v2635_v3, %s2430_s4  ;;  %v3411_v16 = vsel %vm1401_vm4, %v1372_v12, %v3192_v59  ;;  %v4391_v59 = vld [vmem:[#allocation19_spill] sm:$0xff] }
 0x131   : > { %v913_v55 = vpop.permute.xlu0 %912  ;;  %v1434_v43 = vsel %vm1432_vm5, %v3411_v16, %v3310_v63 }
 0x132   : > { %v1193_v14 = vpop.permute.xlu1 %1192  ;;  %v1467_v36 = vsel %vm1465_vm6, %v1434_v43, %v911_v41 }
 0x133   : > { %1126 = vrot.lane.b32.xlu0 %v2632_v2, %s2430_s4  ;;  %v1500_v48 = vsel %vm1498_vm7, %v1467_v36, %v1007_v61 }
 0x134   : > { %1214 = vrot.lane.b32.xlu1 %v4390_v7, %s2431_s7  ;;  %v1533_v25 = vsel %vm1531_vm8, %v1500_v48, %v1103_v6 }
 0x135   : > { %v1281_v38 = vpop.permute.xlu0 %1280  ;;  %v1566_v63 = vsel %vm1564_vm9, %v1533_v25, %v1193_v14 }
 0x136   : > { %v915_v19 = vpop.permute.xlu1 %914  ;;  %v1598_v13 = vsel %vm1597_vm10, %v1565_v15, %v1281_v38 }
 0x137   : > { %936 = vrot.lane.b32.xlu0 %v4390_v7, %s2428_s21  ;;  %2321 = vmatprep.mubr.msk.f32.mxu0 %vm1630_vm11, %v1598_v13  ;;  %v1373_v7 = vsel %vm1370_vm3, %v2489_v21, %v3024_v17  ;;  %v4392_v21 = vld [vmem:[#allocation14_spill] sm:$0xff] }
 0x138   : > { %1216 = vrot.lane.b32.xlu1 %v4391_v59, %s2431_s7  ;;  %v1404_v15 = vsel %vm1401_vm4, %v1373_v7, %v3198_v0  ;;  %v4393_v0 = vld [vmem:[#allocation20_spill] sm:$0xff]  ;;  %v1437_v7 = vsel %vm1432_vm5, %v3393_v58, %v3324_v9  ;;  %v1438_v9 = vsel %vm1432_vm5, %v3411_v16, %v3326_v56 }
 0x139   : > { %v1009_v28 = vpop.permute.xlu0 %1008 }
 0x13a   : > { %v1283_v12 = vpop.permute.xlu1 %1282 }
 0x13b   : > { %v1599_v27 = vsel %vm1597_vm10, %v1566_v63, %v1283_v12  ;;  %1304 = vrot.lane.b32.xlu0 %v2926_v46, %s2432_s8 }
 0x13c   : > { %938 = vrot.lane.b32.xlu1 %v4391_v59, %s2428_s21  ;;  %2322 = vmatmul.mubr.msk.f32.vlgmr.msra.gmra.mxu0 %vm1630_vm11, %v1599_v27 }
 0x13d   : > { %v1011_v61 = vpop.permute.xlu0 %1010 }
 0x13e   : > { %v1105_v41 = vpop.permute.xlu1 %1104 }
 0x13f   : > { %1032 = vrot.lane.b32.xlu0 %v2926_v46, %s2429_s26  ;;  %v1435_v46 = vsel %vm1432_vm5, %v1404_v15, %v3316_v26 }
 0x140   : > { %1306 = vrot.lane.b32.xlu1 %v2931_v49, %s2432_s8  ;;  %v1468_v43 = vsel %vm1465_vm6, %v1435_v46, %v913_v55 }
 0x141   : > { %v1107_v6 = vpop.permute.xlu0 %1106  ;;  %v1501_v36 = vsel %vm1498_vm7, %v1468_v43, %v1009_v28 }
 0x142   : > { %v1195_v14 = vpop.permute.xlu1 %1194  ;;  %v1534_v17 = vsel %vm1531_vm8, %v1501_v36, %v1105_v41 }
 0x143   : > { %1034 = vrot.lane.b32.xlu0 %v2931_v49, %s2429_s26  ;;  %v1374_v49 = vsel %vm1370_vm3, %v2486_v20, %v3032_v35  ;;  %v1567_v55 = vsel %vm1564_vm9, %v1534_v17, %v1195_v14  ;;  %v4395_v17 = vld [vmem:[#allocation17_spill] sm:$0xff] }
 0x144   : > { %1128 = vrot.lane.b32.xlu1 %v2641_v5, %s2430_s4  ;;  %v1405_v26 = vsel %vm1401_vm4, %v1374_v49, %v3200_v29 }
 0x145   : > { %v917_v38 = vpop.permute.xlu0 %916  ;;  %v1436_v59 = vsel %vm1432_vm5, %v1405_v26, %v3318_v31  ;;  %v4396_v26 = vld [vmem:[#allocation23_spill] sm:$0xff] }
 0x146   : > { %v1197_v13 = vpop.permute.xlu1 %1196  ;;  %v1469_v63 = vsel %vm1465_vm6, %v1436_v59, %v915_v19  ;;  %v4394_v19 = vld [vmem:[#allocation22_spill] sm:$0xff]  ;;  %v1470_v46 = vsel %vm1465_vm6, %v1437_v7, %v917_v38 }
 0x147   : > { %1130 = vrot.lane.b32.xlu0 %v4392_v21, %s2430_s4  ;;  %v1502_v20 = vsel %vm1498_vm7, %v1469_v63, %v1011_v61  ;;  %v4397_v63 = vld [vmem:[#allocation25_spill] sm:$0xff] }
 0x148   : > { %1218 = vrot.lane.b32.xlu1 %v4393_v0, %s2431_s7  ;;  %v1535_v35 = vsel %vm1531_vm8, %v1502_v20, %v1107_v6 }
 0x149   : > { %v1285_v48 = vpop.permute.xlu0 %1284  ;;  %v1568_v31 = vsel %vm1564_vm9, %v1535_v35, %v1197_v13 }
 0x14a   : > { %v1600_v25 = vsel %vm1597_vm10, %v1567_v55, %v1285_v48  ;;  %v919_v28 = vpop.permute.xlu1 %918 }
 0x14b   : > { %846 = vrot.lane.b32.xlu0 %v4392_v21, %s2427_s20  ;;  %2324 = vmatprep.mubr.msk.f32.mxu0 %vm1630_vm11, %v1600_v25  ;;  %v1471_v49 = vsel %vm1465_vm6, %v1438_v9, %v919_v28 }
 0x14c   : > { %940 = vrot.lane.b32.xlu1 %v4393_v0, %s2428_s21 }
 0x14d   : > { %v1013_v29 = vpop.permute.xlu0 %1012 }
 0x14e   : > { %v1287_v12 = vpop.permute.xlu1 %1286  ;;  %v1503_v13 = vsel %vm1498_vm7, %v1470_v46, %v1013_v29  ;;  %v1375_v29 = vsel %vm1370_vm3, %v2512_v33, %v3038_v24  ;;  %v1376_v33 = vsel %vm1370_vm3, %v2524_v39, %v3040_v18 }
 0x14f   : > { %v1601_v27 = vsel %vm1597_vm10, %v1568_v31, %v1287_v12  ;;  %1220 = vrot.lane.b32.xlu0 %v4394_v19, %s2431_s7  ;;  %v1406_v31 = vsel %vm1401_vm4, %v1375_v29, %v3206_v37 }
 0x150   : > { %1308 = vrot.lane.b32.xlu1 %v2939_v4, %s2432_s8  ;;  %2325 = vmatmul.mubr.msk.f32.gmra.mxu0 %vm1630_vm11, %v1601_v27  ;;  %v1439_v12 = vsel %vm1432_vm5, %v1406_v31, %v3332_v53  ;;  %v4402_v31 = vld [vmem:[#allocation30_spill] sm:$0xff] }
 0x151   : > { %v1015_v61 = vpop.permute.xlu0 %1014 }
 0x152   : > { %v1109_v41 = vpop.permute.xlu1 %1108  ;;  %v1504_v0 = vsel %vm1498_vm7, %v1471_v49, %v1015_v61 }
 0x153   : > { %942 = vrot.lane.b32.xlu0 %v4394_v19, %s2428_s21 }
 0x154   : > { %1036 = vrot.lane.b32.xlu1 %v2939_v4, %s2429_s26  ;;  %v1536_v4 = vsel %vm1531_vm8, %v1503_v13, %v1109_v41  ;;  %v4399_v13 = vld [vmem:[#allocation26_spill] sm:$0xff] }
 0x155   : > { %v1111_v6 = vpop.permute.xlu0 %1110 }
 0x156   : > { %v1199_v14 = vpop.permute.xlu1 %1198  ;;  %v1537_v55 = vsel %vm1531_vm8, %v1504_v0, %v1111_v6 }
 0x157   : > { %1310 = vrot.lane.b32.xlu0 %v2944_v8, %s2432_s8 }
 0x158   : > { %1038 = vrot.lane.b32.xlu1 %v2944_v8, %s2429_s26  ;;  %v1569_v8 = vsel %vm1564_vm9, %v1536_v4, %v1199_v14 }
 0x159   : > { %v921_v15 = vpop.permute.xlu0 %920 }
 0x15a   : > { %v1201_v43 = vpop.permute.xlu1 %1200  ;;  %v1472_v19 = vsel %vm1465_vm6, %v1439_v12, %v921_v15 }
 0x15b   : > { %1132 = vrot.lane.b32.xlu0 %v2672_v47, %s2430_s4  ;;  %v1570_v56 = vsel %vm1564_vm9, %v1537_v55, %v1201_v43  ;;  %v4398_v43 = vld [vmem:[#allocation21_spill] sm:$0xff] }
 0x15c   : > { %848 = vrot.lane.b32.xlu1 %v2672_v47, %s2427_s20 }
 0x15d   : > { %v1289_v36 = vpop.permute.xlu0 %1288 }
 0x15e   : > { %v1602_v58 = vsel %vm1597_vm10, %v1569_v8, %v1289_v36  ;;  %v923_v38 = vpop.permute.xlu1 %922 }
 0x15f   : > { %1134 = vrot.lane.b32.xlu0 %v4395_v17, %s2430_s4  ;;  %2327 = vmatprep.mubr.msk.f32.mxu0 %vm1630_vm11, %v1602_v58  ;;  %v1377_v58 = vsel %vm1370_vm3, %v2542_v52, %v3046_v30  ;;  %v1378_v52 = vsel %vm1370_vm3, %v2539_v51, %v3048_v34 }
 0x160   : > { %1222 = vrot.lane.b32.xlu1 %v4396_v26, %s2431_s7  ;;  %v1408_v49 = vsel %vm1401_vm4, %v1377_v58, %v3214_v10  ;;  %v1409_v10 = vsel %vm1401_vm4, %v1378_v52, %v3216_v57 }
 0x161   : > { %v1017_v48 = vpop.permute.xlu0 %1016  ;;  %v1441_v0 = vsel %vm1432_vm5, %v1408_v49, %v3340_v50 }
 0x162   : > { %v1291_v16 = vpop.permute.xlu1 %1290  ;;  %v1505_v41 = vsel %vm1498_vm7, %v1472_v19, %v1017_v48  ;;  %v1379_v19 = vsel %vm1370_vm3, %v2561_v62, %v3054_v54  ;;  %v4404_v62 = vld [vmem:[#allocation31_spill] sm:$0xff]  ;;  %v4405_v54 = vld [vmem:[#allocation52_spill] sm:$0xff] }
 0x163   : > { %v1603_v59 = vsel %vm1597_vm10, %v1570_v56, %v1291_v16  ;;  %850 = vrot.lane.b32.xlu0 %v4395_v17, %s2427_s20 }
 0x164   : > { %944 = vrot.lane.b32.xlu1 %v4396_v26, %s2428_s21  ;;  %2328 = vmatmul.mubr.msk.f32.gmra.mxu0 %vm1630_vm11, %v1603_v59  ;;  %v1442_v59 = vsel %vm1432_vm5, %v1409_v10, %v3342_v44  ;;  %v4413_v10 = vld [vmem:[#allocation7_spill] sm:$0xff] }
 0x165   : > { %v1019_v25 = vpop.permute.xlu0 %1018 }
 0x166   : > { %v1113_v28 = vpop.permute.xlu1 %1112 }
 0x167   : > { %1224 = vrot.lane.b32.xlu0 %v4397_v63, %s2431_s7  ;;  %v1538_v24 = vsel %vm1531_vm8, %v1505_v41, %v1113_v28  ;;  %v4403_v41 = vld [vmem:[#allocation42_spill] sm:$0xff] }
 0x168   : > { %1312 = vrot.lane.b32.xlu1 %v2952_v40, %s2432_s8 }
 0x169   : > { %v1115_v20 = vpop.permute.xlu0 %1114 }
 0x16a   : > { %v1203_v35 = vpop.permute.xlu1 %1202 }
 0x16b   : > { %946 = vrot.lane.b32.xlu0 %v4397_v63, %s2428_s21  ;;  %v1571_v37 = vsel %vm1564_vm9, %v1538_v24, %v1203_v35 }
 0x16c   : > { %1040 = vrot.lane.b32.xlu1 %v2952_v40, %s2429_s26  ;;  %v1407_v40 = vsel %vm1401_vm4, %v1376_v33, %v3208_v1 }
 0x16d   : > { %v925_v27 = vpop.permute.xlu0 %924  ;;  %v1440_v6 = vsel %vm1432_vm5, %v1407_v40, %v3334_v42 }
 0x16e   : > { %v1205_v61 = vpop.permute.xlu1 %1204  ;;  %v1473_v15 = vsel %vm1465_vm6, %v1440_v6, %v923_v38  ;;  %v4400_v38 = vld [vmem:[#allocation27_spill] sm:$0xff]  ;;  %v1474_v55 = vsel %vm1465_vm6, %v1441_v0, %v925_v27  ;;  %v4410_v0 = vld [vmem:[#allocation45_spill] sm:$0xff] }
 0x16f   : > { %1314 = vrot.lane.b32.xlu0 %v2957_v45, %s2432_s8  ;;  %v1506_v39 = vsel %vm1498_vm7, %v1473_v15, %v1019_v25  ;;  %v4406_v6 = vld [vmem:[#allocation3_spill] sm:$0xff]  ;;  %v4408_v15 = vld [vmem:[#allocation2_spill] sm:$0xff] }
 0x170   : > { %1042 = vrot.lane.b32.xlu1 %v2957_v45, %s2429_s26  ;;  %v1539_v45 = vsel %vm1531_vm8, %v1506_v39, %v1115_v20 }
 0x171   : > { %v1293_v53 = vpop.permute.xlu0 %1292  ;;  %v1572_v42 = vsel %vm1564_vm9, %v1539_v45, %v1205_v61  ;;  %v1410_v61 = vsel %vm1401_vm4, %v1379_v19, %v3222_v32 }
 0x172   : > { %v1604_v14 = vsel %vm1597_vm10, %v1571_v37, %v1293_v53  ;;  %v927_v7 = vpop.permute.xlu1 %926  ;;  %v1443_v33 = vsel %vm1432_vm5, %v1410_v61, %v4403_v41  ;;  %v4421_v41 = vld [vmem:[#allocation43_spill] sm:$0xff] }
 0x173   : > { %1136 = vrot.lane.b32.xlu0 %v2699_v23, %s2430_s4  ;;  %2330 = vmatprep.mubr.msk.f32.mxu0 %vm1630_vm11, %v1604_v14  ;;  %v1475_v63 = vsel %vm1465_vm6, %v1442_v59, %v927_v7  ;;  %v1380_v14 = vsel %vm1370_vm3, %v4406_v6, %v4405_v54  ;;  %v4407_v7 = vld [vmem:[#allocation44_spill] sm:$0xff]  ;;  %v4415_v59 = vld [vmem:[#allocation73_spill] sm:$0xff]  ;;  %v4423_v54 = vld [vmem:[#allocation46_spill] sm:$0xff] }
 0x174   : > { %852 = vrot.lane.b32.xlu1 %v2699_v23, %s2427_s20  ;;  %v1411_v39 = vsel %vm1401_vm4, %v1380_v14, %v4408_v15 }
 0x175   : > { %v1021_v18 = vpop.permute.xlu0 %1020 }
 0x176   : > { %v1295_v1 = vpop.permute.xlu1 %1294  ;;  %v1507_v56 = vsel %vm1498_vm7, %v1474_v55, %v1021_v18 }
 0x177   : > { %v1605_v46 = vsel %vm1597_vm10, %v1572_v42, %v1295_v1  ;;  %1138 = vrot.lane.b32.xlu0 %v4398_v43, %s2430_s4  ;;  %v4409_v42 = vld [vmem:[#allocation12_spill] sm:$0xff] }
 0x178   : > { %1226 = vrot.lane.b32.xlu1 %v4399_v13, %s2431_s7  ;;  %2331 = vmatmul.mubr.msk.f32.gmra.mxu0 %vm1630_vm11, %v1605_v46  ;;  %v1444_v1 = vsel %vm1432_vm5, %v1411_v39, %v4409_v42 }
 0x179   : > { %v1023_v4 = vpop.permute.xlu0 %1022 }
 0x17a   : > { %v1117_v8 = vpop.permute.xlu1 %1116  ;;  %v1508_v51 = vsel %vm1498_vm7, %v1475_v63, %v1023_v4  ;;  %v4417_v63 = vld [vmem:[#allocation13_spill] sm:$0xff] }
 0x17b   : > { %854 = vrot.lane.b32.xlu0 %v4398_v43, %s2427_s20  ;;  %v1540_v30 = vsel %vm1531_vm8, %v1507_v56, %v1117_v8 }
 0x17c   : > { %948 = vrot.lane.b32.xlu1 %v4399_v13, %s2428_s21 }
 0x17d   : > { %v1119_v36 = vpop.permute.xlu0 %1118 }
 0x17e   : > { %v1207_v9 = vpop.permute.xlu1 %1206 }
 0x17f   : > { %1228 = vrot.lane.b32.xlu0 %v4400_v38, %s2431_s7  ;;  %v1573_v50 = vsel %vm1564_vm9, %v1540_v30, %v1207_v9  ;;  %v4412_v30 = vld [vmem:[#allocation53_spill] sm:$0xff] }
 0x180   : > { %1316 = vrot.lane.b32.xlu1 %v2965_v11, %s2432_s8 }
 0x181   : > { %v929_v26 = vpop.permute.xlu0 %928 }
 0x182   : > { %v1209_v48 = vpop.permute.xlu1 %1208  ;;  %v1476_v40 = vsel %vm1465_vm6, %v1443_v33, %v929_v26 }
 0x183   : > { %950 = vrot.lane.b32.xlu0 %v4400_v38, %s2428_s21 }
 0x184   : > { %1044 = vrot.lane.b32.xlu1 %v2965_v11, %s2429_s26  ;;  %v1541_v11 = vsel %vm1531_vm8, %v1508_v51, %v1119_v36 }
 0x185   : > { %v1297_v16 = vpop.permute.xlu0 %1296  ;;  %v1574_v44 = vsel %vm1564_vm9, %v1541_v11, %v1209_v48  ;;  %v4411_v48 = vld [vmem:[#allocation29_spill] sm:$0xff] }
 0x186   : > { %v1606_v25 = vsel %vm1597_vm10, %v1573_v50, %v1297_v16  ;;  %v931_v28 = vpop.permute.xlu1 %930  ;;  %v1381_v50 = vsel %vm1370_vm3, %v4413_v10, %v4412_v30  ;;  %v4414_v16 = vld [vmem:[#allocation28_spill] sm:$0xff] }
 0x187   : > { %1318 = vrot.lane.b32.xlu0 %v2970_v22, %s2432_s8  ;;  %2333 = vmatprep.mubr.msk.f32.mxu0 %vm1630_vm11, %v1606_v25  ;;  %v1477_v4 = vsel %vm1465_vm6, %v1444_v1, %v931_v28  ;;  %v1412_v25 = vsel %vm1401_vm4, %v1381_v50, %v4415_v59  ;;  %v4416_v28 = vld [vmem:[#allocation34_spill] sm:$0xff] }
 0x188   : > { %1046 = vrot.lane.b32.xlu1 %v2970_v22, %s2429_s26  ;;  %v4401_v22 = vld [vmem:[#allocation24_spill] sm:$0xff]  ;;  %v1445_v51 = vsel %vm1432_vm5, %v1412_v25, %v4417_v63 }
 0x189   : > { %v1025_v34 = vpop.permute.xlu0 %1024  ;;  %v4432_v25 = vld [vmem:[#allocation56_spill] sm:$0xff] }
 0x18a   : > { %v1299_v57 = vpop.permute.xlu1 %1298  ;;  %v1509_v53 = vsel %vm1498_vm7, %v1476_v40, %v1025_v34 }
 0x18b   : > { %v1607_v20 = vsel %vm1597_vm10, %v1574_v44, %v1299_v57  ;;  %1140 = vrot.lane.b32.xlu0 %v2726_v60, %s2430_s4 }
 0x18c   : > { %856 = vrot.lane.b32.xlu1 %v2726_v60, %s2427_s20  ;;  %2334 = vmatmul.mubr.msk.f32.gmra.mxu0 %vm1630_vm11, %v1607_v20  ;;  %v4418_v20 = vld [vmem:[#allocation54_spill] sm:$0xff] }
 0x18d   : > { %v1027_v35 = vpop.permute.xlu0 %1026 }
 0x18e   : > { %v1121_v29 = vpop.permute.xlu1 %1120  ;;  %v1510_v8 = vsel %vm1498_vm7, %v1477_v4, %v1027_v35  ;;  %v4419_v35 = vld [vmem:[#allocation6_spill] sm:$0xff]  ;;  %v4427_v4 = vld [vmem:[#allocation11_spill] sm:$0xff] }
 0x18f   : > { %1142 = vrot.lane.b32.xlu0 %v4401_v22, %s2430_s4  ;;  %v1542_v32 = vsel %vm1531_vm8, %v1509_v53, %v1121_v29  ;;  %v1382_v29 = vsel %vm1370_vm3, %v4419_v35, %v4418_v20  ;;  %v4422_v53 = vld [vmem:[#allocation35_spill] sm:$0xff] }
 0x190   : > { %1230 = vrot.lane.b32.xlu1 %v4402_v31, %s2431_s7 }
 0x191   : > { %v1123_v12 = vpop.permute.xlu0 %1122 }
 0x192   : > { %v1211_v27 = vpop.permute.xlu1 %1210  ;;  %v1543_v36 = vsel %vm1531_vm8, %v1510_v8, %v1123_v12  ;;  %v4420_v12 = vld [vmem:[#allocation74_spill] sm:$0xff] }
 0x193   : > { %858 = vrot.lane.b32.xlu0 %v4401_v22, %s2427_s20  ;;  %v1575_v45 = vsel %vm1564_vm9, %v1542_v32, %v1211_v27  ;;  %v1413_v27 = vsel %vm1401_vm4, %v1382_v29, %v4420_v12  ;;  %v4436_v12 = vld [vmem:[#allocation39_spill] sm:$0xff] }
 0x194   : > { %952 = vrot.lane.b32.xlu1 %v4402_v31, %s2428_s21  ;;  %v1446_v33 = vsel %vm1432_vm5, %v1413_v27, %v4421_v41 }
 0x195   : > { %v933_v24 = vpop.permute.xlu0 %932 }
 0x196   : > { %v1213_v37 = vpop.permute.xlu1 %1212  ;;  %v1478_v34 = vsel %vm1465_vm6, %v1445_v51, %v933_v24 }
 0x197   : > { %1232 = vrot.lane.b32.xlu0 %v4404_v62, %s2431_s7  ;;  %v1576_v58 = vsel %vm1564_vm9, %v1543_v36, %v1213_v37  ;;  %v4428_v36 = vld [vmem:[#allocation75_spill] sm:$0xff] }
 0x198   : > { %1320 = vrot.lane.b32.xlu1 %v4407_v7, %s2432_s8 }
 0x199   : > { %v1301_v18 = vpop.permute.xlu0 %1300 }
 0x19a   : > { %v1608_v46 = vsel %vm1597_vm10, %v1575_v45, %v1301_v18  ;;  %v935_v13 = vpop.permute.xlu1 %934  ;;  %v4424_v18 = vld [vmem:[#allocation47_spill] sm:$0xff] }
 0x19b   : > { %954 = vrot.lane.b32.xlu0 %v4404_v62, %s2428_s21  ;;  %2336 = vmatprep.mubr.msk.f32.mxu0 %vm1630_vm11, %v1608_v46  ;;  %v1479_v37 = vsel %vm1465_vm6, %v1446_v33, %v935_v13  ;;  %v4425_v46 = vld [vmem:[#allocation33_spill] sm:$0xff]  ;;  %v4426_v13 = vld [vmem:[#allocation55_spill] sm:$0xff] }
 0x19c   : > { %1048 = vrot.lane.b32.xlu1 %v4407_v7, %s2429_s26  ;;  %v1383_v8 = vsel %vm1370_vm3, %v4427_v4, %v4426_v13  ;;  %v4443_v13 = vld [vmem:[#allocation36_spill] sm:$0xff] }
 0x19d   : > { %v1029_v9 = vpop.permute.xlu0 %1028 }
 0x19e   : > { %v1303_v38 = vpop.permute.xlu1 %1302  ;;  %v1511_v57 = vsel %vm1498_vm7, %v1478_v34, %v1029_v9  ;;  %v1414_v9 = vsel %vm1401_vm4, %v1383_v8, %v4428_v36 }
 0x19f   : > { %v1609_v49 = vsel %vm1597_vm10, %v1576_v58, %v1303_v38  ;;  %1322 = vrot.lane.b32.xlu0 %v4410_v0, %s2432_s8  ;;  %v4429_v38 = vld [vmem:[#allocation89_spill] sm:$0xff] }
 0x1a0   : > { %1050 = vrot.lane.b32.xlu1 %v4410_v0, %s2429_s26  ;;  %2337 = vmatmul.mubr.msk.f32.gmra.mxu0 %vm1630_vm11, %v1609_v49  ;;  %v1447_v49 = vsel %vm1432_vm5, %v1414_v9, %v4429_v38 }
 0x1a1   : > { %v1031_v26 = vpop.permute.xlu0 %1030 }
 0x1a2   : > { %v1125_v55 = vpop.permute.xlu1 %1124  ;;  %v1512_v62 = vsel %vm1498_vm7, %v1479_v37, %v1031_v26 }
 0x1a3   : > { %1144 = vrot.lane.b32.xlu0 %v4411_v48, %s2430_s4  ;;  %v1544_v31 = vsel %vm1531_vm8, %v1511_v57, %v1125_v55  ;;  %v4430_v55 = vld [vmem:[#allocation32_spill] sm:$0xff] }
 0x1a4   : > { %860 = vrot.lane.b32.xlu1 %v4411_v48, %s2427_s20 }
 0x1a5   : > { %v1127_v56 = vpop.permute.xlu0 %1126 }
 0x1a6   : > { %v1215_v52 = vpop.permute.xlu1 %1214  ;;  %v1545_v6 = vsel %vm1531_vm8, %v1512_v62, %v1127_v56 }
 0x1a7   : > { %1146 = vrot.lane.b32.xlu0 %v4414_v16, %s2430_s4  ;;  %v1577_v19 = vsel %vm1564_vm9, %v1544_v31, %v1215_v52  ;;  %v4431_v52 = vld [vmem:[#allocation38_spill] sm:$0xff] }
 0x1a8   : > { %1234 = vrot.lane.b32.xlu1 %v4416_v28, %s2431_s7 }
 0x1a9   : > { %v937_v11 = vpop.permute.xlu0 %936 }
 0x1aa   : > { %v1217_v44 = vpop.permute.xlu1 %1216  ;;  %v1480_v26 = vsel %vm1465_vm6, %v1447_v49, %v937_v11  ;;  %v4434_v11 = vld [vmem:[#allocation76_spill] sm:$0xff]  ;;  %v4445_v49 = vld [vmem:[#allocation58_spill] sm:$0xff] }
 0x1ab   : > { %862 = vrot.lane.b32.xlu0 %v4414_v16, %s2427_s20  ;;  %v1578_v32 = vsel %vm1564_vm9, %v1545_v6, %v1217_v44  ;;  %v4435_v44 = vld [vmem:[#allocation90_spill] sm:$0xff]  ;;  %v4439_v6 = vld [vmem:[#allocation37_spill] sm:$0xff] }
 0x1ac   : > { %956 = vrot.lane.b32.xlu1 %v4416_v28, %s2428_s21  ;;  %v4433_v28 = vld [vmem:[#allocation10_spill] sm:$0xff] }
 0x1ad   : > { %v1305_v61 = vpop.permute.xlu0 %1304  ;;  %v1384_v63 = vsel %vm1370_vm3, %v4433_v28, %v4432_v25  ;;  %v4447_v25 = vld [vmem:[#allocation41_spill] sm:$0xff]  ;;  %v212_v28 = vld [vmem:[%s2469_s17 + $0xf0] sm:$0xff] }
 0x1ae   : > { %v1610_v24 = vsel %vm1597_vm10, %v1577_v19, %v1305_v61  ;;  %v939_v40 = vpop.permute.xlu1 %938  ;;  %v1415_v34 = vsel %vm1401_vm4, %v1384_v63, %v4434_v11  ;;  %v4437_v19 = vld [vmem:[#allocation48_spill] sm:$0xff]  ;;  %v213_v63 = vld [vmem:[%s2469_s17 + $0xf8] sm:$0xff]  ;;  %v4448_v11 = vld [vmem:[#allocation50_spill] sm:$0xff] }
 0x1af   : > { %1236 = vrot.lane.b32.xlu0 %v4422_v53, %s2431_s7  ;;  %2339 = vmatprep.mubr.msk.f32.mxu0 %vm1630_vm11, %v1610_v24  ;;  %v1448_v57 = vsel %vm1432_vm5, %v1415_v34, %v4435_v44 }
 0x1b0   : > { %1324 = vrot.lane.b32.xlu1 %v4423_v54, %s2432_s8  ;;  %v1481_v35 = vsel %vm1465_vm6, %v1448_v57, %v939_v40 }
 0x1b1   : > { %v1033_v14 = vpop.permute.xlu0 %1032 }
 0x1b2   : > { %v1307_v7 = vpop.permute.xlu1 %1306  ;;  %v1513_v56 = vsel %vm1498_vm7, %v1480_v26, %v1033_v14  ;;  %v4440_v14 = vld [vmem:[#allocation57_spill] sm:$0xff] }
 0x1b3   : > { %v1611_v15 = vsel %vm1597_vm10, %v1578_v32, %v1307_v7  ;;  %958 = vrot.lane.b32.xlu0 %v4422_v53, %s2428_s21  ;;  %v4438_v53 = vld [vmem:[#allocation49_spill] sm:$0xff]  ;;  %v1385_v32 = vsel %vm1370_vm3, %v2635_v3, %v4440_v14  ;;  %v4444_v3 = vld [vmem:[#allocation40_spill] sm:$0xff] }
 0x1b4   : > { %1052 = vrot.lane.b32.xlu1 %v4423_v54, %s2429_s26  ;;  %2340 = vmatmul.mubr.msk.f32.gmra.mxu0 %vm1630_vm11, %v1611_v15  ;;  %v4441_v7 = vld [vmem:[#allocation77_spill] sm:$0xff]  ;;  %v4451_v14 = vld [vmem:[#allocation4_spill] sm:$0xff] }
 0x1b5   : > { %v1035_v39 = vpop.permute.xlu0 %1034  ;;  %v1416_v15 = vsel %vm1401_vm4, %v1385_v32, %v4441_v7 }
 0x1b6   : > { %v1129_v45 = vpop.permute.xlu1 %1128  ;;  %v1514_v31 = vsel %vm1498_vm7, %v1481_v35, %v1035_v39  ;;  %v324_v35 = vrot.slane %v212_v28, 7 }
 0x1b7   : > { %1326 = vrot.lane.b32.xlu0 %v4424_v18, %s2432_s8  ;;  %v1546_v30 = vsel %vm1531_vm8, %v1513_v56, %v1129_v45  ;;  %v4442_v45 = vld [vmem:[#allocation15_spill] sm:$0xff]  ;;  %v4446_v56 = vld [vmem:[#allocation78_spill] sm:$0xff] }
 0x1b8   : > { %1054 = vrot.lane.b32.xlu1 %v4424_v18, %s2429_s26  ;;  %v1449_v18 = vsel %vm1432_vm5, %v1416_v15, %v4442_v45 }
 0x1b9   : > { %v1131_v42 = vpop.permute.xlu0 %1130 }
 0x1ba   : > { %v1219_v1 = vpop.permute.xlu1 %1218  ;;  %v1547_v27 = vsel %vm1531_vm8, %v1514_v31, %v1131_v42 }
 0x1bb   : > { %1148 = vrot.lane.b32.xlu0 %v4425_v46, %s2430_s4  ;;  %v1579_v50 = vsel %vm1564_vm9, %v1546_v30, %v1219_v1 }
 0x1bc   : > { %864 = vrot.lane.b32.xlu1 %v4425_v46, %s2427_s20 }
 0x1bd   : > { %v847_v58 = vpop.permute.xlu0 %846 }
 0x1be   : > { %v941_v0 = vpop.permute.xlu1 %940 }
 0x1bf   : > { %1150 = vrot.lane.b32.xlu0 %v4430_v55, %s2430_s4  ;;  %v1482_v1 = vsel %vm1465_vm6, %v1449_v18, %v941_v0  ;;  %v1386_v0 = vsel %vm1370_vm3, %v2632_v2, %v4445_v49 }
 0x1c0   : > { %1238 = vrot.lane.b32.xlu1 %v4431_v52, %s2431_s7 }
 0x1c1   : > { %v1221_v10 = vpop.permute.xlu0 %1220 }
 0x1c2   : > { %v1309_v59 = vpop.permute.xlu1 %1308  ;;  %v1580_v61 = vsel %vm1564_vm9, %v1547_v27, %v1221_v10 }
 0x1c3   : > { %v1612_v51 = vsel %vm1597_vm10, %v1579_v50, %v1309_v59  ;;  %866 = vrot.lane.b32.xlu0 %v4430_v55, %s2427_s20 }
 0x1c4   : > { %960 = vrot.lane.b32.xlu1 %v4431_v52, %s2428_s21  ;;  %2342 = vmatprep.mubr.msk.f32.mxu0 %vm1630_vm11, %v1612_v51  ;;  %v1417_v52 = vsel %vm1401_vm4, %v1386_v0, %v4446_v56  ;;  %v4453_v56 = vld [vmem:[#allocation79_spill] sm:$0xff] }
 0x1c5   : > { %v943_v20 = vpop.permute.xlu0 %942  ;;  %v1450_v30 = vsel %vm1432_vm5, %v1417_v52, %v847_v58 }
 0x1c6   : > { %v1037_v29 = vpop.permute.xlu1 %1036  ;;  %v1483_v50 = vsel %vm1465_vm6, %v1450_v30, %v943_v20  ;;  %v245_v20 = vrot.slane %v212_v28, 1 }
 0x1c7   : > { %1240 = vrot.lane.b32.xlu0 %v4436_v12, %s2431_s7  ;;  %v1515_v4 = vsel %vm1498_vm7, %v1482_v1, %v1037_v29  ;;  %v325_v29 = vrot.slane %v213_v63, 7 }
 0x1c8   : > { %1328 = vrot.lane.b32.xlu1 %v4437_v19, %s2432_s8  ;;  %v421_v27 = vsel %vm278_vm0, %v245_v20, %v324_v35 }
 0x1c9   : > { %v1311_v41 = vpop.permute.xlu0 %1310 }
 0x1ca   : > { %v1613_v33 = vsel %vm1597_vm10, %v1580_v61, %v1311_v41  ;;  %v1039_v24 = vpop.permute.xlu1 %1038  ;;  %v4449_v61 = vld [vmem:[#allocation51_spill] sm:$0xff] }
 0x1cb   : > { %962 = vrot.lane.b32.xlu0 %v4436_v12, %s2428_s21  ;;  %2343 = vmatmul.mubr.msk.f32.gmra.mxu0 %vm1630_vm11, %v1613_v33  ;;  %v1516_v2 = vsel %vm1498_vm7, %v1483_v50, %v1039_v24  ;;  %v622_v33 = vrot.slane %v421_v27, 1  ;;  %v389_v24 = vrot.slane %v213_v63, 5 }
 0x1cc   : > { %1056 = vrot.lane.b32.xlu1 %v4437_v19, %s2429_s26  ;;  %v326_v19 = vsel %vm278_vm0, %v324_v35, %v325_v29 }
 0x1cd   : > { %v1133_v40 = vpop.permute.xlu0 %1132  ;;  %v437_v45 = vsel %vm278_vm0, %v325_v29, %v389_v24 }
 0x1ce   : > { %v3751_v37 = vpop.permute.xlu1 %848  ;;  %v1548_v8 = vsel %vm1531_vm8, %v1515_v4, %v1133_v40  ;;  %v623_v40 = vrot.slane %v326_v19, 1 }
 0x1cf   : > { %1330 = vrot.lane.b32.xlu0 %v4438_v53, %s2432_s8 }
 0x1d0   : > { %1058 = vrot.lane.b32.xlu1 %v4438_v53, %s2429_s26  ;;  %v624_v15 = vsel %vm468_vm1, %v622_v33, %v623_v40 }
 0x1d1   : > { %v1135_v62 = vpop.permute.xlu0 %1134 }
 0x1d2   : > { %v1223_v54 = vpop.permute.xlu1 %1222  ;;  %v1549_v51 = vsel %vm1531_vm8, %v1516_v2, %v1135_v62  ;;  %v4450_v62 = vld [vmem:[#allocation59_spill] sm:$0xff] }
 0x1d3   : > { %1152 = vrot.lane.b32.xlu0 %v4439_v6, %s2430_s4  ;;  %v1581_v9 = vsel %vm1564_vm9, %v1548_v8, %v1223_v54  ;;  %v1387_v54 = vsel %vm1370_vm3, %v2641_v5, %v4450_v62  ;;  %v4454_v62 = vld [vmem:[#allocation61_spill] sm:$0xff] }
 0x1d4   : > { %868 = vrot.lane.b32.xlu1 %v4439_v6, %s2427_s20  ;;  %v1418_v32 = vsel %vm1401_vm4, %v1387_v54, %v4451_v14  ;;  %v1389_v54 = vsel %vm1370_vm3, %v2672_v47, %v4454_v62  ;;  %v4455_v14 = vld [vmem:[#allocation5_spill] sm:$0xff]  ;;  %v4456_v47 = vld [vmem:[#allocation62_spill] sm:$0xff] }
 0x1d5   : > { %v3766_v39 = vpop.permute.xlu0 %850  ;;  %v1451_v18 = vsel %vm1432_vm5, %v1418_v32, %v3751_v37  ;;  %v1420_v32 = vsel %vm1401_vm4, %v1389_v54, %v4455_v14 }
 0x1d6   : > { %v945_v42 = vpop.permute.xlu1 %944 }
 0x1d7   : > { %1154 = vrot.lane.b32.xlu0 %v4443_v13, %s2430_s4  ;;  %v1484_v4 = vsel %vm1465_vm6, %v1451_v18, %v945_v42 }
 0x1d8   : > { %1242 = vrot.lane.b32.xlu1 %v4444_v3, %s2431_s7 }
 0x1d9   : > { %v1225_v36 = vpop.permute.xlu0 %1224 }
 0x1da   : > { %v1313_v38 = vpop.permute.xlu1 %1312  ;;  %v1582_v34 = vsel %vm1564_vm9, %v1549_v51, %v1225_v36  ;;  %v627_v36 = vrot.slane %v421_v27, 2  ;;  %v630_v51 = vrot.slane %v437_v45, 2 }
 0x1db   : > { %870 = vrot.lane.b32.xlu0 %v4443_v13, %s2427_s20  ;;  %v1614_v26 = vsel %vm1597_vm10, %v1581_v9, %v1313_v38  ;;  %v628_v9 = vrot.slane %v326_v19, 2 }
 0x1dc   : > { %964 = vrot.lane.b32.xlu1 %v4444_v3, %s2428_s21  ;;  %2345 = vmatprep.mubr.msk.f32.mxu1 %vm1630_vm11, %v1614_v26  ;;  %v625_v3 = vrot.slane %v437_v45, 1  ;;  %v4452_v26 = vld [vmem:[#allocation60_spill] sm:$0xff] }
 0x1dd   : > { %v947_v10 = vpop.permute.xlu0 %946  ;;  %v1388_v37 = vsel %vm1370_vm3, %v4392_v21, %v4452_v26  ;;  %v629_v21 = vsel %vm544_vm2, %v627_v36, %v628_v9 }
 0x1de   : > { %v1041_v59 = vpop.permute.xlu1 %1040  ;;  %v1419_v52 = vsel %vm1401_vm4, %v1388_v37, %v4453_v56  ;;  %v626_v30 = vsel %vm468_vm1, %v623_v40, %v625_v3 }
 0x1df   : > { %1244 = vrot.lane.b32.xlu0 %v4447_v25, %s2431_s7  ;;  %v1517_v5 = vsel %vm1498_vm7, %v1484_v4, %v1041_v59  ;;  %v1452_v50 = vsel %vm1432_vm5, %v1419_v52, %v3766_v39 }
 0x1e0   : > { %1332 = vrot.lane.b32.xlu1 %v4448_v11, %s2432_s8  ;;  %v1485_v2 = vsel %vm1465_vm6, %v1452_v50, %v947_v10 }
 0x1e1   : > { %v1315_v44 = vpop.permute.xlu0 %1314 }
 0x1e2   : > { %v1615_v58 = vsel %vm1597_vm10, %v1582_v34, %v1315_v44  ;;  %v1043_v57 = vpop.permute.xlu1 %1042 }
 0x1e3   : > { %966 = vrot.lane.b32.xlu0 %v4447_v25, %s2428_s21  ;;  %2346 = vmatmul.mubr.msk.f32.vlgmr.msra.gmra.mxu1 %vm1630_vm11, %v1615_v58  ;;  %v1518_v28 = vsel %vm1498_vm7, %v1485_v2, %v1043_v57  ;;  %v631_v58 = vsel %vm544_vm2, %v628_v9, %v630_v51 }
 0x1e4   : > { %1060 = vrot.lane.b32.xlu1 %v4448_v11, %s2429_s26 }
 0x1e5   : > { %v1137_v31 = vpop.permute.xlu0 %1136 }
 0x1e6   : > { %v3806_v12 = vpop.permute.xlu1 %852  ;;  %v1550_v8 = vsel %vm1531_vm8, %v1517_v5, %v1137_v31 }
 0x1e7   : > { %1334 = vrot.lane.b32.xlu0 %v4449_v61, %s2432_s8  ;;  %v1453_v45 = vsel %vm1432_vm5, %v1420_v32, %v3806_v12  ;;  %v4460_v32 = vld [vmem:[#allocation64_spill] sm:$0xff] }
 0x1e8   : > { %1062 = vrot.lane.b32.xlu1 %v4449_v61, %s2429_s26 }
 0x1e9   : > { %v1139_v41 = vpop.permute.xlu0 %1138 }
 0x1ea   : > { %v1227_v53 = vpop.permute.xlu1 %1226  ;;  %v1551_v63 = vsel %vm1531_vm8, %v1518_v28, %v1139_v41 }
 0x1eb   : > { %1156 = vrot.lane.b32.xlu0 %v421_v27, %s2430_s4  ;;  %v1583_v49 = vsel %vm1564_vm9, %v1550_v8, %v1227_v53 }
 0x1ec   : > { %872 = vrot.lane.b32.xlu1 %v421_v27, %s2427_s20 }
 0x1ed   : > { %v3821_v7 = vpop.permute.xlu0 %854 }
 0x1ee   : > { %v949_v1 = vpop.permute.xlu1 %948 }
 0x1ef   : > { %1158 = vrot.lane.b32.xlu0 %v326_v19, %s2430_s4  ;;  %v1486_v4 = vsel %vm1465_vm6, %v1453_v45, %v949_v1  ;;  %v1392_v45 = vsel %vm1370_vm3, %v4398_v43, %v4460_v32 }
 0x1f0   : > { %1246 = vrot.lane.b32.xlu1 %v624_v15, %s2431_s7 }
 0x1f1   : > { %v1229_v38 = vpop.permute.xlu0 %1228 }
 0x1f2   : > { %v1317_v0 = vpop.permute.xlu1 %1316  ;;  %v1584_v11 = vsel %vm1564_vm9, %v1551_v63, %v1229_v38  ;;  %v1390_v38 = vsel %vm1370_vm3, %v4395_v17, %v4456_v47 }
 0x1f3   : > { %v1616_v42 = vsel %vm1597_vm10, %v1583_v49, %v1317_v0  ;;  %874 = vrot.lane.b32.xlu0 %v326_v19, %s2427_s20  ;;  %v4457_v0 = vld [vmem:[#allocation80_spill] sm:$0xff] }
 0x1f4   : > { %968 = vrot.lane.b32.xlu1 %v624_v15, %s2428_s21  ;;  %2348 = vmatprep.mubr.msk.f32.mxu1 %vm1630_vm11, %v1616_v42  ;;  %v1421_v12 = vsel %vm1401_vm4, %v1390_v38, %v4457_v0 }
 0x1f5   : > { %v951_v59 = vpop.permute.xlu0 %950  ;;  %v1454_v1 = vsel %vm1432_vm5, %v1421_v12, %v3821_v7 }
 0x1f6   : > { %v1045_v25 = vpop.permute.xlu1 %1044  ;;  %v1487_v37 = vsel %vm1465_vm6, %v1454_v1, %v951_v59 }
 0x1f7   : > { %1248 = vrot.lane.b32.xlu0 %v626_v30, %s2431_s7  ;;  %v1519_v5 = vsel %vm1498_vm7, %v1486_v4, %v1045_v25 }
 0x1f8   : > { %1336 = vrot.lane.b32.xlu1 %v629_v21, %s2432_s8 }
 0x1f9   : > { %v1319_v34 = vpop.permute.xlu0 %1318 }
 0x1fa   : > { %v1617_v39 = vsel %vm1597_vm10, %v1584_v11, %v1319_v34  ;;  %v1047_v44 = vpop.permute.xlu1 %1046 }
 0x1fb   : > { %970 = vrot.lane.b32.xlu0 %v626_v30, %s2428_s21  ;;  %2349 = vmatmul.mubr.msk.f32.gmra.mxu1 %vm1630_vm11, %v1617_v39  ;;  %v1520_v56 = vsel %vm1498_vm7, %v1487_v37, %v1047_v44 }
 0x1fc   : > { %v2323_v10 = vpop.f32.mrf.mxu0  ;;  %1064 = vrot.lane.b32.xlu1 %v629_v21, %s2429_s26 }
 0x1fd   : > { %1905 = vst.msk [vmem:[%s3858_s9 + $0x8] sm:$0xff] %vm1370_vm3, %v2323_v10  ;;  %v2006_v57 = vmul.f32 %v2323_v10, %v2323_v10  ;;  %v1141_v20 = vpop.permute.xlu0 %1140  ;;  %v1937_v31 = vsel %vm1370_vm3, %v2323_v10, 0.0 }
 0x1fe   : > { %v1745_v35 = vpop.f32.mrf.mxu0  ;;  %v857_v29 = vpop.permute.xlu1 %856  ;;  %v1552_v3 = vsel %vm1531_vm8, %v1519_v5, %v1141_v20  ;;  %v4461_v5 = vld [vmem:[#allocation82_spill] sm:$0xff] }
 0x1ff   : > { %1904 = vst.msk [vmem:[%s3858_s9] sm:$0xff] %vm1370_vm3, %v1745_v35  ;;  %v1936_v27 = vsel %vm1370_vm3, %v1745_v35, 0.0  ;;  %v2005_v19 = vmul.f32 %v1745_v35, %v1745_v35  ;;  %1338 = vrot.lane.b32.xlu0 %v631_v58, %s2432_s8  ;;  %v2038_v41 = vsel %vm1370_vm3, %v2006_v57, 0.0 }
 0x200   : > { %v1938_v61 = vadd.f32 %v1937_v31, %v1936_v27  ;;  %1066 = vrot.lane.b32.xlu1 %v631_v58, %s2429_s26  ;;  %v4458_v31 = vld [vmem:[#allocation63_spill] sm:$0xff] }
 0x201   : > { %v2037_v33 = vsel %vm1370_vm3, %v2005_v19, 0.0  ;;  %v1143_v24 = vpop.permute.xlu0 %1142  ;;  %v1391_v27 = vsel %vm1370_vm3, %v2699_v23, %v4458_v31  ;;  %v4459_v19 = vld [vmem:[#allocation81_spill] sm:$0xff] }
 0x202   : > { %v2039_v40 = vadd.f32 %v2038_v41, %v2037_v33  ;;  %v1231_v53 = vpop.permute.xlu1 %1230  ;;  %v1553_v52 = vsel %vm1531_vm8, %v1520_v56, %v1143_v24 }
 0x203   : > { %v1585_v36 = vsel %vm1564_vm9, %v1552_v3, %v1231_v53 }
 0x205   : > { %v859_v15 = vpop.permute.xlu0 %858 }
 0x206   : > { %v953_v18 = vpop.permute.xlu1 %952 }
 0x209   : > { %v1233_v8 = vpop.permute.xlu0 %1232 }
 0x20a   : > { %v1321_v9 = vpop.permute.xlu1 %1320  ;;  %v1586_v30 = vsel %vm1564_vm9, %v1553_v52, %v1233_v8 }
 0x20b   : > { %v1618_v49 = vsel %vm1597_vm10, %v1585_v36, %v1321_v9 }
 0x20c   : > { %2351 = vmatprep.mubr.msk.f32.mxu1 %vm1630_vm11, %v1618_v49 }
 0x20d   : > { %v955_v26 = vpop.permute.xlu0 %954 }
 0x20e   : > { %v1049_v42 = vpop.permute.xlu1 %1048 }
 0x210   : > { %v2326_v17 = vpop.f32.mrf.mxu0 }
 0x211   : > { %1907 = vst.msk [vmem:[%s3858_s9 + $0x18] sm:$0xff] %vm1370_vm3, %v2326_v17  ;;  %v1323_v50 = vpop.permute.xlu0 %1322  ;;  %v2008_v28 = vmul.f32 %v2326_v17, %v2326_v17  ;;  %v1941_v51 = vsel %vm1370_vm3, %v2326_v17, 0.0 }
 0x212   : > { %v1619_v21 = vsel %vm1597_vm10, %v1586_v30, %v1323_v50  ;;  %v1755_v2 = vpop.f32.mrf.mxu0  ;;  %v1051_v25 = vpop.permute.xlu1 %1050 }
 0x213   : > { %1906 = vst.msk [vmem:[%s3858_s9 + $0x10] sm:$0xff] %vm1370_vm3, %v1755_v2  ;;  %v1939_v7 = vsel %vm1370_vm3, %v1755_v2, 0.0  ;;  %v2007_v59 = vmul.f32 %v1755_v2, %v1755_v2  ;;  %2352 = vmatmul.mubr.msk.f32.gmra.mxu1 %vm1630_vm11, %v1619_v21  ;;  %v2042_v58 = vsel %vm1370_vm3, %v2008_v28, 0.0 }
 0x214   : > { %v1940_v63 = vadd.f32 %v1939_v7, %v1938_v61  ;;  %v1422_v61 = vsel %vm1401_vm4, %v1391_v27, %v4459_v19 }
 0x215   : > { %v2040_v11 = vsel %vm1370_vm3, %v2007_v59, 0.0  ;;  %v1145_v34 = vpop.permute.xlu0 %1144  ;;  %v1455_v33 = vsel %vm1432_vm5, %v1422_v61, %v857_v29  ;;  %v1423_v29 = vsel %vm1401_vm4, %v1392_v45, %v4461_v5  ;;  %v4462_v59 = vld [vmem:[#allocation65_spill] sm:$0xff] }
 0x216   : > { %v2041_v39 = vadd.f32 %v2040_v11, %v2039_v40  ;;  %v861_v44 = vpop.permute.xlu1 %860  ;;  %v1942_v10 = vadd.f32 %v1941_v51, %v1940_v63  ;;  %v1488_v40 = vsel %vm1465_vm6, %v1455_v33, %v953_v18  ;;  %v1456_v18 = vsel %vm1432_vm5, %v1423_v29, %v859_v15  ;;  %v4463_v51 = vld [vmem:[#allocation83_spill] sm:$0xff] }
 0x217   : > { %v1521_v53 = vsel %vm1498_vm7, %v1488_v40, %v1049_v42  ;;  %v1489_v36 = vsel %vm1465_vm6, %v1456_v18, %v955_v26  ;;  %v1393_v63 = vsel %vm1370_vm3, %v2726_v60, %v4462_v59  ;;  %v4464_v60 = vld [vmem:[#allocation66_spill] sm:$0xff] }
 0x218   : > { %v2043_v57 = vadd.f32 %v2042_v58, %v2041_v39  ;;  %v1554_v62 = vsel %vm1531_vm8, %v1521_v53, %v1145_v34  ;;  %v1522_v38 = vsel %vm1498_vm7, %v1489_v36, %v1051_v25  ;;  %v1424_v11 = vsel %vm1401_vm4, %v1393_v63, %v4463_v51 }
 0x219   : > { %v1147_v20 = vpop.permute.xlu0 %1146  ;;  %v1457_v39 = vsel %vm1432_vm5, %v1424_v11, %v861_v44  ;;  %v1394_v27 = vsel %vm1370_vm3, %v4401_v22, %v4464_v60 }
 0x21a   : > { %v1235_v35 = vpop.permute.xlu1 %1234  ;;  %v1555_v12 = vsel %vm1531_vm8, %v1522_v38, %v1147_v20 }
 0x21b   : > { %v1587_v14 = vsel %vm1564_vm9, %v1554_v62, %v1235_v35  ;;  %v4465_v62 = vld [vmem:[#allocation84_spill] sm:$0xff] }
 0x21d   : > { %v3913_v41 = vpop.permute.xlu0 %862 }
 0x21e   : > { %v957_v24 = vpop.permute.xlu1 %956 }
 0x21f   : > { %v1490_v58 = vsel %vm1465_vm6, %v1457_v39, %v957_v24 }
 0x221   : > { %v1237_v54 = vpop.permute.xlu0 %1236 }
 0x222   : > { %v1325_v23 = vpop.permute.xlu1 %1324  ;;  %v1588_v15 = vsel %vm1564_vm9, %v1555_v12, %v1237_v54  ;;  %v1425_v54 = vsel %vm1401_vm4, %v1394_v27, %v4465_v62  ;;  %v4469_v27 = vld [vmem:[#allocation86_spill] sm:$0xff] }
 0x223   : > { %v1620_v4 = vsel %vm1597_vm10, %v1587_v14, %v1325_v23  ;;  %v1458_v22 = vsel %vm1432_vm5, %v1425_v54, %v3913_v41 }
 0x224   : > { %v2329_v3 = vpop.f32.mrf.mxu0  ;;  %2354 = vmatprep.mubr.msk.f32.mxu1 %vm1630_vm11, %v1620_v4 }
 0x225   : > { %1909 = vst.msk [vmem:[%s3858_s9 + $0x28] sm:$0xff] %vm1370_vm3, %v2329_v3  ;;  %v959_v8 = vpop.permute.xlu0 %958  ;;  %v2010_v43 = vmul.f32 %v2329_v3, %v2329_v3  ;;  %v1945_v37 = vsel %vm1370_vm3, %v2329_v3, 0.0 }
 0x226   : > { %v1765_v9 = vpop.f32.mrf.mxu0  ;;  %v1053_v47 = vpop.permute.xlu1 %1052  ;;  %v1491_v4 = vsel %vm1465_vm6, %v1458_v22, %v959_v8 }
 0x227   : > { %1908 = vst.msk [vmem:[%s3858_s9 + $0x20] sm:$0xff] %vm1370_vm3, %v1765_v9  ;;  %v1943_v49 = vsel %vm1370_vm3, %v1765_v9, 0.0  ;;  %v2009_v0 = vmul.f32 %v1765_v9, %v1765_v9  ;;  %v2046_v50 = vsel %vm1370_vm3, %v2010_v43, 0.0 }
 0x228   : > { %v1944_v1 = vadd.f32 %v1943_v49, %v1942_v10 }
 0x229   : > { %v2044_v42 = vsel %vm1370_vm3, %v2009_v0, 0.0  ;;  %v1327_v26 = vpop.permute.xlu0 %1326 }
 0x22a   : > { %v2045_v56 = vadd.f32 %v2044_v42, %v2043_v57  ;;  %v1621_v52 = vsel %vm1597_vm10, %v1588_v15, %v1327_v26  ;;  %v1055_v17 = vpop.permute.xlu1 %1054  ;;  %v1946_v30 = vadd.f32 %v1945_v37, %v1944_v1  ;;  %v1523_v57 = vsel %vm1498_vm7, %v1490_v58, %v1053_v47  ;;  %v4466_v15 = vld [vmem:[#allocation67_spill] sm:$0xff]  ;;  %v4467_v26 = vld [vmem:[#allocation85_spill] sm:$0xff] }
 0x22b   : > { %2355 = vmatmul.mubr.msk.f32.gmra.mxu1 %vm1630_vm11, %v1621_v52  ;;  %v1524_v18 = vsel %vm1498_vm7, %v1491_v4, %v1055_v17  ;;  %v1395_v37 = vsel %vm1370_vm3, %v4411_v48, %v4466_v15 }
 0x22c   : > { %v2047_v21 = vadd.f32 %v2046_v50, %v2045_v56  ;;  %v1426_v56 = vsel %vm1401_vm4, %v1395_v37, %v4467_v26 }
 0x22d   : > { %v1149_v2 = vpop.permute.xlu0 %1148 }
 0x22e   : > { %v865_v25 = vpop.permute.xlu1 %864  ;;  %v1556_v35 = vsel %vm1531_vm8, %v1523_v57, %v1149_v2 }
 0x22f   : > { %v1459_v17 = vsel %vm1432_vm5, %v1426_v56, %v865_v25 }
 0x231   : > { %v1151_v28 = vpop.permute.xlu0 %1150 }
 0x232   : > { %v1239_v7 = vpop.permute.xlu1 %1238  ;;  %v1557_v9 = vsel %vm1531_vm8, %v1524_v18, %v1151_v28 }
 0x233   : > { %v1589_v19 = vsel %vm1564_vm9, %v1556_v35, %v1239_v7 }
 0x235   : > { %v3947_v34 = vpop.permute.xlu0 %866 }
 0x236   : > { %v961_v10 = vpop.permute.xlu1 %960 }
 0x238   : > { %v2332_v20 = vpop.f32.mrf.mxu0 }
 0x239   : > { %1911 = vst.msk [vmem:[%s3858_s9 + $0x38] sm:$0xff] %vm1370_vm3, %v2332_v20  ;;  %v1241_v31 = vpop.permute.xlu0 %1240  ;;  %v2012_v44 = vmul.f32 %v2332_v20, %v2332_v20  ;;  %v1949_v23 = vsel %vm1370_vm3, %v2332_v20, 0.0  ;;  %v4468_v20 = vld [vmem:[#allocation68_spill] sm:$0xff] }
 0x23a   : > { %v1775_v61 = vpop.f32.mrf.mxu0  ;;  %v1329_v33 = vpop.permute.xlu1 %1328  ;;  %v1590_v41 = vsel %vm1564_vm9, %v1557_v9, %v1241_v31  ;;  %v1396_v35 = vsel %vm1370_vm3, %v4414_v16, %v4468_v20 }
 0x23b   : > { %1910 = vst.msk [vmem:[%s3858_s9 + $0x30] sm:$0xff] %vm1370_vm3, %v1775_v61  ;;  %v1947_v24 = vsel %vm1370_vm3, %v1775_v61, 0.0  ;;  %v2011_v40 = vmul.f32 %v1775_v61, %v1775_v61  ;;  %v1622_v53 = vsel %vm1597_vm10, %v1589_v19, %v1329_v33  ;;  %v2050_v36 = vsel %vm1370_vm3, %v2012_v44, 0.0 }
 0x23c   : > { %v1948_v14 = vadd.f32 %v1947_v24, %v1946_v30  ;;  %2357 = vmatprep.mubr.msk.f32.mxu1 %vm1630_vm11, %v1622_v53  ;;  %v1427_v19 = vsel %vm1401_vm4, %v1396_v35, %v4469_v27  ;;  %v4476_v27 = vld [vmem:[#allocation72_spill] sm:$0xff] }
 0x23d   : > { %v2048_v32 = vsel %vm1370_vm3, %v2011_v40, 0.0  ;;  %v963_v45 = vpop.permute.xlu0 %962  ;;  %v1460_v33 = vsel %vm1432_vm5, %v1427_v19, %v3947_v34  ;;  %v1400_v19 = vsel %vm1370_vm3, %v4443_v13, %v4476_v27 }
 0x23e   : > { %v2049_v5 = vadd.f32 %v2048_v32, %v2047_v21  ;;  %v1057_v29 = vpop.permute.xlu1 %1056  ;;  %v1950_v3 = vadd.f32 %v1949_v23, %v1948_v14  ;;  %v1492_v21 = vsel %vm1465_vm6, %v1459_v17, %v961_v10  ;;  %v1493_v24 = vsel %vm1465_vm6, %v1460_v33, %v963_v45 }
 0x23f   : > { %v1525_v7 = vsel %vm1498_vm7, %v1492_v21, %v1057_v29 }
 0x240   : > { %v2051_v47 = vadd.f32 %v2050_v36, %v2049_v5  ;;  %v4470_v36 = vld [vmem:[#allocation69_spill] sm:$0xff] }
 0x241   : > { %v1331_v38 = vpop.permute.xlu0 %1330  ;;  %v1397_v9 = vsel %vm1370_vm3, %v4425_v46, %v4470_v36 }
 0x242   : > { %v1623_v43 = vsel %vm1597_vm10, %v1590_v41, %v1331_v38  ;;  %v1059_v49 = vpop.permute.xlu1 %1058  ;;  %v4471_v41 = vld [vmem:[#allocation8_spill] sm:$0xff] }
 0x243   : > { %2358 = vmatmul.mubr.msk.f32.gmra.mxu1 %vm1630_vm11, %v1623_v43  ;;  %v1526_v16 = vsel %vm1498_vm7, %v1493_v24, %v1059_v49  ;;  %v1428_v38 = vsel %vm1401_vm4, %v1397_v9, %v4471_v41  ;;  %v4477_v24 = vld [vmem:[#allocation88_spill] sm:$0xff] }
 0x245   : > { %v3977_v8 = vpop.permute.xlu0 %1152 }
 0x246   : > { %v869_v0 = vpop.permute.xlu1 %868  ;;  %v1558_v63 = vsel %vm1531_vm8, %v1525_v7, %v3977_v8 }
 0x247   : > { %v1461_v37 = vsel %vm1432_vm5, %v1428_v38, %v869_v0 }
 0x249   : > { %v3979_v12 = vpop.permute.xlu0 %1154 }
 0x24a   : > { %v3981_v1 = vpop.permute.xlu1 %1242  ;;  %v1559_v53 = vsel %vm1531_vm8, %v1526_v16, %v3979_v12 }
 0x24b   : > { %v1591_v39 = vsel %vm1564_vm9, %v1558_v63, %v3981_v1  ;;  %v4473_v63 = vld [vmem:[#allocation71_spill] sm:$0xff] }
 0x24c   : > { %v2335_v42 = vpop.f32.mrf.mxu0 }
 0x24d   : > { %1913 = vst.msk [vmem:[%s3858_s9 + $0x48] sm:$0xff] %vm1370_vm3, %v2335_v42  ;;  %v3990_v52 = vpop.permute.xlu0 %870  ;;  %v2014_v2 = vmul.f32 %v2335_v42, %v2335_v42  ;;  %v1953_v51 = vsel %vm1370_vm3, %v2335_v42, 0.0 }
 0x24e   : > { %v1785_v30 = vpop.f32.mrf.mxu0  ;;  %v965_v50 = vpop.permute.xlu1 %964 }
 0x24f   : > { %1912 = vst.msk [vmem:[%s3858_s9 + $0x40] sm:$0xff] %vm1370_vm3, %v1785_v30  ;;  %v1951_v28 = vsel %vm1370_vm3, %v1785_v30, 0.0  ;;  %v2013_v48 = vmul.f32 %v1785_v30, %v1785_v30  ;;  %v2054_v31 = vsel %vm1370_vm3, %v2014_v2, 0.0  ;;  %v1494_v17 = vsel %vm1465_vm6, %v1461_v37, %v965_v50 }
 0x250   : > { %v1952_v59 = vadd.f32 %v1951_v28, %v1950_v3 }
 0x251   : > { %v2052_v25 = vsel %vm1370_vm3, %v2013_v48, 0.0  ;;  %v4002_v11 = vpop.permute.xlu0 %1244 }
 0x252   : > { %v2053_v10 = vadd.f32 %v2052_v25, %v2051_v47  ;;  %v4006_v58 = vpop.permute.xlu1 %1332  ;;  %v1954_v57 = vadd.f32 %v1953_v51, %v1952_v59  ;;  %v1592_v62 = vsel %vm1564_vm9, %v1559_v53, %v4002_v11  ;;  %v4472_v59 = vld [vmem:[#allocation70_spill] sm:$0xff]  ;;  %v1399_v51 = vsel %vm1370_vm3, %v4439_v6, %v4473_v63  ;;  %v4474_v25 = vld [vmem:[#allocation87_spill] sm:$0xff] }
 0x253   : > { %v1624_v60 = vsel %vm1597_vm10, %v1591_v39, %v4006_v58  ;;  %v1398_v0 = vsel %vm1370_vm3, %v4430_v55, %v4472_v59 }
 0x254   : > { %2360 = vmatprep.mubr.msk.f32.mxu1 %vm1630_vm11, %v1624_v60  ;;  %v2055_v61 = vadd.f32 %v2054_v31, %v2053_v10  ;;  %v1429_v39 = vsel %vm1401_vm4, %v1398_v0, %v4474_v25  ;;  %v4475_v10 = vld [vmem:[#allocation9_spill] sm:$0xff] }
 0x255   : > { %v967_v44 = vpop.permute.xlu0 %966  ;;  %v1462_v20 = vsel %vm1432_vm5, %v1429_v39, %v3990_v52 }
 0x256   : > { %v1061_v40 = vpop.permute.xlu1 %1060  ;;  %v1495_v31 = vsel %vm1465_vm6, %v1462_v20, %v967_v44 }
 0x257   : > { %v1527_v46 = vsel %vm1498_vm7, %v1494_v17, %v1061_v40  ;;  %v1431_v40 = vsel %vm1401_vm4, %v1400_v19, %v4477_v24 }
 0x259   : > { %v4025_v54 = vpop.permute.xlu0 %1334 }
 0x25a   : > { %v1625_v14 = vsel %vm1597_vm10, %v1592_v62, %v4025_v54  ;;  %v1063_v22 = vpop.permute.xlu1 %1062 }
 0x25b   : > { %2361 = vmatmul.mubr.msk.f32.gmra.mxu1 %vm1630_vm11, %v1625_v14 }
 0x25d   : > { %v1157_v34 = vpop.permute.xlu0 %1156 }
 0x25e   : > { %v873_v23 = vpop.permute.xlu1 %872  ;;  %v1560_v2 = vsel %vm1531_vm8, %v1527_v46, %v1157_v34 }
 0x260   : > { %v2338_v32 = vpop.f32.mrf.mxu0 }
 0x261   : > { %1915 = vst.msk [vmem:[%s3858_s9 + $0x58] sm:$0xff] %vm1370_vm3, %v2338_v32  ;;  %v1159_v45 = vpop.permute.xlu0 %1158  ;;  %v2016_v29 = vmul.f32 %v2338_v32, %v2338_v32  ;;  %v1957_v43 = vsel %vm1370_vm3, %v2338_v32, 0.0 }
 0x262   : > { %v1795_v4 = vpop.f32.mrf.mxu0  ;;  %v1247_v5 = vpop.permute.xlu1 %1246 }
 0x263   : > { %1914 = vst.msk [vmem:[%s3858_s9 + $0x50] sm:$0xff] %vm1370_vm3, %v1795_v4  ;;  %v1955_v3 = vsel %vm1370_vm3, %v1795_v4, 0.0  ;;  %v2015_v18 = vmul.f32 %v1795_v4, %v1795_v4  ;;  %v2058_v30 = vsel %vm1370_vm3, %v2016_v29, 0.0  ;;  %v1593_v48 = vsel %vm1564_vm9, %v1560_v2, %v1247_v5 }
 0x264   : > { %v1956_v47 = vadd.f32 %v1955_v3, %v1954_v57  ;;  %v1430_v57 = vsel %vm1401_vm4, %v1399_v51, %v4475_v10 }
 0x265   : > { %v2056_v49 = vsel %vm1370_vm3, %v2015_v18, 0.0  ;;  %v875_v15 = vpop.permute.xlu0 %874  ;;  %v1463_v35 = vsel %vm1432_vm5, %v1430_v57, %v873_v23 }
 0x266   : > { %v2057_v42 = vadd.f32 %v2056_v49, %v2055_v61  ;;  %v969_v26 = vpop.permute.xlu1 %968  ;;  %v1958_v56 = vadd.f32 %v1957_v43, %v1956_v47  ;;  %v1528_v61 = vsel %vm1498_vm7, %v1495_v31, %v1063_v22  ;;  %v1464_v16 = vsel %vm1432_vm5, %v1431_v40, %v875_v15 }
 0x267   : > { %v1496_v6 = vsel %vm1465_vm6, %v1463_v35, %v969_v26  ;;  %v1561_v52 = vsel %vm1531_vm8, %v1528_v61, %v1159_v45 }
 0x268   : > { %v2059_v21 = vadd.f32 %v2058_v30, %v2057_v42 }
 0x269   : > { %v1249_v28 = vpop.permute.xlu0 %1248 }
 0x26a   : > { %v1337_v7 = vpop.permute.xlu1 %1336  ;;  %v1594_v53 = vsel %vm1564_vm9, %v1561_v52, %v1249_v28 }
 0x26b   : > { %v1626_v50 = vsel %vm1597_vm10, %v1593_v48, %v1337_v7 }
 0x26c   : > { %2363 = vmatprep.mubr.msk.f32.mxu1 %vm1630_vm11, %v1626_v50 }
 0x26d   : > { %v971_v55 = vpop.permute.xlu0 %970 }
 0x26e   : > { %v1065_v60 = vpop.permute.xlu1 %1064  ;;  %v1497_v14 = vsel %vm1465_vm6, %v1464_v16, %v971_v55 }
 0x26f   : > { %v1529_v33 = vsel %vm1498_vm7, %v1496_v6, %v1065_v60 }
 0x270   : > { %v1562_v44 = vsel %vm1531_vm8, %v1529_v33, %v3977_v8 }
 0x271   : > { %v1339_v62 = vpop.permute.xlu0 %1338  ;;  %v1595_v13 = vsel %vm1564_vm9, %v1562_v44, %v3981_v1 }
 0x272   : > { %v1627_v22 = vsel %vm1597_vm10, %v1594_v53, %v1339_v62  ;;  %v1067_v34 = vpop.permute.xlu1 %1066  ;;  %v1628_v8 = vsel %vm1597_vm10, %v1595_v13, %v4006_v58 }
 0x273   : > { %v1530_v23 = vsel %vm1498_vm7, %v1497_v14, %v1067_v34  ;;  %2364 = vmatmul.mubr.msk.f32.gmra.mxu1 %vm1630_vm11, %v1627_v22 }
 0x274   : > { %v1563_v32 = vsel %vm1531_vm8, %v1530_v23, %v3979_v12  ;;  %v2341_v45 = vpop.f32.mrf.mxu0  ;;  %2366 = vmatprep.mubr.msk.f32.mxu1 %vm1630_vm11, %v1628_v8 }
 0x275   : > { %1917 = vst.msk [vmem:[%s3858_s9 + $0x68] sm:$0xff] %vm1370_vm3, %v2341_v45  ;;  %v1596_v1 = vsel %vm1564_vm9, %v1563_v32, %v4002_v11  ;;  %v2018_v29 = vmul.f32 %v2341_v45, %v2341_v45  ;;  %v1961_v18 = vsel %vm1370_vm3, %v2341_v45, 0.0 }
 0x276   : > { %v1805_v4 = vpop.f32.mrf.mxu0  ;;  %v1629_v5 = vsel %vm1597_vm10, %v1596_v1, %v4025_v54 }
 0x277   : > { %1916 = vst.msk [vmem:[%s3858_s9 + $0x60] sm:$0xff] %vm1370_vm3, %v1805_v4  ;;  %v1959_v58 = vsel %vm1370_vm3, %v1805_v4, 0.0  ;;  %v2017_v12 = vmul.f32 %v1805_v4, %v1805_v4  ;;  %2367 = vmatmul.mubr.msk.f32.gmra.mxu1 %vm1630_vm11, %v1629_v5  ;;  %v2062_v47 = vsel %vm1370_vm3, %v2018_v29, 0.0 }
 0x278   : > { %v1960_v3 = vadd.f32 %v1959_v58, %v1958_v56 }
 0x279   : > { %v2060_v36 = vsel %vm1370_vm3, %v2017_v12, 0.0 }
 0x27a   : > { %v2061_v11 = vadd.f32 %v2060_v36, %v2059_v21  ;;  %v1962_v9 = vadd.f32 %v1961_v18, %v1960_v3 }
 0x27c   : > { %v2063_v41 = vadd.f32 %v2062_v47, %v2061_v11 }
 0x28b   : > { %v2344_v54 = vpop.f32.mrf.mxu0 }
 0x28c   : > { %1919 = vst.msk [vmem:[%s3858_s9 + $0x78] sm:$0xff] %vm1370_vm3, %v2344_v54  ;;  %v2020_v43 = vmul.f32 %v2344_v54, %v2344_v54  ;;  %v1965_v42 = vsel %vm1370_vm3, %v2344_v54, 0.0 }
 0x28d   : > { %v1815_v38 = vpop.f32.mrf.mxu0 }
 0x28e   : > { %1918 = vst.msk [vmem:[%s3858_s9 + $0x70] sm:$0xff] %vm1370_vm3, %v1815_v38  ;;  %v1963_v49 = vsel %vm1370_vm3, %v1815_v38, 0.0  ;;  %v2019_v15 = vmul.f32 %v1815_v38, %v1815_v38  ;;  %v2066_v30 = vsel %vm1370_vm3, %v2020_v43, 0.0 }
 0x28f   : > { %v1964_v37 = vadd.f32 %v1963_v49, %v1962_v9 }
 0x290   : > { %v2064_v26 = vsel %vm1370_vm3, %v2019_v15, 0.0 }
 0x291   : > { %v1966_v56 = vadd.f32 %v1965_v42, %v1964_v37  ;;  %v2065_v17 = vadd.f32 %v2064_v26, %v2063_v41 }
 0x293   : > { %v2067_v46 = vadd.f32 %v2066_v30, %v2065_v17 }
 0x2a3   : > { %v2347_v21 = vpop.f32.mrf.mxu1 }
 0x2a4   : > { %1921 = vst.msk [vmem:[%s3858_s9 + $0x88] sm:$0xff] %vm1370_vm3, %v2347_v21  ;;  %v2022_v28 = vmul.f32 %v2347_v21, %v2347_v21  ;;  %v1969_v0 = vsel %vm1370_vm3, %v2347_v21, 0.0 }
 0x2a5   : > { %v1825_v2 = vpop.f32.mrf.mxu1 }
 0x2a6   : > { %1920 = vst.msk [vmem:[%s3858_s9 + $0x80] sm:$0xff] %vm1370_vm3, %v1825_v2  ;;  %v1967_v48 = vsel %vm1370_vm3, %v1825_v2, 0.0  ;;  %v2021_v7 = vmul.f32 %v1825_v2, %v1825_v2  ;;  %v2070_v25 = vsel %vm1370_vm3, %v2022_v28, 0.0 }
 0x2a7   : > { %v1968_v59 = vadd.f32 %v1967_v48, %v1966_v56 }
 0x2a8   : > { %v2068_v63 = vsel %vm1370_vm3, %v2021_v7, 0.0 }
 0x2a9   : > { %v2069_v51 = vadd.f32 %v2068_v63, %v2067_v46  ;;  %v1970_v50 = vadd.f32 %v1969_v0, %v1968_v59 }
 0x2ab   : > { %v2071_v39 = vadd.f32 %v2070_v25, %v2069_v51 }
 0x2bb   : > { %v2350_v10 = vpop.f32.mrf.mxu1 }
 0x2bc   : > { %1923 = vst.msk [vmem:[%s3858_s9 + $0x98] sm:$0xff] %vm1370_vm3, %v2350_v10  ;;  %v2024_v20 = vmul.f32 %v2350_v10, %v2350_v10  ;;  %v1973_v6 = vsel %vm1370_vm3, %v2350_v10, 0.0 }
 0x2bd   : > { %v1835_v57 = vpop.f32.mrf.mxu1 }
 0x2be   : > { %1922 = vst.msk [vmem:[%s3858_s9 + $0x90] sm:$0xff] %vm1370_vm3, %v1835_v57  ;;  %v1971_v35 = vsel %vm1370_vm3, %v1835_v57, 0.0  ;;  %v2023_v55 = vmul.f32 %v1835_v57, %v1835_v57  ;;  %v2074_v61 = vsel %vm1370_vm3, %v2024_v20, 0.0 }
 0x2bf   : > { %v1972_v31 = vadd.f32 %v1971_v35, %v1970_v50 }
 0x2c0   : > { %v2072_v60 = vsel %vm1370_vm3, %v2023_v55, 0.0 }
 0x2c1   : > { %v2073_v27 = vadd.f32 %v2072_v60, %v2071_v39  ;;  %v1974_v19 = vadd.f32 %v1973_v6, %v1972_v31 }
 0x2c3   : > { %v2075_v33 = vadd.f32 %v2074_v61, %v2073_v27 }
 0x2d3   : > { %v2353_v24 = vpop.f32.mrf.mxu1 }
 0x2d4   : > { %1925 = vst.msk [vmem:[%s3858_s9 + $0xa8] sm:$0xff] %vm1370_vm3, %v2353_v24  ;;  %v2026_v52 = vmul.f32 %v2353_v24, %v2353_v24  ;;  %v1977_v62 = vsel %vm1370_vm3, %v2353_v24, 0.0 }
 0x2d5   : > { %v1845_v40 = vpop.f32.mrf.mxu1 }
 0x2d6   : > { %1924 = vst.msk [vmem:[%s3858_s9 + $0xa0] sm:$0xff] %vm1370_vm3, %v1845_v40  ;;  %v1975_v44 = vsel %vm1370_vm3, %v1845_v40, 0.0  ;;  %v2025_v16 = vmul.f32 %v1845_v40, %v1845_v40  ;;  %v2078_v34 = vsel %vm1370_vm3, %v2026_v52, 0.0 }
 0x2d7   : > { %v1976_v53 = vadd.f32 %v1975_v44, %v1974_v19 }
 0x2d8   : > { %v2076_v13 = vsel %vm1370_vm3, %v2025_v16, 0.0 }
 0x2d9   : > { %v2077_v14 = vadd.f32 %v2076_v13, %v2075_v33  ;;  %v1978_v22 = vadd.f32 %v1977_v62, %v1976_v53 }
 0x2db   : > { %v2079_v23 = vadd.f32 %v2078_v34, %v2077_v14 }
 0x2eb   : > { %v2356_v8 = vpop.f32.mrf.mxu1 }
 0x2ec   : > { %1927 = vst.msk [vmem:[%s3858_s9 + $0xb8] sm:$0xff] %vm1370_vm3, %v2356_v8  ;;  %v2028_v45 = vmul.f32 %v2356_v8, %v2356_v8  ;;  %v1981_v29 = vsel %vm1370_vm3, %v2356_v8, 0.0 }
 0x2ed   : > { %v1855_v32 = vpop.f32.mrf.mxu1 }
 0x2ee   : > { %1926 = vst.msk [vmem:[%s3858_s9 + $0xb0] sm:$0xff] %vm1370_vm3, %v1855_v32  ;;  %v1979_v1 = vsel %vm1370_vm3, %v1855_v32, 0.0  ;;  %v2027_v4 = vmul.f32 %v1855_v32, %v1855_v32  ;;  %v2082_v18 = vsel %vm1370_vm3, %v2028_v45, 0.0 }
 0x2ef   : > { %v1980_v5 = vadd.f32 %v1979_v1, %v1978_v22 }
 0x2f0   : > { %v2080_v58 = vsel %vm1370_vm3, %v2027_v4, 0.0 }
 0x2f1   : > { %v2081_v12 = vadd.f32 %v2080_v58, %v2079_v23  ;;  %v1982_v3 = vadd.f32 %v1981_v29, %v1980_v5 }
 0x2f3   : > { %v2083_v36 = vadd.f32 %v2082_v18, %v2081_v12 }
 0x303   : > { %v2359_v11 = vpop.f32.mrf.mxu1 }
 0x304   : > { %1929 = vst.msk [vmem:[%s3858_s9 + $0xc8] sm:$0xff] %vm1370_vm3, %v2359_v11  ;;  %v2030_v15 = vmul.f32 %v2359_v11, %v2359_v11  ;;  %v1985_v26 = vsel %vm1370_vm3, %v2359_v11, 0.0 }
 0x305   : > { %v1865_v9 = vpop.f32.mrf.mxu1 }
 0x306   : > { %1928 = vst.msk [vmem:[%s3858_s9 + $0xc0] sm:$0xff] %vm1370_vm3, %v1865_v9  ;;  %v2029_v54 = vmul.f32 %v1865_v9, %v1865_v9  ;;  %v1983_v38 = vsel %vm1370_vm3, %v1865_v9, 0.0  ;;  %v2086_v30 = vsel %vm1370_vm3, %v2030_v15, 0.0 }
 0x307   : > { %v1984_v49 = vadd.f32 %v1983_v38, %v1982_v3 }
 0x308   : > { %v2084_v43 = vsel %vm1370_vm3, %v2029_v54, 0.0 }
 0x309   : > { %v2085_v42 = vadd.f32 %v2084_v43, %v2083_v36  ;;  %v1986_v17 = vadd.f32 %v1985_v26, %v1984_v49 }
 0x30b   : > { %v2087_v2 = vadd.f32 %v2086_v30, %v2085_v42 }
 0x31b   : > { %v2362_v47 = vpop.f32.mrf.mxu1 }
 0x31c   : > { %1931 = vst.msk [vmem:[%s3858_s9 + $0xd8] sm:$0xff] %vm1370_vm3, %v2362_v47  ;;  %v2032_v28 = vmul.f32 %v2362_v47, %v2362_v47  ;;  %v1989_v59 = vsel %vm1370_vm3, %v2362_v47, 0.0 }
 0x31d   : > { %v1875_v41 = vpop.f32.mrf.mxu1 }
 0x31e   : > { %1930 = vst.msk [vmem:[%s3858_s9 + $0xd0] sm:$0xff] %vm1370_vm3, %v1875_v41  ;;  %v2031_v37 = vmul.f32 %v1875_v41, %v1875_v41  ;;  %v1987_v56 = vsel %vm1370_vm3, %v1875_v41, 0.0  ;;  %v2090_v51 = vsel %vm1370_vm3, %v2032_v28, 0.0 }
 0x31f   : > { %v1988_v21 = vadd.f32 %v1987_v56, %v1986_v17 }
 0x320   : > { %v2088_v46 = vsel %vm1370_vm3, %v2031_v37, 0.0 }
 0x321   : > { %v2089_v48 = vadd.f32 %v2088_v46, %v2087_v2  ;;  %v1990_v63 = vadd.f32 %v1989_v59, %v1988_v21 }
 0x323   : > { %v2091_v57 = vadd.f32 %v2090_v51, %v2089_v48 }
 0x333   : > { %v2365_v7 = vpop.f32.mrf.mxu1 }
 0x334   : > { %1933 = vst.msk [vmem:[%s3858_s9 + $0xe8] sm:$0xff] %vm1370_vm3, %v2365_v7  ;;  %v2034_v50 = vmul.f32 %v2365_v7, %v2365_v7  ;;  %v1993_v35 = vsel %vm1370_vm3, %v2365_v7, 0.0 }
 0x335   : > { %v1885_v0 = vpop.f32.mrf.mxu1 }
 0x336   : > { %1932 = vst.msk [vmem:[%s3858_s9 + $0xe0] sm:$0xff] %vm1370_vm3, %v1885_v0  ;;  %v1991_v25 = vsel %vm1370_vm3, %v1885_v0, 0.0  ;;  %v2033_v39 = vmul.f32 %v1885_v0, %v1885_v0  ;;  %v2094_v27 = vsel %vm1370_vm3, %v2034_v50, 0.0 }
 0x337   : > { %v1992_v10 = vadd.f32 %v1991_v25, %v1990_v63  ;;  %v2368_v20 = vpop.f32.mrf.mxu1 }
 0x338   : > { %v2092_v55 = vsel %vm1370_vm3, %v2033_v39, 0.0  ;;  %1935 = vst.msk [vmem:[%s3858_s9 + $0xf8] sm:$0xff] %vm1370_vm3, %v2368_v20  ;;  %v2036_v19 = vmul.f32 %v2368_v20, %v2368_v20  ;;  %v1997_v52 = vsel %vm1370_vm3, %v2368_v20, 0.0 }
 0x339   : > { %v2093_v31 = vadd.f32 %v2092_v55, %v2091_v57  ;;  %v1895_v6 = vpop.f32.mrf.mxu1  ;;  %v1994_v60 = vadd.f32 %v1993_v35, %v1992_v10 }
 0x33a   : > { %1934 = vst.msk [vmem:[%s3858_s9 + $0xf0] sm:$0xff] %vm1370_vm3, %v1895_v6  ;;  %v1995_v61 = vsel %vm1370_vm3, %v1895_v6, 0.0  ;;  %v2035_v33 = vmul.f32 %v1895_v6, %v1895_v6  ;;  %v2098_v62 = vsel %vm1370_vm3, %v2036_v19, 0.0 }
 0x33b   : > { %v1996_v24 = vadd.f32 %v1995_v61, %v1994_v60  ;;  %v2095_v40 = vadd.f32 %v2094_v27, %v2093_v31 }
 0x33c   : > { %v2096_v44 = vsel %vm1370_vm3, %v2035_v33, 0.0 }
 0x33d   : > { %v1998_v16 = vadd.f32 %v1997_v52, %v1996_v24  ;;  %v2097_v53 = vadd.f32 %v2096_v44, %v2095_v40 }
 0x33f   : > { %v1999_v13 = vrot.slane %v1998_v16, 4  ;;  %v2099_v14 = vadd.f32 %v2098_v62, %v2097_v53 }
 0x341   : > { %v2000_v22 = vadd.f32 %v1999_v13, %v1998_v16  ;;  %v2100_v34 = vrot.slane %v2099_v14, 4 }
 0x343   : > { %v2001_v23 = vrot.slane %v2000_v22, 2  ;;  %v2101_v8 = vadd.f32 %v2100_v34, %v2099_v14 }
 0x345   : > { %v2002_v32 = vadd.f32 %v2001_v23, %v2000_v22  ;;  %v2102_v45 = vrot.slane %v2101_v8, 2 }
 0x347   : > { %v2003_v1 = vrot.slane %v2002_v32, 1  ;;  %v2103_v4 = vadd.f32 %v2102_v45, %v2101_v8 }
 0x349   : > { %v2104_v5 = vrot.slane %v2103_v4, 1  ;;  %v2004_v29 = vadd.f32 %v2003_v1, %v2002_v32 }
 0x34b   : > { %v2105_v58 = vadd.f32 %v2104_v5, %v2103_v4 }
 0x34d   : > { %v2106_v12 = vsel %vm278_vm0, %v2004_v29, %v2105_v58 }
 0x34e   : > { %2108 = vst.msk [vmem:[%s181_s15] sm:$0x3] %vm2107_vm12, %v2106_v12 }
 0x34f PF: > { %s14_s12 = sadd.s32 1, %s2423_s12  }
 0x350   : > { %p11_p4 = scmp.ge.s32.totalorder %s14_s12, 4  }
 0x352   :  { %13 = sbr.rel (!%p11_p4) target bundleno = 1 (0x1), region = 70 }

// kernel: res_block_forward.4
= control target key start
LH: loop header
LB: loop body
LE: loop exit
PB: predicated region body
PF: predicated region fallthrough
CT: control target
= control target key end

     0   :  { %s2631_s18 = smov 0   ;;  %s4441_s0 = inlined_call_operand.vmem [shape: f32[2,16,16,4], index: 0, kind: input, shape index: {}]   ;;  %s4442_s1 = inlined_call_operand.vmem [shape: f32[1,4], index: 1, kind: input, shape index: {}]   ;;  %s4443_s2 = inlined_call_operand.vmem [shape: f32[1,4], index: 2, kind: input, shape index: {}]   ;;  %s4444_s3 = inlined_call_operand.vmem [shape: f32[128,128], index: 3, kind: input, shape index: {}]   ;;  %s4445_s4 = inlined_call_operand.vmem [shape: f32[2,16,16,4], index: 4, kind: output, shape index: {0}]   ;;  %s4446_s5 = inlined_call_operand.vmem [shape: f32[2,2,4], index: 5, kind: output, shape index: {1}]  }
   0x1 LB: > { %s2359_s19 = sadd.s32 4294967295, %s2591_s18   ;;  %p2363_p0 = scmp.ge.s32.totalorder %s2591_s18, 1  ;;  %s2591_s18 = sphi %s2631_s18, %s16_s18  }
   0x2   : > { %p190_p1 = scmp.lt.s32.totalorder %s2591_s18, 3 }
   0x4   : > { %p191_p2 = pnand %p2363_p0, %p190_p1 }
   0x6   : > { %194 = sbr.rel (%p191_p2) target bundleno = 857 (0x359), region = 36 }
   0xb   : > { %p222_p3 = scmp.lt.s32.totalorder %s2359_s19, 1  ;;  %v2645_v0 = vld [vmem:[%s4442_s1] ss:$0 sm:$0xff]  ;;  %vm442_vm0 = vcmask 1040384   ;;  %vm632_vm1 = vcmask 1046528   ;;  %s2593_s28 = smov 4  }
   0xc   : > { %v2657_v1 = vld [vmem:[%s4443_s2] ss:$0 sm:$0xff]  ;;  %vm708_vm2 = vcmask 1045504   ;;  %s2594_s29 = smov 8   ;;  %s2595_s30 = smov 12   ;;  %vm1534_vm3 = vcmask 31744  }
   0xd   : > { %s4742_s19 = smov (!%p222_p3, %s2359_s19), 1  ;;  %s2597_s7 = smov 20   ;;  %vm1565_vm4 = vcmask 64512   ;;  %vm1596_vm5 = vcmask 97280   ;;  %vm1629_vm6 = vcmask 130048   ;;  %vm1662_vm7 = vcmask 162816  }
   0xe   : > { %s2405_s20 = sshll.u32 %s4742_s19, 8  ;;  %s2598_s12 = smov 24   ;;  %vm1695_vm8 = vcmask 195584   ;;  %vm1728_vm9 = vcmask 228352   ;;  %vm1761_vm10 = vcmask 261120   ;;  %vm1794_vm11 = vcmask 293888  }
   0xf   : > { %s2652_s25 = scalar_lea.vmem %s4441_s0, %s2405_s20  ;;  %s2599_s15 = smov 28   ;;  %vm2271_vm12 = vcmask 25600  }
  0x10   : > { %v238_v2 = vld [vmem:[%s2652_s25 + $0x10] sm:$0xff]  ;;  %v239_v3 = vld [vmem:[%s2652_s25 + $0x18] sm:$0xff]  ;;  %v236_v4 = vld [vmem:[%s2652_s25] sm:$0xff]  ;;  %s2600_s26 = smov 32   ;;  %s4117_s9 = scalar_lea.vmem %s4445_s4, %s2405_s20 }
  0x11   : > { %v277_v5 = vmul.f32 %v2645_v0, %v238_v2  ;;  %v278_v6 = vmul.f32 %v2645_v0, %v239_v3  ;;  %v237_v7 = vld [vmem:[%s2652_s25 + $0x8] sm:$0xff]  ;;  %v275_v8 = vmul.f32 %v2645_v0, %v236_v4  ;;  %v240_v9 = vld [vmem:[%s2652_s25 + $0x20] sm:$0xff]  ;;  %v242_v14 = vld [vmem:[%s2652_s25 + $0x30] sm:$0xff]  ;;  %s2368_s20 = sshll.u32 %s4742_s19, 1 }
  0x12   : > { %v241_v10 = vld [vmem:[%s2652_s25 + $0x28] sm:$0xff]  ;;  %v276_v11 = vmul.f32 %v2645_v0, %v237_v7  ;;  %v279_v12 = vmul.f32 %v2645_v0, %v240_v9  ;;  %v243_v15 = vld [vmem:[%s2652_s25 + $0x38] sm:$0xff]  ;;  %v281_v19 = vmul.f32 %v2645_v0, %v242_v14  ;;  %v244_v60 = vld [vmem:[%s2652_s25 + $0x40] sm:$0xff]  ;;  %s235_s10 = scalar_lea.vmem %s4446_s5, %s2368_s20 }
  0x13   : > { %v280_v13 = vmul.f32 %v2645_v0, %v241_v10  ;;  %v316_v16 = vadd.f32 %v2657_v1, %v277_v5  ;;  %v317_v17 = vadd.f32 %v2657_v1, %v278_v6  ;;  %v314_v18 = vadd.f32 %v2657_v1, %v275_v8  ;;  %v245_v61 = vld [vmem:[%s2652_s25 + $0x48] sm:$0xff]  ;;  %v246_v4 = vld [vmem:[%s2652_s25 + $0x50] sm:$0xff] }
  0x14   : > { %v315_v20 = vadd.f32 %v2657_v1, %v276_v11  ;;  %v318_v21 = vadd.f32 %v2657_v1, %v279_v12  ;;  %v282_v23 = vmul.f32 %v2645_v0, %v243_v15  ;;  %v320_v27 = vadd.f32 %v2657_v1, %v281_v19 }
  0x15   : > { %v319_v22 = vadd.f32 %v2657_v1, %v280_v13  ;;  %v348_v24 = vmax.f32 %v316_v16, 0.0  ;;  %v349_v25 = vmax.f32 %v317_v17, 0.0  ;;  %v346_v26 = vmax.f32 %v314_v18, 0.0  ;;  %v247_v13 = vld [vmem:[%s2652_s25 + $0x58] sm:$0xff] }
  0x16   : > { %v347_v28 = vmax.f32 %v315_v20, 0.0  ;;  %v350_v29 = vmax.f32 %v318_v21, 0.0  ;;  %v321_v31 = vadd.f32 %v2657_v1, %v282_v23  ;;  %v352_v59 = vmax.f32 %v320_v27, 0.0  ;;  %v249_v23 = vld [vmem:[%s2652_s25 + $0x68] sm:$0xff] }
  0x17   : > { %v351_v30 = vmax.f32 %v319_v22, 0.0  ;;  %v394_v32 = vrot.slane %v348_v24, 1  ;;  %v443_v33 = vrot.slane %v348_v24, 7  ;;  %v444_v34 = vrot.slane %v349_v25, 7  ;;  %v248_v22 = vld [vmem:[%s2652_s25 + $0x60] sm:$0xff] }
  0x18   : > { %v395_v35 = vrot.slane %v346_v26, 1  ;;  %v446_v36 = vrot.slane %v346_v26, 7  ;;  %v447_v37 = vrot.slane %v347_v28, 7  ;;  %v538_v38 = vrot.slane %v349_v25, 5 }
  0x19   : > { %v539_v39 = vrot.slane %v347_v28, 5  ;;  %v2684_v40 = vsel %vm442_vm0, %v443_v33, %v444_v34  ;;  %v2687_v41 = vsel %vm442_vm0, %v394_v32, %v443_v33  ;;  %v396_v42 = vrot.slane %v350_v29, 1 }
  0x1a   : > { %v449_v43 = vrot.slane %v350_v29, 7  ;;  %v633_v44 = vrot.slane %v2687_v41, 1  ;;  %v634_v45 = vrot.slane %v2684_v40, 1  ;;  %v2692_v46 = vsel %vm442_vm0, %v446_v36, %v447_v37 }
  0x1b   : > { %v2695_v47 = vsel %vm442_vm0, %v395_v35, %v446_v36  ;;  %v639_v49 = vrot.slane %v2692_v46, 1  ;;  %v2700_v50 = vsel %vm442_vm0, %v444_v34, %v538_v38  ;;  %v2703_v51 = vsel %vm442_vm0, %v447_v37, %v539_v39  ;;  %v250_v36 = vld [vmem:[%s2652_s25 + $0x70] sm:$0xff] }
  0x1c   : > { %v638_v48 = vrot.slane %v2695_v47, 1  ;;  %v2706_v52 = vsel %vm632_vm1, %v633_v44, %v634_v45  ;;  %v636_v53 = vrot.slane %v2700_v50, 1  ;;  %v641_v54 = vrot.slane %v2703_v51, 1 }
  0x1d   : > { %v450_v55 = vrot.slane %v351_v30, 7  ;;  %796 = vrot.lane.b32.xlu0 %v2706_v52, %s2593_s28  ;;  %v2716_v57 = vsel %vm442_vm0, %v396_v42, %v449_v43  ;;  %v540_v58 = vrot.slane %v351_v30, 5  ;;  %v353_v7 = vmax.f32 %v321_v31, 0.0 }
  0x1e   : > { %v2713_v56 = vsel %vm632_vm1, %v638_v48, %v639_v49  ;;  %v2723_v62 = vsel %vm632_vm1, %v634_v45, %v636_v53  ;;  %v2726_v63 = vsel %vm632_vm1, %v639_v49, %v641_v54  ;;  %v643_v3 = vrot.slane %v2716_v57, 1 }
  0x1f   : > { %800 = vrot.lane.b32.xlu1 %v2713_v56, %s2593_s28  ;;  %v2729_v2 = vsel %vm442_vm0, %v449_v43, %v450_v55  ;;  %v2735_v6 = vsel %vm442_vm0, %v450_v55, %v540_v58  ;;  %v397_v8 = vrot.slane %v352_v59, 1  ;;  %v452_v10 = vrot.slane %v352_v59, 7  ;;  %v251_v55 = vld [vmem:[%s2652_s25 + $0x78] sm:$0xff] }
  0x20   : > { %v644_v5 = vrot.slane %v2729_v2, 1  ;;  %v646_v9 = vrot.slane %v2735_v6, 1  ;;  %v283_v11 = vmul.f32 %v2645_v0, %v244_v60  ;;  %v284_v12 = vmul.f32 %v2645_v0, %v245_v61 }
  0x21   : > { %798 = vrot.lane.b32.xlu0 %v2723_v62, %s2593_s28  ;;  %v453_v15 = vrot.slane %v353_v7, 7  ;;  %v541_v16 = vrot.slane %v353_v7, 5  ;;  %v285_v17 = vmul.f32 %v2645_v0, %v246_v4  ;;  %v2753_v19 = vsel %vm442_vm0, %v397_v8, %v452_v10 }
  0x22   : > { %v2744_v14 = vsel %vm632_vm1, %v643_v3, %v644_v5  ;;  %v2750_v18 = vsel %vm632_vm1, %v644_v5, %v646_v9  ;;  %v322_v20 = vadd.f32 %v2657_v1, %v283_v11  ;;  %v323_v21 = vadd.f32 %v2657_v1, %v284_v12 }
  0x23   : > { %4541 = vst [vmem:[#allocation2_spill] sm:$0xff] %v2744_v14  ;;  %802 = vrot.lane.b32.xlu1 %v2726_v63, %s2593_s28  ;;  %4542 = vst [vmem:[#allocation3_spill] sm:$0xff] %v2750_v18  ;;  %v2760_v24 = vsel %vm442_vm0, %v452_v10, %v453_v15  ;;  %v648_v25 = vrot.slane %v2753_v19, 1  ;;  %v2764_v26 = vsel %vm442_vm0, %v453_v15, %v541_v16 }
  0x24   : > { %v286_v27 = vmul.f32 %v2645_v0, %v247_v13  ;;  %v649_v28 = vrot.slane %v2760_v24, 1  ;;  %v651_v29 = vrot.slane %v2764_v26, 1  ;;  %v354_v30 = vmax.f32 %v322_v20, 0.0  ;;  %v252_v20 = vld [vmem:[%s2652_s25 + $0x80] sm:$0xff] }
  0x25   : > { %v355_v31 = vmax.f32 %v323_v21, 0.0  ;;  %804 = vrot.lane.b32.xlu0 %v2744_v14, %s2593_s28  ;;  %v324_v32 = vadd.f32 %v2657_v1, %v285_v17  ;;  %v287_v34 = vmul.f32 %v2645_v0, %v248_v22  ;;  %v288_v35 = vmul.f32 %v2645_v0, %v249_v23 }
  0x26   : > { %v325_v33 = vadd.f32 %v2657_v1, %v286_v27  ;;  %v2779_v37 = vsel %vm632_vm1, %v648_v25, %v649_v28  ;;  %v2782_v38 = vsel %vm632_vm1, %v649_v28, %v651_v29  ;;  %v398_v39 = vrot.slane %v354_v30, 1 }
  0x27   : > { %806 = vrot.lane.b32.xlu1 %v2750_v18, %s2593_s28  ;;  %4543 = vst [vmem:[#allocation4_spill] sm:$0xff] %v2779_v37  ;;  %4544 = vst [vmem:[#allocation5_spill] sm:$0xff] %v2782_v38  ;;  %v455_v42 = vrot.slane %v354_v30, 7  ;;  %v456_v43 = vrot.slane %v355_v31, 7  ;;  %v542_v44 = vrot.slane %v355_v31, 5  ;;  %v356_v45 = vmax.f32 %v324_v32, 0.0 }
  0x28   : > { %v357_v48 = vmax.f32 %v325_v33, 0.0  ;;  %v326_v53 = vadd.f32 %v2657_v1, %v287_v34  ;;  %v327_v54 = vadd.f32 %v2657_v1, %v288_v35  ;;  %v289_v58 = vmul.f32 %v2645_v0, %v250_v36  ;;  %v253_v34 = vld [vmem:[%s2652_s25 + $0x88] sm:$0xff]  ;;  %v254_v36 = vld [vmem:[%s2652_s25 + $0x90] sm:$0xff] }
  0x29   : > { %v2785_v49 = vsel %vm442_vm0, %v398_v39, %v455_v42  ;;  %808 = vrot.lane.b32.xlu0 %v2779_v37, %s2593_s28  ;;  %v2794_v59 = vsel %vm442_vm0, %v455_v42, %v456_v43  ;;  %v2798_v61 = vsel %vm442_vm0, %v456_v43, %v542_v44  ;;  %v399_v3 = vrot.slane %v356_v45, 1 }
  0x2a   : > { %4545 = vst [vmem:[#allocation6_spill] sm:$0xff] %v2794_v59  ;;  %v653_v60 = vrot.slane %v2785_v49, 1  ;;  %v654_v4 = vrot.slane %v2794_v59, 1  ;;  %v656_v5 = vrot.slane %v2798_v61, 1  ;;  %v458_v7 = vrot.slane %v356_v45, 7 }
  0x2b   : > { %810 = vrot.lane.b32.xlu1 %v2782_v38, %s2593_s28  ;;  %v459_v8 = vrot.slane %v357_v48, 7  ;;  %v543_v9 = vrot.slane %v357_v48, 5  ;;  %v358_v10 = vmax.f32 %v326_v53, 0.0  ;;  %v359_v11 = vmax.f32 %v327_v54, 0.0 }
  0x2c   : > { %v290_v12 = vmul.f32 %v2645_v0, %v251_v55  ;;  %v2806_v13 = vsel %vm632_vm1, %v653_v60, %v654_v4  ;;  %v2809_v15 = vsel %vm632_vm1, %v654_v4, %v656_v5  ;;  %v2815_v17 = vsel %vm442_vm0, %v399_v3, %v458_v7  ;;  %v255_v3 = vld [vmem:[%s2652_s25 + $0x98] sm:$0xff]  ;;  %v256_v5 = vld [vmem:[%s2652_s25 + $0xa0] sm:$0xff] }
  0x2d   : > { %4546 = vst [vmem:[#allocation7_spill] sm:$0xff] %v2806_v13  ;;  %4547 = vst [vmem:[#allocation8_spill] sm:$0xff] %v2809_v15  ;;  %v2812_v16 = vsel %vm442_vm0, %v458_v7, %v459_v8  ;;  %812 = vrot.lane.b32.xlu0 %v2806_v13, %s2593_s28  ;;  %v658_v21 = vrot.slane %v2815_v17, 1  ;;  %v2823_v23 = vsel %vm442_vm0, %v459_v8, %v543_v9  ;;  %v400_v25 = vrot.slane %v358_v10, 1 }
  0x2e   : > { %4548 = vst [vmem:[#allocation9_spill] sm:$0xff] %v2812_v16  ;;  %4549 = vst [vmem:[#allocation10_spill] sm:$0xff] %v2815_v17  ;;  %v659_v22 = vrot.slane %v2812_v16, 1  ;;  %v661_v27 = vrot.slane %v2823_v23, 1  ;;  %v461_v28 = vrot.slane %v358_v10, 7  ;;  %v462_v29 = vrot.slane %v359_v11, 7 }
  0x2f   : > { %814 = vrot.lane.b32.xlu1 %v2809_v15, %s2593_s28  ;;  %v544_v30 = vrot.slane %v359_v11, 5  ;;  %v328_v32 = vadd.f32 %v2657_v1, %v289_v58  ;;  %v329_v33 = vadd.f32 %v2657_v1, %v290_v12  ;;  %v291_v35 = vmul.f32 %v2645_v0, %v252_v20 }
  0x30   : > { %v2829_v31 = vsel %vm632_vm1, %v658_v21, %v659_v22  ;;  %v2837_v39 = vsel %vm632_vm1, %v659_v22, %v661_v27  ;;  %v2840_v42 = vsel %vm442_vm0, %v461_v28, %v462_v29  ;;  %v2843_v43 = vsel %vm442_vm0, %v400_v25, %v461_v28 }
  0x31   : > { %4550 = vst [vmem:[#allocation11_spill] sm:$0xff] %v2829_v31  ;;  %4551 = vst [vmem:[#allocation12_spill] sm:$0xff] %v2837_v39  ;;  %v2846_v44 = vsel %vm442_vm0, %v462_v29, %v544_v30  ;;  %816 = vrot.lane.b32.xlu0 %v2829_v31, %s2593_s28  ;;  %v663_v45 = vrot.slane %v2843_v43, 1  ;;  %v664_v48 = vrot.slane %v2840_v42, 1  ;;  %v360_v54 = vmax.f32 %v328_v32, 0.0 }
  0x32   : > { %4552 = vst [vmem:[#allocation13_spill] sm:$0xff] %v2840_v42  ;;  %4553 = vst [vmem:[#allocation14_spill] sm:$0xff] %v2843_v43  ;;  %v666_v53 = vrot.slane %v2846_v44, 1  ;;  %v361_v55 = vmax.f32 %v329_v33, 0.0  ;;  %v292_v58 = vmul.f32 %v2645_v0, %v253_v34  ;;  %v330_v60 = vadd.f32 %v2657_v1, %v291_v35  ;;  %v257_v34 = vld [vmem:[%s2652_s25 + $0xa8] sm:$0xff] }
  0x33   : > { %818 = vrot.lane.b32.xlu1 %v2837_v39, %s2593_s28  ;;  %v293_v4 = vmul.f32 %v2645_v0, %v254_v36  ;;  %v2861_v7 = vsel %vm632_vm1, %v663_v45, %v664_v48  ;;  %v401_v9 = vrot.slane %v360_v54, 1  ;;  %v464_v10 = vrot.slane %v360_v54, 7  ;;  %v263_v39 = vld [vmem:[%s2652_s25 + $0xd8] sm:$0xff] }
  0x34   : > { %4554 = vst [vmem:[#allocation15_spill] sm:$0xff] %v2861_v7  ;;  %v2864_v8 = vsel %vm632_vm1, %v664_v48, %v666_v53  ;;  %v465_v11 = vrot.slane %v361_v55, 7  ;;  %v545_v12 = vrot.slane %v361_v55, 5  ;;  %v331_v20 = vadd.f32 %v2657_v1, %v292_v58 }
  0x35   : > { %4555 = vst [vmem:[#allocation16_spill] sm:$0xff] %v2864_v8  ;;  %v362_v21 = vmax.f32 %v330_v60, 0.0  ;;  %820 = vrot.lane.b32.xlu0 %v2861_v7, %s2593_s28  ;;  %v2870_v22 = vsel %vm442_vm0, %v401_v9, %v464_v10  ;;  %v294_v25 = vmul.f32 %v2645_v0, %v255_v3  ;;  %v332_v27 = vadd.f32 %v2657_v1, %v293_v4 }
  0x36   : > { %v295_v28 = vmul.f32 %v2645_v0, %v256_v5  ;;  %v2878_v29 = vsel %vm442_vm0, %v464_v10, %v465_v11  ;;  %v668_v30 = vrot.slane %v2870_v22, 1  ;;  %v2882_v32 = vsel %vm442_vm0, %v465_v11, %v545_v12 }
  0x37   : > { %822 = vrot.lane.b32.xlu1 %v2864_v8, %s2593_s28  ;;  %4556 = vst [vmem:[#allocation17_spill] sm:$0xff] %v2878_v29  ;;  %v363_v33 = vmax.f32 %v331_v20, 0.0  ;;  %v669_v35 = vrot.slane %v2878_v29, 1  ;;  %v671_v36 = vrot.slane %v2882_v32, 1  ;;  %v402_v45 = vrot.slane %v362_v21, 1  ;;  %v258_v20 = vld [vmem:[%s2652_s25 + $0xb0] sm:$0xff] }
  0x38   : > { %v467_v48 = vrot.slane %v362_v21, 7  ;;  %v333_v55 = vadd.f32 %v2657_v1, %v294_v25  ;;  %v364_v58 = vmax.f32 %v332_v27, 0.0  ;;  %v296_v5 = vmul.f32 %v2645_v0, %v257_v34 }
  0x39   : > { %v468_v53 = vrot.slane %v363_v33, 7  ;;  %v546_v54 = vrot.slane %v363_v33, 5  ;;  %v2889_v60 = vsel %vm632_vm1, %v668_v30, %v669_v35  ;;  %v2892_v3 = vsel %vm632_vm1, %v669_v35, %v671_v36 }
  0x3a   : > { %4557 = vst [vmem:[#allocation18_spill] sm:$0xff] %v2889_v60  ;;  %4558 = vst [vmem:[#allocation19_spill] sm:$0xff] %v2892_v3  ;;  %v2895_v4 = vsel %vm442_vm0, %v402_v45, %v467_v48  ;;  %824 = vrot.lane.b32.xlu0 %v2889_v60, %s2593_s28  ;;  %v365_v12 = vmax.f32 %v333_v55, 0.0  ;;  %v403_v27 = vrot.slane %v364_v58, 1  ;;  %v470_v30 = vrot.slane %v364_v58, 7  ;;  %v259_v45 = vld [vmem:[%s2652_s25 + $0xb8] sm:$0xff] }
  0x3b   : > { %826 = vrot.lane.b32.xlu1 %v2892_v3, %s2593_s28  ;;  %v2903_v9 = vsel %vm442_vm0, %v467_v48, %v468_v53  ;;  %v673_v10 = vrot.slane %v2895_v4, 1  ;;  %v2907_v11 = vsel %vm442_vm0, %v468_v53, %v546_v54  ;;  %v334_v35 = vadd.f32 %v2657_v1, %v295_v28  ;;  %v260_v58 = vld [vmem:[%s2652_s25 + $0xc0] sm:$0xff] }
  0x3c   : > { %v674_v21 = vrot.slane %v2903_v9, 1  ;;  %v676_v25 = vrot.slane %v2907_v11, 1  ;;  %v471_v33 = vrot.slane %v365_v12, 7  ;;  %v547_v34 = vrot.slane %v365_v12, 5 }
  0x3d   : > { %v335_v36 = vadd.f32 %v2657_v1, %v296_v5  ;;  %v2922_v54 = vsel %vm442_vm0, %v403_v27, %v470_v30  ;;  %v297_v55 = vmul.f32 %v2645_v0, %v258_v20  ;;  %v366_v12 = vmax.f32 %v334_v35, 0.0 }
  0x3e   : > { %v2916_v48 = vsel %vm632_vm1, %v673_v10, %v674_v21  ;;  %v2919_v53 = vsel %vm632_vm1, %v674_v21, %v676_v25  ;;  %4561 = vst [vmem:[#allocation22_spill] sm:$0xff] %v2922_v54  ;;  %v2931_v28 = vsel %vm442_vm0, %v470_v30, %v471_v33  ;;  %v678_v5 = vrot.slane %v2922_v54, 1 }
  0x3f   : > { %4559 = vst [vmem:[#allocation20_spill] sm:$0xff] %v2916_v48  ;;  %4560 = vst [vmem:[#allocation21_spill] sm:$0xff] %v2919_v53  ;;  %828 = vrot.lane.b32.xlu0 %v2916_v48, %s2593_s28  ;;  %830 = vrot.lane.b32.xlu1 %v2919_v53, %s2593_s28  ;;  %v2935_v10 = vsel %vm442_vm0, %v471_v33, %v547_v34  ;;  %v679_v21 = vrot.slane %v2931_v28, 1  ;;  %v367_v25 = vmax.f32 %v335_v36, 0.0  ;;  %v261_v48 = vld [vmem:[%s2652_s25 + $0xc8] sm:$0xff]  ;;  %v404_v3 = vrot.slane %v366_v12, 1 }
  0x40   : > { %v681_v20 = vrot.slane %v2935_v10, 1  ;;  %v298_v27 = vmul.f32 %v2645_v0, %v259_v45  ;;  %v473_v53 = vrot.slane %v366_v12, 7  ;;  %v336_v30 = vadd.f32 %v2657_v1, %v297_v55 }
  0x41   : > { %v299_v60 = vmul.f32 %v2645_v0, %v260_v58  ;;  %v2944_v8 = vsel %vm632_vm1, %v678_v5, %v679_v21  ;;  %v474_v34 = vrot.slane %v367_v25, 7  ;;  %v548_v35 = vrot.slane %v367_v25, 5  ;;  %v262_v5 = vld [vmem:[%s2652_s25 + $0xd0] sm:$0xff] }
  0x42   : > { %4562 = vst [vmem:[#allocation23_spill] sm:$0xff] %v2944_v8  ;;  %v2947_v33 = vsel %vm632_vm1, %v679_v21, %v681_v20  ;;  %v2954_v36 = vsel %vm442_vm0, %v404_v3, %v473_v53  ;;  %v337_v45 = vadd.f32 %v2657_v1, %v298_v27  ;;  %v368_v55 = vmax.f32 %v336_v30, 0.0 }
  0x43   : > { %4563 = vst [vmem:[#allocation24_spill] sm:$0xff] %v2947_v33  ;;  %832 = vrot.lane.b32.xlu0 %v2944_v8, %s2593_s28  ;;  %834 = vrot.lane.b32.xlu1 %v2947_v33, %s2593_s28  ;;  %4564 = vst [vmem:[#allocation25_spill] sm:$0xff] %v2954_v36  ;;  %v300_v58 = vmul.f32 %v2645_v0, %v261_v48  ;;  %v2960_v12 = vsel %vm442_vm0, %v473_v53, %v474_v34  ;;  %v683_v21 = vrot.slane %v2954_v36, 1 }
  0x44   : > { %v2964_v20 = vsel %vm442_vm0, %v474_v34, %v548_v35  ;;  %v338_v25 = vadd.f32 %v2657_v1, %v299_v60  ;;  %v684_v3 = vrot.slane %v2960_v12, 1  ;;  %v369_v8 = vmax.f32 %v337_v45, 0.0 }
  0x45   : > { %v686_v33 = vrot.slane %v2964_v20, 1  ;;  %v405_v27 = vrot.slane %v368_v55, 1  ;;  %v476_v30 = vrot.slane %v368_v55, 7  ;;  %v339_v48 = vadd.f32 %v2657_v1, %v300_v58 }
  0x46   : > { %v370_v7 = vmax.f32 %v338_v25, 0.0  ;;  %v301_v53 = vmul.f32 %v2645_v0, %v262_v5  ;;  %v2973_v31 = vsel %vm632_vm1, %v683_v21, %v684_v3  ;;  %v477_v60 = vrot.slane %v369_v8, 7 }
  0x47   : > { %4565 = vst [vmem:[#allocation26_spill] sm:$0xff] %v2973_v31  ;;  %v2976_v34 = vsel %vm632_vm1, %v684_v3, %v686_v33  ;;  %v549_v35 = vrot.slane %v369_v8, 5  ;;  %836 = vrot.lane.b32.xlu0 %v2973_v31, %s2593_s28  ;;  %v2983_v45 = vsel %vm442_vm0, %v405_v27, %v476_v30  ;;  %v371_v55 = vmax.f32 %v339_v48, 0.0  ;;  %v264_v3 = vld [vmem:[%s2652_s25 + $0xe0] sm:$0xff] }
  0x48   : > { %4566 = vst [vmem:[#allocation27_spill] sm:$0xff] %v2976_v34  ;;  %838 = vrot.lane.b32.xlu1 %v2976_v34, %s2593_s28  ;;  %4567 = vst [vmem:[#allocation28_spill] sm:$0xff] %v2983_v45  ;;  %v406_v58 = vrot.slane %v370_v7, 1  ;;  %v479_v5 = vrot.slane %v370_v7, 7  ;;  %v2986_v21 = vsel %vm442_vm0, %v476_v30, %v477_v60  ;;  %v688_v33 = vrot.slane %v2983_v45, 1 }
  0x49   : > { %v2990_v8 = vsel %vm442_vm0, %v477_v60, %v549_v35  ;;  %v302_v25 = vmul.f32 %v2645_v0, %v263_v39  ;;  %v689_v34 = vrot.slane %v2986_v21, 1  ;;  %v480_v31 = vrot.slane %v371_v55, 7  ;;  %v265_v60 = vld [vmem:[%s2652_s25 + $0xe8] sm:$0xff] }
  0x4a   : > { %v691_v27 = vrot.slane %v2990_v8, 1  ;;  %v2997_v48 = vsel %vm442_vm0, %v406_v58, %v479_v5  ;;  %v550_v30 = vrot.slane %v371_v55, 5  ;;  %v340_v15 = vadd.f32 %v2657_v1, %v301_v53 }
  0x4b   : > { %4568 = vst [vmem:[#allocation29_spill] sm:$0xff] %v2997_v48  ;;  %v693_v7 = vrot.slane %v2997_v48, 1  ;;  %v341_v13 = vadd.f32 %v2657_v1, %v302_v25  ;;  %v3004_v35 = vsel %vm632_vm1, %v688_v33, %v689_v34  ;;  %v3010_v38 = vsel %vm442_vm0, %v479_v5, %v480_v31 }
  0x4c   : > { %4569 = vst [vmem:[#allocation30_spill] sm:$0xff] %v3004_v35  ;;  %v3007_v39 = vsel %vm632_vm1, %v689_v34, %v691_v27  ;;  %4571 = vst [vmem:[#allocation32_spill] sm:$0xff] %v3010_v38  ;;  %v303_v58 = vmul.f32 %v2645_v0, %v264_v3  ;;  %840 = vrot.lane.b32.xlu0 %v3004_v35, %s2593_s28  ;;  %v694_v53 = vrot.slane %v3010_v38, 1  ;;  %v372_v33 = vmax.f32 %v340_v15, 0.0 }
  0x4d   : > { %4570 = vst [vmem:[#allocation31_spill] sm:$0xff] %v3007_v39  ;;  %842 = vrot.lane.b32.xlu1 %v3007_v39, %s2593_s28  ;;  %v3019_v55 = vsel %vm442_vm0, %v480_v31, %v550_v30  ;;  %v373_v25 = vmax.f32 %v341_v13, 0.0  ;;  %v304_v5 = vmul.f32 %v2645_v0, %v265_v60 }
  0x4e   : > { %v696_v34 = vrot.slane %v3019_v55, 1  ;;  %v342_v27 = vadd.f32 %v2657_v1, %v303_v58  ;;  %v3025_v3 = vsel %vm632_vm1, %v693_v7, %v694_v53  ;;  %v407_v35 = vrot.slane %v372_v33, 1 }
  0x4f   : > { %4572 = vst [vmem:[#allocation33_spill] sm:$0xff] %v3025_v3  ;;  %v482_v37 = vrot.slane %v372_v33, 7  ;;  %v483_v18 = vrot.slane %v373_v25, 7  ;;  %v551_v14 = vrot.slane %v373_v25, 5  ;;  %v343_v31 = vadd.f32 %v2657_v1, %v304_v5 }
  0x50   : > { %v3028_v39 = vsel %vm632_vm1, %v694_v53, %v696_v34  ;;  %v374_v15 = vmax.f32 %v342_v27, 0.0  ;;  %844 = vrot.lane.b32.xlu0 %v3025_v3, %s2593_s28 }
  0x51   : > { %4573 = vst [vmem:[#allocation34_spill] sm:$0xff] %v3028_v39  ;;  %846 = vrot.lane.b32.xlu1 %v3028_v39, %s2593_s28  ;;  %v3036_v0 = vsel %vm442_vm0, %v482_v37, %v483_v18  ;;  %v3039_v13 = vsel %vm442_vm0, %v407_v35, %v482_v37  ;;  %v3044_v60 = vsel %vm442_vm0, %v483_v18, %v551_v14  ;;  %v375_v1 = vmax.f32 %v343_v31, 0.0 }
  0x52   : > { %4574 = vst [vmem:[#allocation35_spill] sm:$0xff] %v3036_v0  ;;  %4575 = vst [vmem:[#allocation36_spill] sm:$0xff] %v3039_v13  ;;  %v698_v7 = vrot.slane %v3039_v13, 1  ;;  %v699_v30 = vrot.slane %v3036_v0, 1  ;;  %v701_v58 = vrot.slane %v3044_v60, 1  ;;  %v408_v53 = vrot.slane %v374_v15, 1 }
  0x53   : > { %v485_v33 = vrot.slane %v374_v15, 7  ;;  %v486_v34 = vrot.slane %v375_v1, 7  ;;  %v552_v5 = vrot.slane %v375_v1, 5  ;;  %v709_v31 = vrot.slane %v2687_v41, 2 }
  0x54   : > { %v3048_v25 = vsel %vm632_vm1, %v698_v7, %v699_v30  ;;  %v3053_v37 = vsel %vm632_vm1, %v699_v30, %v701_v58  ;;  %v710_v30 = vrot.slane %v2684_v40, 2  ;;  %v712_v1 = vrot.slane %v2700_v50, 2 }
  0x55   : > { %4576 = vst [vmem:[#allocation37_spill] sm:$0xff] %v3048_v25  ;;  %848 = vrot.lane.b32.xlu0 %v3048_v25, %s2593_s28  ;;  %4577 = vst [vmem:[#allocation38_spill] sm:$0xff] %v3053_v37  ;;  %v3056_v35 = vsel %vm442_vm0, %v408_v53, %v485_v33  ;;  %850 = vrot.lane.b32.xlu1 %v3053_v37, %s2593_s28  ;;  %v3061_v14 = vsel %vm442_vm0, %v485_v33, %v486_v34  ;;  %v714_v33 = vrot.slane %v2695_v47, 2 }
  0x56   : > { %4578 = vst [vmem:[#allocation39_spill] sm:$0xff] %v3056_v35  ;;  %4579 = vst [vmem:[#allocation40_spill] sm:$0xff] %v3061_v14  ;;  %v703_v18 = vrot.slane %v3056_v35, 1  ;;  %v3065_v27 = vsel %vm442_vm0, %v486_v34, %v552_v5  ;;  %v704_v15 = vrot.slane %v3061_v14, 1  ;;  %v715_v34 = vrot.slane %v2692_v46, 2 }
  0x57   : > { %v706_v7 = vrot.slane %v3065_v27, 1  ;;  %v3085_v5 = vsel %vm708_vm2, %v709_v31, %v710_v30  ;;  %v3088_v50 = vsel %vm708_vm2, %v710_v30, %v712_v1  ;;  %v719_v31 = vrot.slane %v2716_v57, 2 }
  0x58   : > { %v3073_v58 = vsel %vm632_vm1, %v703_v18, %v704_v15  ;;  %v717_v18 = vrot.slane %v2703_v51, 2  ;;  %v720_v30 = vrot.slane %v2729_v2, 2  ;;  %v722_v1 = vrot.slane %v2735_v6, 2 }
  0x59   : > { %4580 = vst [vmem:[#allocation41_spill] sm:$0xff] %v3073_v58  ;;  %v3076_v53 = vsel %vm632_vm1, %v704_v15, %v706_v7  ;;  %852 = vrot.lane.b32.xlu0 %v3073_v58, %s2593_s28  ;;  %v3096_v15 = vsel %vm708_vm2, %v714_v33, %v715_v34  ;;  %v724_v51 = vrot.slane %v2753_v19, 2  ;;  %v729_v6 = vrot.slane %v2785_v49, 2 }
  0x5a   : > { %4581 = vst [vmem:[#allocation42_spill] sm:$0xff] %v3076_v53  ;;  %854 = vrot.lane.b32.xlu1 %v3076_v53, %s2593_s28  ;;  %v3099_v7 = vsel %vm708_vm2, %v715_v34, %v717_v18  ;;  %v3110_v33 = vsel %vm708_vm2, %v719_v31, %v720_v30  ;;  %v3113_v34 = vsel %vm708_vm2, %v720_v30, %v722_v1  ;;  %v725_v18 = vrot.slane %v2760_v24, 2  ;;  %s2596_s28 = smov 16  }
  0x5b   : > { %v727_v53 = vrot.slane %v2764_v26, 2  ;;  %v730_v30 = vrot.slane %v2794_v59, 2  ;;  %v732_v1 = vrot.slane %v2798_v61, 2  ;;  %v734_v26 = vrot.slane %v2815_v17, 2 }
  0x5c   : > { %v3123_v58 = vsel %vm708_vm2, %v724_v51, %v725_v18  ;;  %v739_v61 = vrot.slane %v2843_v43, 2 }
  0x5d   : > { %886 = vrot.lane.b32.xlu0 %v3085_v5, %s2594_s29  ;;  %v3126_v31 = vsel %vm708_vm2, %v725_v18, %v727_v53  ;;  %v3136_v37 = vsel %vm708_vm2, %v729_v6, %v730_v30  ;;  %v3139_v51 = vsel %vm708_vm2, %v730_v30, %v732_v1  ;;  %v735_v53 = vrot.slane %v2812_v16, 2 }
  0x5e   : > { %888 = vrot.lane.b32.xlu1 %v3088_v50, %s2594_s29  ;;  %v737_v18 = vrot.slane %v2823_v23, 2  ;;  %v740_v30 = vrot.slane %v2840_v42, 2  ;;  %v742_v1 = vrot.slane %v2846_v44, 2  ;;  %v744_v23 = vrot.slane %v2870_v22, 2 }
  0x5f   : > { %v3149_v25 = vsel %vm708_vm2, %v734_v26, %v735_v53  ;;  %v749_v44 = vrot.slane %v2895_v4, 2 }
  0x60   : > { %v3152_v6 = vsel %vm708_vm2, %v735_v53, %v737_v18  ;;  %v3162_v39 = vsel %vm708_vm2, %v739_v61, %v740_v30  ;;  %v3165_v26 = vsel %vm708_vm2, %v740_v30, %v742_v1  ;;  %v745_v53 = vrot.slane %v2878_v29, 2 }
  0x61   : > { %890 = vrot.lane.b32.xlu0 %v3096_v15, %s2594_s29  ;;  %4582 = vst [vmem:[#allocation43_spill] sm:$0xff] %v3165_v26  ;;  %v747_v18 = vrot.slane %v2882_v32, 2  ;;  %v750_v30 = vrot.slane %v2903_v9, 2  ;;  %v752_v1 = vrot.slane %v2907_v11, 2  ;;  %v754_v32 = vrot.slane %v2922_v54, 2 }
  0x62   : > { %892 = vrot.lane.b32.xlu1 %v3099_v7, %s2594_s29  ;;  %v3175_v3 = vsel %vm708_vm2, %v744_v23, %v745_v53  ;;  %v759_v11 = vrot.slane %v2954_v36, 2 }
  0x63   : > { %v3178_v61 = vsel %vm708_vm2, %v745_v53, %v747_v18  ;;  %v3191_v23 = vsel %vm708_vm2, %v750_v30, %v752_v1  ;;  %v755_v53 = vrot.slane %v2931_v28, 2  ;;  %v757_v18 = vrot.slane %v2935_v10, 2 }
  0x64   : > { %v762_v1 = vrot.slane %v2964_v20, 2  ;;  %v764_v10 = vrot.slane %v2983_v45, 2  ;;  %v769_v20 = vrot.slane %v2997_v48, 2 }
  0x65   : > { %894 = vrot.lane.b32.xlu0 %v3110_v33, %s2594_s29  ;;  %v3201_v54 = vsel %vm708_vm2, %v754_v32, %v755_v53 }
  0x66   : > { %896 = vrot.lane.b32.xlu1 %v3113_v34, %s2594_s29 }
  0x69   : > { %898 = vrot.lane.b32.xlu0 %v3123_v58, %s2594_s29 }
  0x6a   : > { %900 = vrot.lane.b32.xlu1 %v3126_v31, %s2594_s29 }
  0x6d   : > { %902 = vrot.lane.b32.xlu0 %v3136_v37, %s2594_s29 }
  0x6e   : > { %904 = vrot.lane.b32.xlu1 %v3139_v51, %s2594_s29 }
  0x71   : > { %906 = vrot.lane.b32.xlu0 %v3149_v25, %s2594_s29 }
  0x72   : > { %908 = vrot.lane.b32.xlu1 %v3152_v6, %s2594_s29 }
  0x75   : > { %910 = vrot.lane.b32.xlu0 %v3162_v39, %s2594_s29 }
  0x76   : > { %912 = vrot.lane.b32.xlu1 %v3165_v26, %s2594_s29  ;;  %v3188_v26 = vsel %vm708_vm2, %v749_v44, %v750_v30  ;;  %v3204_v44 = vsel %vm708_vm2, %v755_v53, %v757_v18  ;;  %v760_v30 = vrot.slane %v2960_v12, 2  ;;  %v765_v53 = vrot.slane %v2986_v21, 2 }
  0x77   : > { %v767_v18 = vrot.slane %v2990_v8, 2  ;;  %v774_v8 = vrot.slane %v3039_v13, 2 }
  0x78   : > { %v3214_v36 = vsel %vm708_vm2, %v759_v11, %v760_v30  ;;  %v3217_v32 = vsel %vm708_vm2, %v760_v30, %v762_v1  ;;  %v3227_v45 = vsel %vm708_vm2, %v764_v10, %v765_v53  ;;  %v770_v30 = vrot.slane %v3010_v38, 2  ;;  %v1840_v38 = vld [vmem:[%s4444_s3 + $0x68] sm:$0xff] }
  0x79   : > { %914 = vrot.lane.b32.xlu0 %v3175_v3, %s2594_s29  ;;  %4583 = vst [vmem:[#allocation44_spill] sm:$0xff] %v3227_v45  ;;  %v3230_v11 = vsel %vm708_vm2, %v765_v53, %v767_v18  ;;  %v772_v1 = vrot.slane %v3019_v55, 2  ;;  %v775_v53 = vrot.slane %v3036_v0, 2  ;;  %v777_v18 = vrot.slane %v3044_v60, 2 }
  0x7a   : > { %916 = vrot.lane.b32.xlu1 %v3178_v61, %s2594_s29  ;;  %4584 = vst [vmem:[#allocation45_spill] sm:$0xff] %v3230_v11  ;;  %v3240_v48 = vsel %vm708_vm2, %v769_v20, %v770_v30  ;;  %v779_v55 = vrot.slane %v3056_v35, 2 }
  0x7b   : > { %4585 = vst [vmem:[#allocation46_spill] sm:$0xff] %v3240_v48  ;;  %v3243_v10 = vsel %vm708_vm2, %v770_v30, %v772_v1  ;;  %v3253_v13 = vsel %vm708_vm2, %v774_v8, %v775_v53  ;;  %v3256_v20 = vsel %vm708_vm2, %v775_v53, %v777_v18  ;;  %v780_v30 = vrot.slane %v3061_v14, 2 }
  0x7c   : > { %4586 = vst [vmem:[#allocation47_spill] sm:$0xff] %v3243_v10  ;;  %4587 = vst [vmem:[#allocation48_spill] sm:$0xff] %v3253_v13  ;;  %v782_v1 = vrot.slane %v3065_v27, 2 }
  0x7d   : > { %918 = vrot.lane.b32.xlu0 %v3188_v26, %s2594_s29  ;;  %4588 = vst [vmem:[#allocation49_spill] sm:$0xff] %v3256_v20  ;;  %v3269_v8 = vsel %vm708_vm2, %v779_v55, %v780_v30 }
  0x7e   : > { %920 = vrot.lane.b32.xlu1 %v3191_v23, %s2594_s29  ;;  %4589 = vst [vmem:[#allocation50_spill] sm:$0xff] %v3269_v8  ;;  %v3272_v53 = vsel %vm708_vm2, %v780_v30, %v782_v1 }
  0x7f   : > { %4590 = vst [vmem:[#allocation51_spill] sm:$0xff] %v3272_v53 }
  0x81   : > { %922 = vrot.lane.b32.xlu0 %v3201_v54, %s2594_s29 }
  0x82   : > { %924 = vrot.lane.b32.xlu1 %v3204_v44, %s2594_s29 }
  0x85   : > { %926 = vrot.lane.b32.xlu0 %v3214_v36, %s2594_s29 }
  0x86   : > { %928 = vrot.lane.b32.xlu1 %v3217_v32, %s2594_s29 }
  0x89   : > { %930 = vrot.lane.b32.xlu0 %v3227_v45, %s2594_s29 }
  0x8a   : > { %932 = vrot.lane.b32.xlu1 %v3230_v11, %s2594_s29 }
  0x8d   : > { %934 = vrot.lane.b32.xlu0 %v3240_v48, %s2594_s29 }
  0x8e   : > { %936 = vrot.lane.b32.xlu1 %v3243_v10, %s2594_s29  ;;  %v1841_v10 = vld [vmem:[%s4444_s3 + $0x70] sm:$0xff] }
  0x8f   : > { %v3260_v0 = vpop.permute.xlu0 %796 }
  0x91   : > { %v3262_v60 = vpop.permute.xlu1 %800  ;;  %938 = vrot.lane.b32.xlu0 %v3253_v13, %s2594_s29  ;;  %v1842_v13 = vld [vmem:[%s4444_s3 + $0x78] sm:$0xff] }
  0x92   : > { %940 = vrot.lane.b32.xlu1 %v3256_v20, %s2594_s29  ;;  %2455 = vmatprep.subr.mxu0 %v1842_v13 }
  0x93   : > { %v3274_v18 = vpop.permute.xlu0 %798  ;;  %2535 = vmatprep.subr.mxu1 %v1842_v13  ;;  %2456 = vmatpush3.msra.mxu0 %v1842_v13 }
  0x94   : > { %2551 = vmatpush3.msra.mxu1 %v1842_v13  ;;  %2457 = vmatprep.subr.mxu0 %v1841_v10  ;;  %v1839_v13 = vld [vmem:[%s4444_s3 + $0x60] sm:$0xff] }
  0x95   : > { %v3276_v14 = vpop.permute.xlu1 %802  ;;  %942 = vrot.lane.b32.xlu0 %v3269_v8, %s2594_s29  ;;  %2536 = vmatprep.subr.mxu1 %v1841_v10 }
  0x96   : > { %944 = vrot.lane.b32.xlu1 %v3272_v53, %s2594_s29  ;;  %2458 = vmatpush3.msra.mxu0 %v1841_v10 }
  0x97   : > { %v3282_v27 = vpop.permute.xlu0 %804  ;;  %2552 = vmatpush3.msra.mxu1 %v1841_v10  ;;  %2459 = vmatprep.subr.mxu0 %v1840_v38  ;;  %v1838_v10 = vld [vmem:[%s4444_s3 + $0x58] sm:$0xff] }
  0x98   : > { %2537 = vmatprep.subr.mxu1 %v1840_v38  ;;  %2460 = vmatpush3.msra.mxu0 %v1840_v38 }
  0x99   : > { %v3284_v35 = vpop.permute.xlu1 %806  ;;  %976 = vrot.lane.b32.xlu0 %v2695_v47, %s2595_s30  ;;  %2553 = vmatpush3.msra.mxu1 %v1840_v38  ;;  %v1837_v38 = vld [vmem:[%s4444_s3 + $0x50] sm:$0xff] }
  0x9a   : > { %978 = vrot.lane.b32.xlu1 %v2692_v46, %s2595_s30  ;;  %2461 = vmatprep.subr.mxu0 %v1839_v13 }
  0x9b   : > { %v3290_v55 = vpop.permute.xlu0 %808  ;;  %2538 = vmatprep.subr.mxu1 %v1839_v13  ;;  %2462 = vmatpush3.msra.mxu0 %v1839_v13 }
  0x9c   : > { %2554 = vmatpush3.msra.mxu1 %v1839_v13  ;;  %2463 = vmatprep.subr.mxu0 %v1838_v10  ;;  %v1836_v13 = vld [vmem:[%s4444_s3 + $0x48] sm:$0xff] }
  0x9d   : > { %v3292_v30 = vpop.permute.xlu1 %810  ;;  %980 = vrot.lane.b32.xlu0 %v2687_v41, %s2595_s30  ;;  %2539 = vmatprep.subr.mxu1 %v1838_v10 }
  0x9e   : > { %982 = vrot.lane.b32.xlu1 %v2684_v40, %s2595_s30  ;;  %2464 = vmatpush3.msra.mxu0 %v1838_v10 }
  0x9f   : > { %v3298_v1 = vpop.permute.xlu0 %812  ;;  %2555 = vmatpush3.msra.mxu1 %v1838_v10  ;;  %2465 = vmatprep.subr.mxu0 %v1837_v38  ;;  %v1835_v10 = vld [vmem:[%s4444_s3 + $0x40] sm:$0xff] }
  0xa0   : > { %2540 = vmatprep.subr.mxu1 %v1837_v38  ;;  %2466 = vmatpush3.msra.mxu0 %v1837_v38 }
  0xa1   : > { %v3300_v53 = vpop.permute.xlu1 %814  ;;  %984 = vrot.lane.b32.xlu0 %v2716_v57, %s2595_s30  ;;  %2556 = vmatpush3.msra.mxu1 %v1837_v38 }
  0xa2   : > { %4591 = vst [vmem:[#allocation52_spill] sm:$0xff] %v3300_v53  ;;  %986 = vrot.lane.b32.xlu1 %v2729_v2, %s2595_s30  ;;  %2467 = vmatprep.subr.mxu0 %v1836_v13  ;;  %v1535_v53 = vsel %vm1534_vm3, %v2687_v41, %v3260_v0  ;;  %v1536_v0 = vsel %vm1534_vm3, %v2684_v40, %v3274_v18 }
  0xa3   : > { %v3306_v8 = vpop.permute.xlu0 %816  ;;  %2541 = vmatprep.subr.mxu1 %v1836_v13  ;;  %2468 = vmatpush3.msra.mxu0 %v1836_v13 }
  0xa4   : > { %4592 = vst [vmem:[#allocation53_spill] sm:$0xff] %v3306_v8  ;;  %2557 = vmatpush3.msra.mxu1 %v1836_v13  ;;  %2469 = vmatprep.subr.mxu0 %v1835_v10  ;;  %v1833_v13 = vld [vmem:[%s4444_s3 + $0x30] sm:$0xff] }
  0xa5   : > { %v3308_v20 = vpop.permute.xlu1 %818  ;;  %988 = vrot.lane.b32.xlu0 %v2753_v19, %s2595_s30  ;;  %2542 = vmatprep.subr.mxu1 %v1835_v10 }
  0xa6   : > { %4593 = vst [vmem:[#allocation54_spill] sm:$0xff] %v3308_v20  ;;  %990 = vrot.lane.b32.xlu1 %v2760_v24, %s2595_s30  ;;  %2470 = vmatpush3.msra.mxu0 %v1835_v10 }
  0xa7   : > { %v3320_v48 = vpop.permute.xlu0 %820  ;;  %2558 = vmatpush3.msra.mxu1 %v1835_v10 }
  0xa8   : > { %4594 = vst [vmem:[#allocation55_spill] sm:$0xff] %v3320_v48 }
  0xa9   : > { %v3322_v20 = vpop.permute.xlu1 %822  ;;  %992 = vrot.lane.b32.xlu0 %v2785_v49, %s2595_s30 }
  0xaa   : > { %4595 = vst [vmem:[#allocation56_spill] sm:$0xff] %v3322_v20  ;;  %994 = vrot.lane.b32.xlu1 %v2794_v59, %s2595_s30 }
  0xac   : > { %v3334_v20 = vpop.permute.xlu0 %824 }
  0xad   : > { %4596 = vst [vmem:[#allocation57_spill] sm:$0xff] %v3334_v20  ;;  %v3336_v48 = vpop.permute.xlu1 %826  ;;  %996 = vrot.lane.b32.xlu0 %v2815_v17, %s2595_s30 }
  0xae   : > { %4597 = vst [vmem:[#allocation58_spill] sm:$0xff] %v3336_v48  ;;  %998 = vrot.lane.b32.xlu1 %v2812_v16, %s2595_s30 }
  0xb1   : > { %v3345_v8 = vpop.permute.xlu0 %828  ;;  %v3347_v20 = vpop.permute.xlu1 %830  ;;  %1000 = vrot.lane.b32.xlu0 %v2843_v43, %s2595_s30 }
  0xb2   : > { %4598 = vst [vmem:[#allocation59_spill] sm:$0xff] %v3345_v8  ;;  %4599 = vst [vmem:[#allocation60_spill] sm:$0xff] %v3347_v20  ;;  %1002 = vrot.lane.b32.xlu1 %v2840_v42, %s2595_s30 }
  0xb5   : > { %v3359_v20 = vpop.permute.xlu0 %832  ;;  %v3361_v8 = vpop.permute.xlu1 %834  ;;  %1004 = vrot.lane.b32.xlu0 %v2870_v22, %s2595_s30 }
  0xb6   : > { %4600 = vst [vmem:[#allocation61_spill] sm:$0xff] %v3359_v20  ;;  %4601 = vst [vmem:[#allocation62_spill] sm:$0xff] %v3361_v8  ;;  %1006 = vrot.lane.b32.xlu1 %v2878_v29, %s2595_s30  ;;  %v1834_v8 = vld [vmem:[%s4444_s3 + $0x38] sm:$0xff] }
  0xb7   : > { %2471 = vmatprep.subr.mxu0 %v1834_v8  ;;  %2543 = vmatprep.subr.mxu1 %v1834_v8 }
  0xb8   : > { %2472 = vmatpush3.msra.mxu0 %v1834_v8  ;;  %2559 = vmatpush3.msra.mxu1 %v1834_v8 }
  0xb9   : > { %1008 = vrot.lane.b32.xlu0 %v2895_v4, %s2595_s30  ;;  %v3377_v38 = vpop.permute.xlu0 %836  ;;  %2473 = vmatprep.subr.mxu0 %v1833_v13 }
  0xba   : > { %1072 = vrot.lane.b32.xlu1 %v2713_v56, %s2596_s28  ;;  %4602 = vst [vmem:[#allocation63_spill] sm:$0xff] %v3377_v38  ;;  %v3379_v20 = vpop.permute.xlu1 %838  ;;  %v1832_v56 = vld [vmem:[%s4444_s3 + $0x28] sm:$0xff]  ;;  %2544 = vmatprep.subr.mxu1 %v1833_v13 }
  0xbb   : > { %4603 = vst [vmem:[#allocation64_spill] sm:$0xff] %v3379_v20  ;;  %2474 = vmatpush3.msra.mxu0 %v1833_v13  ;;  %2560 = vmatpush3.msra.mxu1 %v1833_v13  ;;  %v1830_v13 = vld [vmem:[%s4444_s3 + $0x18] sm:$0xff] }
  0xbc   : > { %2475 = vmatprep.subr.mxu0 %v1832_v56  ;;  %2545 = vmatprep.subr.mxu1 %v1832_v56 }
  0xbd   : > { %1074 = vrot.lane.b32.xlu0 %v2726_v63, %s2596_s28  ;;  %v1831_v63 = vld [vmem:[%s4444_s3 + $0x20] sm:$0xff]  ;;  %2476 = vmatpush3.msra.mxu0 %v1832_v56 }
  0xbe   : > { %1168 = vrot.lane.b32.xlu1 %v3096_v15, %s2597_s7  ;;  %v3391_v10 = vpop.permute.xlu0 %840  ;;  %2561 = vmatpush3.msra.mxu1 %v1832_v56 }
  0xbf   : > { %4604 = vst [vmem:[#allocation65_spill] sm:$0xff] %v3391_v10  ;;  %v3393_v20 = vpop.permute.xlu1 %842  ;;  %2477 = vmatprep.subr.mxu0 %v1831_v63  ;;  %2546 = vmatprep.subr.mxu1 %v1831_v63 }
  0xc0   : > { %4605 = vst [vmem:[#allocation66_spill] sm:$0xff] %v3393_v20  ;;  %2478 = vmatpush3.msra.mxu0 %v1831_v63  ;;  %2562 = vmatpush3.msra.mxu1 %v1831_v63  ;;  %v1828_v63 = vld [vmem:[%s4444_s3 + $0x8] sm:$0xff] }
  0xc1   : > { %1170 = vrot.lane.b32.xlu0 %v3099_v7, %s2597_s7  ;;  %v1829_v7 = vld [vmem:[%s4444_s3 + $0x10] sm:$0xff]  ;;  %2479 = vmatprep.subr.mxu0 %v1830_v13 }
  0xc2   : > { %1264 = vrot.lane.b32.xlu1 %v2687_v41, %s2598_s12  ;;  %v3402_v15 = vpop.permute.xlu0 %844  ;;  %2547 = vmatprep.subr.mxu1 %v1830_v13 }
  0xc3   : > { %4606 = vst [vmem:[#allocation67_spill] sm:$0xff] %v3402_v15  ;;  %v3404_v8 = vpop.permute.xlu1 %846  ;;  %2480 = vmatpush3.msra.mxu0 %v1830_v13  ;;  %2563 = vmatpush3.msra.mxu1 %v1830_v13  ;;  %v1827_v13 = vld [vmem:[%s4444_s3] sm:$0xff] }
  0xc4   : > { %4607 = vst [vmem:[#allocation68_spill] sm:$0xff] %v3404_v8  ;;  %2481 = vmatprep.subr.mxu0 %v1829_v7  ;;  %2548 = vmatprep.subr.mxu1 %v1829_v7 }
  0xc5   : > { %1266 = vrot.lane.b32.xlu0 %v2684_v40, %s2598_s12  ;;  %2482 = vmatpush3.msra.mxu0 %v1829_v7 }
  0xc6   : > { %1354 = vrot.lane.b32.xlu1 %v2706_v52, %s2599_s15  ;;  %2564 = vmatpush3.msra.mxu1 %v1829_v7 }
  0xc7   : > { %v3416_v56 = vpop.permute.xlu0 %848  ;;  %v3418_v8 = vpop.permute.xlu1 %850  ;;  %2483 = vmatprep.subr.mxu0 %v1828_v63  ;;  %2549 = vmatprep.subr.mxu1 %v1828_v63 }
  0xc8   : > { %4608 = vst [vmem:[#allocation69_spill] sm:$0xff] %v3416_v56  ;;  %4609 = vst [vmem:[#allocation70_spill] sm:$0xff] %v3418_v8  ;;  %2484 = vmatpush3.msra.mxu0 %v1828_v63  ;;  %2565 = vmatpush3.msra.mxu1 %v1828_v63 }
  0xc9   : > { %1076 = vrot.lane.b32.xlu0 %v2706_v52, %s2596_s28  ;;  %2485 = vmatprep.subr.mxu0 %v1827_v13 }
  0xca   : > { %1356 = vrot.lane.b32.xlu1 %v2723_v62, %s2599_s15  ;;  %2550 = vmatprep.subr.mxu1 %v1827_v13 }
  0xcb   : > { %v3427_v56 = vpop.permute.xlu0 %852  ;;  %2486 = vmatpush3.msra.mxu0 %v1827_v13  ;;  %2566 = vmatpush3.msra.mxu1 %v1827_v13 }
  0xcc   : > { %4610 = vst [vmem:[#allocation71_spill] sm:$0xff] %v3427_v56  ;;  %v3429_v15 = vpop.permute.xlu1 %854 }
  0xcd   : > { %4611 = vst [vmem:[#allocation72_spill] sm:$0xff] %v3429_v15  ;;  %1444 = vrot.lane.b32.xlu0 %v3085_v5, %s2600_s26 }
  0xce   : > { %1078 = vrot.lane.b32.xlu1 %v2723_v62, %s2596_s28 }
  0xcf   : > { %v3438_v52 = vpop.permute.xlu0 %886 }
  0xd0   : > { %v3440_v7 = vpop.permute.xlu1 %888 }
  0xd1   : > { %1172 = vrot.lane.b32.xlu0 %v3085_v5, %s2597_s7  ;;  %v4612_v5 = vld [vmem:[#allocation2_spill] sm:$0xff] }
  0xd2   : > { %1446 = vrot.lane.b32.xlu1 %v3088_v50, %s2600_s26 }
  0xd3   : > { %v3446_v63 = vpop.permute.xlu0 %890 }
  0xd4   : > { %v3448_v15 = vpop.permute.xlu1 %892 }
  0xd5   : > { %1174 = vrot.lane.b32.xlu0 %v3088_v50, %s2597_s7  ;;  %v4613_v50 = vld [vmem:[#allocation3_spill] sm:$0xff] }
  0xd6   : > { %1268 = vrot.lane.b32.xlu1 %v2716_v57, %s2598_s12 }
  0xd7   : > { %v3454_v62 = vpop.permute.xlu0 %894 }
  0xd8   : > { %v3456_v8 = vpop.permute.xlu1 %896 }
  0xd9   : > { %1270 = vrot.lane.b32.xlu0 %v2729_v2, %s2598_s12 }
  0xda   : > { %1358 = vrot.lane.b32.xlu1 %v4612_v5, %s2599_s15 }
  0xdb   : > { %v3462_v13 = vpop.permute.xlu0 %898 }
  0xdc   : > { %v3464_v56 = vpop.permute.xlu1 %900 }
  0xdd   : > { %1080 = vrot.lane.b32.xlu0 %v4612_v5, %s2596_s28 }
  0xde   : > { %1360 = vrot.lane.b32.xlu1 %v4613_v50, %s2599_s15 }
  0xdf   : > { %v3470_v20 = vpop.permute.xlu0 %902 }
  0xe0   : > { %4614 = vst [vmem:[#allocation2_spill] sm:$0xff] %v3470_v20  ;;  %v3472_v10 = vpop.permute.xlu1 %904 }
  0xe1   : > { %4615 = vst [vmem:[#allocation3_spill] sm:$0xff] %v3472_v10  ;;  %1448 = vrot.lane.b32.xlu0 %v3110_v33, %s2600_s26 }
  0xe2   : > { %1082 = vrot.lane.b32.xlu1 %v4613_v50, %s2596_s28 }
  0xe3   : > { %v3478_v38 = vpop.permute.xlu0 %906 }
  0xe4   : > { %4616 = vst [vmem:[#allocation73_spill] sm:$0xff] %v3478_v38  ;;  %v3480_v48 = vpop.permute.xlu1 %908 }
  0xe5   : > { %4617 = vst [vmem:[#allocation74_spill] sm:$0xff] %v3480_v48  ;;  %1176 = vrot.lane.b32.xlu0 %v3110_v33, %s2597_s7  ;;  %v4622_v33 = vld [vmem:[#allocation4_spill] sm:$0xff] }
  0xe6   : > { %1450 = vrot.lane.b32.xlu1 %v3113_v34, %s2600_s26 }
  0xe7   : > { %v3486_v5 = vpop.permute.xlu0 %910 }
  0xe8   : > { %4618 = vst [vmem:[#allocation75_spill] sm:$0xff] %v3486_v5  ;;  %v3488_v11 = vpop.permute.xlu1 %912 }
  0xe9   : > { %4619 = vst [vmem:[#allocation76_spill] sm:$0xff] %v3488_v11  ;;  %1178 = vrot.lane.b32.xlu0 %v3113_v34, %s2597_s7  ;;  %v4625_v34 = vld [vmem:[#allocation5_spill] sm:$0xff] }
  0xea   : > { %1272 = vrot.lane.b32.xlu1 %v2753_v19, %s2598_s12 }
  0xeb   : > { %v3494_v50 = vpop.permute.xlu0 %914 }
  0xec   : > { %4620 = vst [vmem:[#allocation77_spill] sm:$0xff] %v3494_v50  ;;  %v3496_v38 = vpop.permute.xlu1 %916 }
  0xed   : > { %4621 = vst [vmem:[#allocation78_spill] sm:$0xff] %v3496_v38  ;;  %1274 = vrot.lane.b32.xlu0 %v2760_v24, %s2598_s12 }
  0xee   : > { %1362 = vrot.lane.b32.xlu1 %v4622_v33, %s2599_s15 }
  0xef   : > { %v3502_v48 = vpop.permute.xlu0 %918 }
  0xf0   : > { %4623 = vst [vmem:[#allocation4_spill] sm:$0xff] %v3502_v48  ;;  %v3504_v5 = vpop.permute.xlu1 %920 }
  0xf1   : > { %4624 = vst [vmem:[#allocation79_spill] sm:$0xff] %v3504_v5  ;;  %1084 = vrot.lane.b32.xlu0 %v4622_v33, %s2596_s28 }
  0xf2   : > { %1364 = vrot.lane.b32.xlu1 %v4625_v34, %s2599_s15 }
  0xf3   : > { %v3510_v11 = vpop.permute.xlu0 %922 }
  0xf4   : > { %4626 = vst [vmem:[#allocation5_spill] sm:$0xff] %v3510_v11  ;;  %v3512_v50 = vpop.permute.xlu1 %924 }
  0xf5   : > { %4627 = vst [vmem:[#allocation80_spill] sm:$0xff] %v3512_v50  ;;  %1452 = vrot.lane.b32.xlu0 %v3123_v58, %s2600_s26 }
  0xf6   : > { %1086 = vrot.lane.b32.xlu1 %v4625_v34, %s2596_s28 }
  0xf7   : > { %v3518_v38 = vpop.permute.xlu0 %926 }
  0xf8   : > { %4628 = vst [vmem:[#allocation81_spill] sm:$0xff] %v3518_v38  ;;  %v3520_v48 = vpop.permute.xlu1 %928 }
  0xf9   : > { %4629 = vst [vmem:[#allocation82_spill] sm:$0xff] %v3520_v48  ;;  %1180 = vrot.lane.b32.xlu0 %v3123_v58, %s2597_s7  ;;  %v4634_v58 = vld [vmem:[#allocation7_spill] sm:$0xff] }
  0xfa   : > { %1454 = vrot.lane.b32.xlu1 %v3126_v31, %s2600_s26 }
  0xfb   : > { %v3526_v33 = vpop.permute.xlu0 %930 }
  0xfc   : > { %4630 = vst [vmem:[#allocation83_spill] sm:$0xff] %v3526_v33  ;;  %v3528_v11 = vpop.permute.xlu1 %932 }
  0xfd   : > { %4631 = vst [vmem:[#allocation84_spill] sm:$0xff] %v3528_v11  ;;  %1182 = vrot.lane.b32.xlu0 %v3126_v31, %s2597_s7  ;;  %v4637_v31 = vld [vmem:[#allocation8_spill] sm:$0xff] }
  0xfe   : > { %1276 = vrot.lane.b32.xlu1 %v2785_v49, %s2598_s12 }
  0xff   : > { %v3534_v34 = vpop.permute.xlu0 %934 }
 0x100   : > { %4632 = vst [vmem:[#allocation85_spill] sm:$0xff] %v3534_v34  ;;  %v3536_v38 = vpop.permute.xlu1 %936 }
 0x101   : > { %4633 = vst [vmem:[#allocation86_spill] sm:$0xff] %v3536_v38  ;;  %1278 = vrot.lane.b32.xlu0 %v2794_v59, %s2598_s12 }
 0x102   : > { %1366 = vrot.lane.b32.xlu1 %v4634_v58, %s2599_s15 }
 0x103   : > { %v3542_v48 = vpop.permute.xlu0 %938 }
 0x104   : > { %4635 = vst [vmem:[#allocation7_spill] sm:$0xff] %v3542_v48  ;;  %v3544_v33 = vpop.permute.xlu1 %940 }
 0x105   : > { %4636 = vst [vmem:[#allocation87_spill] sm:$0xff] %v3544_v33  ;;  %1088 = vrot.lane.b32.xlu0 %v4634_v58, %s2596_s28 }
 0x106   : > { %1368 = vrot.lane.b32.xlu1 %v4637_v31, %s2599_s15 }
 0x107   : > { %v3550_v11 = vpop.permute.xlu0 %942 }
 0x108   : > { %4638 = vst [vmem:[#allocation8_spill] sm:$0xff] %v3550_v11  ;;  %v3552_v34 = vpop.permute.xlu1 %944 }
 0x109   : > { %4639 = vst [vmem:[#allocation88_spill] sm:$0xff] %v3552_v34  ;;  %1456 = vrot.lane.b32.xlu0 %v3136_v37, %s2600_s26 }
 0x10a   : > { %1090 = vrot.lane.b32.xlu1 %v4637_v31, %s2596_s28 }
 0x10b   : > { %v977_v38 = vpop.permute.xlu0 %976 }
 0x10c   : > { %v3558_v48 = vpop.permute.xlu1 %978 }
 0x10d   : > { %1184 = vrot.lane.b32.xlu0 %v3136_v37, %s2597_s7  ;;  %v4640_v37 = vld [vmem:[#allocation11_spill] sm:$0xff] }
 0x10e   : > { %1458 = vrot.lane.b32.xlu1 %v3139_v51, %s2600_s26 }
 0x10f   : > { %v3564_v58 = vpop.permute.xlu0 %980 }
 0x110   : > { %v3566_v33 = vpop.permute.xlu1 %982 }
 0x111   : > { %1186 = vrot.lane.b32.xlu0 %v3139_v51, %s2597_s7  ;;  %v4641_v51 = vld [vmem:[#allocation12_spill] sm:$0xff] }
 0x112   : > { %1280 = vrot.lane.b32.xlu1 %v2815_v17, %s2598_s12 }
 0x113   : > { %v3572_v31 = vpop.permute.xlu0 %984 }
 0x114   : > { %v3574_v34 = vpop.permute.xlu1 %986 }
 0x115   : > { %1282 = vrot.lane.b32.xlu0 %v2812_v16, %s2598_s12 }
 0x116   : > { %1370 = vrot.lane.b32.xlu1 %v4640_v37, %s2599_s15 }
 0x117   : > { %v3580_v11 = vpop.permute.xlu0 %988 }
 0x118   : > { %v3582_v50 = vpop.permute.xlu1 %990 }
 0x119   : > { %1092 = vrot.lane.b32.xlu0 %v4640_v37, %s2596_s28 }
 0x11a   : > { %1372 = vrot.lane.b32.xlu1 %v4641_v51, %s2599_s15 }
 0x11b   : > { %v3588_v5 = vpop.permute.xlu0 %992 }
 0x11c   : > { %v3590_v17 = vpop.permute.xlu1 %994 }
 0x11d   : > { %1460 = vrot.lane.b32.xlu0 %v3149_v25, %s2600_s26 }
 0x11e   : > { %1094 = vrot.lane.b32.xlu1 %v4641_v51, %s2596_s28 }
 0x11f   : > { %v3596_v16 = vpop.permute.xlu0 %996 }
 0x120   : > { %4642 = vst [vmem:[#allocation11_spill] sm:$0xff] %v3596_v16  ;;  %v3598_v10 = vpop.permute.xlu1 %998 }
 0x121   : > { %4643 = vst [vmem:[#allocation12_spill] sm:$0xff] %v3598_v10  ;;  %1188 = vrot.lane.b32.xlu0 %v3149_v25, %s2597_s7  ;;  %v4648_v25 = vld [vmem:[#allocation15_spill] sm:$0xff] }
 0x122   : > { %1462 = vrot.lane.b32.xlu1 %v3152_v6, %s2600_s26 }
 0x123   : > { %v3604_v37 = vpop.permute.xlu0 %1000 }
 0x124   : > { %4644 = vst [vmem:[#allocation89_spill] sm:$0xff] %v3604_v37  ;;  %v3606_v45 = vpop.permute.xlu1 %1002 }
 0x125   : > { %4645 = vst [vmem:[#allocation90_spill] sm:$0xff] %v3606_v45  ;;  %1190 = vrot.lane.b32.xlu0 %v3152_v6, %s2597_s7  ;;  %v4650_v6 = vld [vmem:[#allocation16_spill] sm:$0xff] }
 0x126   : > { %1284 = vrot.lane.b32.xlu1 %v2843_v43, %s2598_s12 }
 0x127   : > { %v3612_v51 = vpop.permute.xlu0 %1004 }
 0x128   : > { %4646 = vst [vmem:[#allocation91_spill] sm:$0xff] %v3612_v51  ;;  %v3614_v59 = vpop.permute.xlu1 %1006 }
 0x129   : > { %4647 = vst [vmem:[#allocation92_spill] sm:$0xff] %v3614_v59  ;;  %1286 = vrot.lane.b32.xlu0 %v2840_v42, %s2598_s12 }
 0x12a   : > { %1374 = vrot.lane.b32.xlu1 %v4648_v25, %s2599_s15 }
 0x12b   : > { %v3620_v10 = vpop.permute.xlu0 %1008 }
 0x12c   : > { %4649 = vst [vmem:[#allocation15_spill] sm:$0xff] %v3620_v10  ;;  %v1073_v37 = vpop.permute.xlu1 %1072  ;;  %v4651_v10 = vld [vmem:[#allocation43_spill] sm:$0xff] }
 0x12d   : > { %1096 = vrot.lane.b32.xlu0 %v4648_v25, %s2596_s28 }
 0x12e   : > { %1376 = vrot.lane.b32.xlu1 %v4650_v6, %s2599_s15 }
 0x12f   : > { %v1075_v43 = vpop.permute.xlu0 %1074 }
 0x130   : > { %v1169_v45 = vpop.permute.xlu1 %1168 }
 0x131   : > { %1464 = vrot.lane.b32.xlu0 %v3162_v39, %s2600_s26 }
 0x132   : > { %1098 = vrot.lane.b32.xlu1 %v4650_v6, %s2596_s28 }
 0x133   : > { %v1171_v59 = vpop.permute.xlu0 %1170 }
 0x134   : > { %v1265_v42 = vpop.permute.xlu1 %1264 }
 0x135   : > { %1192 = vrot.lane.b32.xlu0 %v3162_v39, %s2597_s7  ;;  %v3643_v39 = vsel %vm1565_vm4, %v1535_v53, %v3438_v52  ;;  %v4652_v53 = vld [vmem:[#allocation18_spill] sm:$0xff] }
 0x136   : > { %1466 = vrot.lane.b32.xlu1 %v4651_v10, %s2600_s26  ;;  %v1597_v6 = vsel %vm1596_vm5, %v3643_v39, %v977_v38  ;;  %v3658_v38 = vsel %vm1565_vm4, %v1536_v0, %v3440_v7 }
 0x137   : > { %v1267_v25 = vpop.permute.xlu0 %1266  ;;  %v1630_v41 = vsel %vm1629_vm6, %v1597_v6, %v1073_v37  ;;  %v1598_v37 = vsel %vm1596_vm5, %v3658_v38, %v3558_v48 }
 0x138   : > { %v1355_v51 = vpop.permute.xlu1 %1354  ;;  %v1631_v6 = vsel %vm1629_vm6, %v1598_v37, %v1075_v43 }
 0x139   : > { %1194 = vrot.lane.b32.xlu0 %v4651_v10, %s2597_s7  ;;  %v1663_v10 = vsel %vm1662_vm7, %v1630_v41, %v1169_v45 }
 0x13a   : > { %1288 = vrot.lane.b32.xlu1 %v2870_v22, %s2598_s12  ;;  %v1696_v52 = vsel %vm1695_vm8, %v1663_v10, %v1265_v42  ;;  %v4653_v42 = vld [vmem:[#allocation19_spill] sm:$0xff] }
 0x13b   : > { %v1077_v16 = vpop.permute.xlu0 %1076  ;;  %v1729_v40 = vsel %vm1728_vm9, %v1696_v52, %v1355_v51 }
 0x13c   : > { %v1357_v20 = vpop.permute.xlu1 %1356 }
 0x13d   : > { %1290 = vrot.lane.b32.xlu0 %v2878_v29, %s2598_s12  ;;  %v1664_v29 = vsel %vm1662_vm7, %v1631_v6, %v1171_v59 }
 0x13e   : > { %1378 = vrot.lane.b32.xlu1 %v4652_v53, %s2599_s15  ;;  %v1697_v7 = vsel %vm1695_vm8, %v1664_v29, %v1267_v25  ;;  %v1537_v25 = vsel %vm1534_vm3, %v2695_v47, %v3262_v60  ;;  %v1538_v47 = vsel %vm1534_vm3, %v2692_v46, %v3276_v14 }
 0x13f   : > { %v1445_v45 = vpop.permute.xlu0 %1444  ;;  %v1730_v48 = vsel %vm1728_vm9, %v1697_v7, %v1357_v20 }
 0x140   : > { %v1079_v18 = vpop.permute.xlu1 %1078  ;;  %v1762_v41 = vsel %vm1761_vm10, %v1729_v40, %v1445_v45 }
 0x141   : > { %1100 = vrot.lane.b32.xlu0 %v4652_v53, %s2596_s28  ;;  %2487 = vmatprep.mubr.msk.f32.mxu0 %vm1794_vm11, %v1762_v41  ;;  %v1568_v53 = vsel %vm1565_vm4, %v1537_v25, %v3446_v63  ;;  %v1569_v63 = vsel %vm1565_vm4, %v1538_v47, %v3448_v15 }
 0x142   : > { %1380 = vrot.lane.b32.xlu1 %v4653_v42, %s2599_s15 }
 0x143   : > { %v1173_v51 = vpop.permute.xlu0 %1172 }
 0x144   : > { %v1447_v0 = vpop.permute.xlu1 %1446 }
 0x145   : > { %v1763_v43 = vsel %vm1761_vm10, %v1730_v48, %v1447_v0  ;;  %1468 = vrot.lane.b32.xlu0 %v3175_v3, %s2600_s26 }
 0x146   : > { %1102 = vrot.lane.b32.xlu1 %v4653_v42, %s2596_s28  ;;  %2488 = vmatmul.mubr.msk.f32.vlgmr.msra.gmra.mxu0 %vm1794_vm11, %v1763_v43 }
 0x147   : > { %v1175_v59 = vpop.permute.xlu0 %1174 }
 0x148   : > { %v1269_v10 = vpop.permute.xlu1 %1268 }
 0x149   : > { %1196 = vrot.lane.b32.xlu0 %v3175_v3, %s2597_s7  ;;  %v1599_v3 = vsel %vm1596_vm5, %v1568_v53, %v3564_v58 }
 0x14a   : > { %1470 = vrot.lane.b32.xlu1 %v3178_v61, %s2600_s26  ;;  %v1632_v40 = vsel %vm1629_vm6, %v1599_v3, %v1077_v16  ;;  %v1600_v16 = vsel %vm1596_vm5, %v1569_v63, %v3566_v33 }
 0x14b   : > { %v1271_v29 = vpop.permute.xlu0 %1270  ;;  %v1665_v60 = vsel %vm1662_vm7, %v1632_v40, %v1173_v51  ;;  %v1633_v14 = vsel %vm1629_vm6, %v1600_v16, %v1079_v18  ;;  %v4655_v51 = vld [vmem:[#allocation21_spill] sm:$0xff] }
 0x14c   : > { %v1359_v20 = vpop.permute.xlu1 %1358  ;;  %v1698_v58 = vsel %vm1695_vm8, %v1665_v60, %v1269_v10  ;;  %v1666_v42 = vsel %vm1662_vm7, %v1633_v14, %v1175_v59 }
 0x14d   : > { %1198 = vrot.lane.b32.xlu0 %v3178_v61, %s2597_s7  ;;  %v4654_v61 = vld [vmem:[#allocation20_spill] sm:$0xff]  ;;  %v1731_v45 = vsel %vm1728_vm9, %v1698_v58, %v1359_v20  ;;  %v1699_v15 = vsel %vm1695_vm8, %v1666_v42, %v1271_v29  ;;  %v1601_v29 = vsel %vm1596_vm5, %v3643_v39, %v3572_v31  ;;  %v1539_v42 = vsel %vm1534_vm3, %v2716_v57, %v3282_v27 }
 0x14e   : > { %1292 = vrot.lane.b32.xlu1 %v2895_v4, %s2598_s12  ;;  %v1540_v57 = vsel %vm1534_vm3, %v2729_v2, %v3284_v35 }
 0x14f   : > { %v1081_v52 = vpop.permute.xlu0 %1080 }
 0x150   : > { %v1361_v37 = vpop.permute.xlu1 %1360  ;;  %v1634_v53 = vsel %vm1629_vm6, %v1601_v29, %v1081_v52 }
 0x151   : > { %1294 = vrot.lane.b32.xlu0 %v2903_v9, %s2598_s12  ;;  %v1732_v33 = vsel %vm1728_vm9, %v1699_v15, %v1361_v37  ;;  %v1570_v15 = vsel %vm1565_vm4, %v1539_v42, %v3454_v62 }
 0x152   : > { %1382 = vrot.lane.b32.xlu1 %v4654_v61, %s2599_s15 }
 0x153   : > { %v1449_v6 = vpop.permute.xlu0 %1448 }
 0x154   : > { %v1083_v46 = vpop.permute.xlu1 %1082  ;;  %v1764_v41 = vsel %vm1761_vm10, %v1731_v45, %v1449_v6 }
 0x155   : > { %1010 = vrot.lane.b32.xlu0 %v2903_v9, %s2595_s30  ;;  %2490 = vmatprep.mubr.msk.f32.mxu0 %vm1794_vm11, %v1764_v41 }
 0x156   : > { %1104 = vrot.lane.b32.xlu1 %v4654_v61, %s2596_s28  ;;  %v4657_v61 = vld [vmem:[#allocation23_spill] sm:$0xff] }
 0x157   : > { %v1177_v7 = vpop.permute.xlu0 %1176 }
 0x158   : > { %v1451_v48 = vpop.permute.xlu1 %1450  ;;  %v1667_v3 = vsel %vm1662_vm7, %v1634_v53, %v1177_v7 }
 0x159   : > { %v1765_v18 = vsel %vm1761_vm10, %v1732_v33, %v1451_v48  ;;  %1384 = vrot.lane.b32.xlu0 %v4655_v51, %s2599_s15  ;;  %v1603_v33 = vsel %vm1596_vm5, %v1570_v15, %v3580_v11 }
 0x15a   : > { %1472 = vrot.lane.b32.xlu1 %v3188_v26, %s2600_s26  ;;  %2491 = vmatmul.mubr.msk.f32.gmra.mxu0 %vm1794_vm11, %v1765_v18 }
 0x15b   : > { %v1179_v0 = vpop.permute.xlu0 %1178 }
 0x15c   : > { %v1273_v43 = vpop.permute.xlu1 %1272 }
 0x15d   : > { %1106 = vrot.lane.b32.xlu0 %v4655_v51, %s2596_s28  ;;  %v1700_v37 = vsel %vm1695_vm8, %v1667_v3, %v1273_v43 }
 0x15e   : > { %1200 = vrot.lane.b32.xlu1 %v3188_v26, %s2597_s7  ;;  %v4656_v26 = vld [vmem:[#allocation22_spill] sm:$0xff] }
 0x15f   : > { %v1275_v59 = vpop.permute.xlu0 %1274 }
 0x160   : > { %v1363_v10 = vpop.permute.xlu1 %1362 }
 0x161   : > { %1474 = vrot.lane.b32.xlu0 %v3191_v23, %s2600_s26  ;;  %v1733_v31 = vsel %vm1728_vm9, %v1700_v37, %v1363_v10 }
 0x162   : > { %1202 = vrot.lane.b32.xlu1 %v3191_v23, %s2597_s7  ;;  %v1602_v23 = vsel %vm1596_vm5, %v3658_v38, %v3574_v34 }
 0x163   : > { %v1085_v20 = vpop.permute.xlu0 %1084  ;;  %v1635_v52 = vsel %vm1629_vm6, %v1602_v23, %v1083_v46  ;;  %v4658_v46 = vld [vmem:[#allocation24_spill] sm:$0xff] }
 0x164   : > { %v1365_v25 = vpop.permute.xlu1 %1364  ;;  %v1668_v60 = vsel %vm1662_vm7, %v1635_v52, %v1179_v0  ;;  %v1636_v18 = vsel %vm1629_vm6, %v1603_v33, %v1085_v20  ;;  %v1543_v33 = vsel %vm1534_vm3, %v2785_v49, %v3298_v1 }
 0x165   : > { %1296 = vrot.lane.b32.xlu0 %v4656_v26, %s2598_s12  ;;  %v1701_v63 = vsel %vm1695_vm8, %v1668_v60, %v1275_v59 }
 0x166   : > { %1012 = vrot.lane.b32.xlu1 %v4656_v26, %s2595_s30  ;;  %v1734_v34 = vsel %vm1728_vm9, %v1701_v63, %v1365_v25  ;;  %v4660_v25 = vld [vmem:[#allocation26_spill] sm:$0xff] }
 0x167   : > { %v1453_v39 = vpop.permute.xlu0 %1452 }
 0x168   : > { %v1087_v40 = vpop.permute.xlu1 %1086  ;;  %v1766_v47 = vsel %vm1761_vm10, %v1733_v31, %v1453_v39  ;;  %v1541_v31 = vsel %vm1534_vm3, %v2753_v19, %v3290_v55  ;;  %v4661_v39 = vld [vmem:[#allocation27_spill] sm:$0xff]  ;;  %v1542_v19 = vsel %vm1534_vm3, %v2760_v24, %v3292_v30 }
 0x169   : > { %1298 = vrot.lane.b32.xlu0 %v2931_v28, %s2598_s12  ;;  %2493 = vmatprep.mubr.msk.f32.mxu0 %vm1794_vm11, %v1766_v47 }
 0x16a   : > { %1386 = vrot.lane.b32.xlu1 %v4657_v61, %s2599_s15 }
 0x16b   : > { %v1181_v38 = vpop.permute.xlu0 %1180 }
 0x16c   : > { %v1455_v58 = vpop.permute.xlu1 %1454  ;;  %v1669_v27 = vsel %vm1662_vm7, %v1636_v18, %v1181_v38  ;;  %v4665_v18 = vld [vmem:[#allocation11_spill] sm:$0xff] }
 0x16d   : > { %v1767_v16 = vsel %vm1761_vm10, %v1734_v34, %v1455_v58  ;;  %1014 = vrot.lane.b32.xlu0 %v2931_v28, %s2595_s30 }
 0x16e   : > { %1108 = vrot.lane.b32.xlu1 %v4657_v61, %s2596_s28  ;;  %2494 = vmatmul.mubr.msk.f32.gmra.mxu0 %vm1794_vm11, %v1767_v16 }
 0x16f   : > { %v1183_v45 = vpop.permute.xlu0 %1182 }
 0x170   : > { %v1277_v6 = vpop.permute.xlu1 %1276 }
 0x171   : > { %1388 = vrot.lane.b32.xlu0 %v4658_v46, %s2599_s15  ;;  %v1702_v11 = vsel %vm1695_vm8, %v1669_v27, %v1277_v6 }
 0x172   : > { %1476 = vrot.lane.b32.xlu1 %v3201_v54, %s2600_s26 }
 0x173   : > { %v1279_v14 = vpop.permute.xlu0 %1278 }
 0x174   : > { %v1367_v41 = vpop.permute.xlu1 %1366 }
 0x175   : > { %1110 = vrot.lane.b32.xlu0 %v4658_v46, %s2596_s28  ;;  %v1735_v51 = vsel %vm1728_vm9, %v1702_v11, %v1367_v41  ;;  %v4662_v46 = vld [vmem:[#allocation28_spill] sm:$0xff]  ;;  %v4663_v41 = vld [vmem:[#allocation30_spill] sm:$0xff] }
 0x176   : > { %1204 = vrot.lane.b32.xlu1 %v3201_v54, %s2597_s7  ;;  %v1571_v54 = vsel %vm1565_vm4, %v1540_v57, %v3456_v8 }
 0x177   : > { %v1089_v7 = vpop.permute.xlu0 %1088  ;;  %v1604_v62 = vsel %vm1596_vm5, %v1571_v54, %v3582_v50 }
 0x178   : > { %v1369_v48 = vpop.permute.xlu1 %1368  ;;  %v1637_v35 = vsel %vm1629_vm6, %v1604_v62, %v1087_v40  ;;  %v1572_v40 = vsel %vm1565_vm4, %v1541_v31, %v3462_v13  ;;  %v1573_v13 = vsel %vm1565_vm4, %v1542_v19, %v3464_v56  ;;  %v4666_v62 = vld [vmem:[#allocation52_spill] sm:$0xff] }
 0x179   : > { %1478 = vrot.lane.b32.xlu0 %v3204_v44, %s2600_s26  ;;  %v1670_v59 = vsel %vm1662_vm7, %v1637_v35, %v1183_v45  ;;  %v1605_v52 = vsel %vm1596_vm5, %v1572_v40, %v3588_v5  ;;  %v1606_v63 = vsel %vm1596_vm5, %v1573_v13, %v3590_v17  ;;  %v4670_v35 = vld [vmem:[#allocation3_spill] sm:$0xff]  ;;  %v4674_v13 = vld [vmem:[#allocation53_spill] sm:$0xff] }
 0x17a   : > { %1206 = vrot.lane.b32.xlu1 %v3204_v44, %s2597_s7  ;;  %v4659_v44 = vld [vmem:[#allocation25_spill] sm:$0xff]  ;;  %v1703_v8 = vsel %vm1695_vm8, %v1670_v59, %v1279_v14  ;;  %v1638_v61 = vsel %vm1629_vm6, %v1605_v52, %v1089_v7  ;;  %v4664_v7 = vld [vmem:[#allocation2_spill] sm:$0xff] }
 0x17b   : > { %v1457_v0 = vpop.permute.xlu0 %1456  ;;  %v1736_v50 = vsel %vm1728_vm9, %v1703_v8, %v1369_v48  ;;  %v1574_v48 = vsel %vm1565_vm4, %v1543_v33, %v4664_v7  ;;  %v4671_v8 = vld [vmem:[#allocation12_spill] sm:$0xff]  ;;  %v4672_v52 = vld [vmem:[#allocation45_spill] sm:$0xff]  ;;  %v4683_v33 = vld [vmem:[#allocation90_spill] sm:$0xff] }
 0x17c   : > { %v1091_v2 = vpop.permute.xlu1 %1090  ;;  %v1768_v43 = vsel %vm1761_vm10, %v1735_v51, %v1457_v0  ;;  %v1607_v57 = vsel %vm1596_vm5, %v1574_v48, %v4665_v18  ;;  %v4667_v51 = vld [vmem:[#allocation6_spill] sm:$0xff]  ;;  %v4668_v0 = vld [vmem:[#allocation31_spill] sm:$0xff] }
 0x17d   : > { %1300 = vrot.lane.b32.xlu0 %v4659_v44, %s2598_s12  ;;  %2496 = vmatprep.mubr.msk.f32.mxu0 %vm1794_vm11, %v1768_v43  ;;  %v1639_v30 = vsel %vm1629_vm6, %v1606_v63, %v1091_v2  ;;  %v1544_v49 = vsel %vm1534_vm3, %v4667_v51, %v4666_v62  ;;  %v4669_v2 = vld [vmem:[#allocation44_spill] sm:$0xff]  ;;  %v4684_v62 = vld [vmem:[#allocation34_spill] sm:$0xff] }
 0x17e   : > { %1016 = vrot.lane.b32.xlu1 %v4659_v44, %s2595_s30  ;;  %v1575_v43 = vsel %vm1565_vm4, %v1544_v49, %v4670_v35  ;;  %v4685_v51 = vld [vmem:[#allocation46_spill] sm:$0xff] }
 0x17f   : > { %v1185_v10 = vpop.permute.xlu0 %1184 }
 0x180   : > { %v1459_v29 = vpop.permute.xlu1 %1458  ;;  %v1671_v55 = vsel %vm1662_vm7, %v1638_v61, %v1185_v10  ;;  %v4673_v61 = vld [vmem:[#allocation29_spill] sm:$0xff] }
 0x181   : > { %v1769_v20 = vsel %vm1761_vm10, %v1736_v50, %v1459_v29  ;;  %1302 = vrot.lane.b32.xlu0 %v2960_v12, %s2598_s12  ;;  %v1608_v50 = vsel %vm1596_vm5, %v1575_v43, %v4671_v8  ;;  %v4686_v8 = vld [vmem:[#allocation47_spill] sm:$0xff] }
 0x182   : > { %1390 = vrot.lane.b32.xlu1 %v4660_v25, %s2599_s15  ;;  %2497 = vmatmul.mubr.msk.f32.gmra.mxu0 %vm1794_vm11, %v1769_v20 }
 0x183   : > { %v1187_v53 = vpop.permute.xlu0 %1186 }
 0x184   : > { %v1281_v3 = vpop.permute.xlu1 %1280  ;;  %v1672_v16 = vsel %vm1662_vm7, %v1639_v30, %v1187_v53 }
 0x185   : > { %1018 = vrot.lane.b32.xlu0 %v2960_v12, %s2595_s30  ;;  %v1704_v5 = vsel %vm1695_vm8, %v1671_v55, %v1281_v3 }
 0x186   : > { %1112 = vrot.lane.b32.xlu1 %v4660_v25, %s2596_s28 }
 0x187   : > { %v1283_v37 = vpop.permute.xlu0 %1282 }
 0x188   : > { %v1371_v23 = vpop.permute.xlu1 %1370 }
 0x189   : > { %1392 = vrot.lane.b32.xlu0 %v4661_v39, %s2599_s15  ;;  %v1737_v34 = vsel %vm1728_vm9, %v1704_v5, %v1371_v23  ;;  %v4675_v5 = vld [vmem:[#allocation10_spill] sm:$0xff] }
 0x18a   : > { %1480 = vrot.lane.b32.xlu1 %v3214_v36, %s2600_s26  ;;  %v1545_v63 = vsel %vm1534_vm3, %v4675_v5, %v4674_v13 }
 0x18b   : > { %v1093_v47 = vpop.permute.xlu0 %1092 }
 0x18c   : > { %v1373_v60 = vpop.permute.xlu1 %1372  ;;  %v1640_v11 = vsel %vm1629_vm6, %v1607_v57, %v1093_v47 }
 0x18d   : > { %1114 = vrot.lane.b32.xlu0 %v4661_v39, %s2596_s28 }
 0x18e   : > { %1208 = vrot.lane.b32.xlu1 %v3214_v36, %s2597_s7  ;;  %v1705_v36 = vsel %vm1695_vm8, %v1672_v16, %v1283_v37 }
 0x18f   : > { %v1461_v38 = vpop.permute.xlu0 %1460  ;;  %v1738_v17 = vsel %vm1728_vm9, %v1705_v36, %v1373_v60 }
 0x190   : > { %v1095_v24 = vpop.permute.xlu1 %1094  ;;  %v1770_v58 = vsel %vm1761_vm10, %v1737_v34, %v1461_v38  ;;  %v4676_v34 = vld [vmem:[#allocation32_spill] sm:$0xff]  ;;  %v4677_v38 = vld [vmem:[#allocation33_spill] sm:$0xff] }
 0x191   : > { %1482 = vrot.lane.b32.xlu0 %v3217_v32, %s2600_s26  ;;  %2499 = vmatprep.mubr.msk.f32.mxu0 %vm1794_vm11, %v1770_v58  ;;  %v1641_v25 = vsel %vm1629_vm6, %v1608_v50, %v1095_v24  ;;  %v4678_v24 = vld [vmem:[#allocation73_spill] sm:$0xff] }
 0x192   : > { %1210 = vrot.lane.b32.xlu1 %v3217_v32, %s2597_s7  ;;  %v1576_v30 = vsel %vm1565_vm4, %v1545_v63, %v4678_v24  ;;  %v4679_v58 = vld [vmem:[#allocation89_spill] sm:$0xff]  ;;  %v4694_v24 = vld [vmem:[#allocation56_spill] sm:$0xff] }
 0x193   : > { %v1189_v56 = vpop.permute.xlu0 %1188  ;;  %v1609_v16 = vsel %vm1596_vm5, %v1576_v30, %v4679_v58  ;;  %v4695_v30 = vld [vmem:[#allocation13_spill] sm:$0xff] }
 0x194   : > { %v1463_v45 = vpop.permute.xlu1 %1462  ;;  %v1673_v1 = vsel %vm1662_vm7, %v1640_v11, %v1189_v56  ;;  %v1548_v58 = vsel %vm1534_vm3, %v4695_v30, %v4694_v24  ;;  %v4709_v30 = vld [vmem:[#allocation78_spill] sm:$0xff] }
 0x195   : > { %v1771_v6 = vsel %vm1761_vm10, %v1738_v17, %v1463_v45  ;;  %1304 = vrot.lane.b32.xlu0 %v4662_v46, %s2598_s12  ;;  %v4680_v45 = vld [vmem:[#allocation54_spill] sm:$0xff] }
 0x196   : > { %1020 = vrot.lane.b32.xlu1 %v4662_v46, %s2595_s30  ;;  %2500 = vmatmul.mubr.msk.f32.gmra.mxu0 %vm1794_vm11, %v1771_v6  ;;  %v4681_v6 = vld [vmem:[#allocation9_spill] sm:$0xff] }
 0x197   : > { %v1191_v14 = vpop.permute.xlu0 %1190 }
 0x198   : > { %v1285_v32 = vpop.permute.xlu1 %1284  ;;  %v1674_v3 = vsel %vm1662_vm7, %v1641_v25, %v1191_v14  ;;  %v1546_v14 = vsel %vm1534_vm3, %v4681_v6, %v4680_v45 }
 0x199   : > { %1306 = vrot.lane.b32.xlu0 %v2986_v21, %s2598_s12  ;;  %v1706_v59 = vsel %vm1695_vm8, %v1673_v1, %v1285_v32 }
 0x19a   : > { %1394 = vrot.lane.b32.xlu1 %v4663_v41, %s2599_s15 }
 0x19b   : > { %v1287_v42 = vpop.permute.xlu0 %1286 }
 0x19c   : > { %v1375_v15 = vpop.permute.xlu1 %1374  ;;  %v1707_v37 = vsel %vm1695_vm8, %v1674_v3, %v1287_v42  ;;  %v4690_v3 = vld [vmem:[#allocation75_spill] sm:$0xff] }
 0x19d   : > { %1022 = vrot.lane.b32.xlu0 %v2986_v21, %s2595_s30  ;;  %v1739_v10 = vsel %vm1728_vm9, %v1706_v59, %v1375_v15 }
 0x19e   : > { %1116 = vrot.lane.b32.xlu1 %v4663_v41, %s2596_s28  ;;  %v4682_v41 = vld [vmem:[#allocation74_spill] sm:$0xff] }
 0x19f   : > { %v1097_v27 = vpop.permute.xlu0 %1096  ;;  %v1577_v42 = vsel %vm1565_vm4, %v1546_v14, %v4682_v41  ;;  %v4698_v41 = vld [vmem:[#allocation38_spill] sm:$0xff] }
 0x1a0   : > { %v1377_v54 = vpop.permute.xlu1 %1376  ;;  %v1642_v56 = vsel %vm1629_vm6, %v1609_v16, %v1097_v27  ;;  %v1610_v7 = vsel %vm1596_vm5, %v1577_v42, %v4683_v33  ;;  %v4696_v16 = vld [vmem:[#allocation76_spill] sm:$0xff] }
 0x1a1   : > { %1396 = vrot.lane.b32.xlu0 %v4668_v0, %s2599_s15  ;;  %v1740_v23 = vsel %vm1728_vm9, %v1707_v37, %v1377_v54  ;;  %v4699_v42 = vld [vmem:[#allocation48_spill] sm:$0xff] }
 0x1a2   : > { %1484 = vrot.lane.b32.xlu1 %v4669_v2, %s2600_s26 }
 0x1a3   : > { %v1465_v29 = vpop.permute.xlu0 %1464 }
 0x1a4   : > { %v1099_v20 = vpop.permute.xlu1 %1098  ;;  %v1772_v53 = vsel %vm1761_vm10, %v1739_v10, %v1465_v29  ;;  %v4687_v29 = vld [vmem:[#allocation55_spill] sm:$0xff] }
 0x1a5   : > { %1118 = vrot.lane.b32.xlu0 %v4668_v0, %s2596_s28  ;;  %2502 = vmatprep.mubr.msk.f32.mxu0 %vm1794_vm11, %v1772_v53  ;;  %v1643_v27 = vsel %vm1629_vm6, %v1610_v7, %v1099_v20  ;;  %v4688_v20 = vld [vmem:[#allocation14_spill] sm:$0xff]  ;;  %v4689_v53 = vld [vmem:[#allocation36_spill] sm:$0xff] }
 0x1a6   : > { %1212 = vrot.lane.b32.xlu1 %v4669_v2, %s2597_s7  ;;  %v1547_v25 = vsel %vm1534_vm3, %v4688_v20, %v4687_v29  ;;  %v2583_v29 = vld [vmem:[%s4442_s1] ss:$0 sm:$0xff] }
 0x1a7   : > { %v1193_v31 = vpop.permute.xlu0 %1192  ;;  %v1578_v37 = vsel %vm1565_vm4, %v1547_v25, %v4690_v3 }
 0x1a8   : > { %v1467_v39 = vpop.permute.xlu1 %1466  ;;  %v1675_v32 = vsel %vm1662_vm7, %v1642_v56, %v1193_v31 }
 0x1a9   : > { %v1773_v40 = vsel %vm1761_vm10, %v1740_v23, %v1467_v39  ;;  %1486 = vrot.lane.b32.xlu0 %v4672_v52, %s2600_s26  ;;  %v4691_v23 = vld [vmem:[#allocation91_spill] sm:$0xff] }
 0x1aa   : > { %1214 = vrot.lane.b32.xlu1 %v4672_v52, %s2597_s7  ;;  %2503 = vmatmul.mubr.msk.f32.gmra.mxu0 %vm1794_vm11, %v1773_v40  ;;  %v1611_v31 = vsel %vm1596_vm5, %v1578_v37, %v4691_v23  ;;  %v4705_v37 = vld [vmem:[#allocation40_spill] sm:$0xff]  ;;  %v4706_v23 = vld [vmem:[#allocation41_spill] sm:$0xff] }
 0x1ab   : > { %v1195_v47 = vpop.permute.xlu0 %1194 }
 0x1ac   : > { %v1289_v60 = vpop.permute.xlu1 %1288  ;;  %v1676_v11 = vsel %vm1662_vm7, %v1643_v27, %v1195_v47 }
 0x1ad   : > { %1308 = vrot.lane.b32.xlu0 %v4673_v61, %s2598_s12  ;;  %v1708_v15 = vsel %vm1695_vm8, %v1675_v32, %v1289_v60  ;;  %v4692_v60 = vld [vmem:[#allocation35_spill] sm:$0xff] }
 0x1ae   : > { %1024 = vrot.lane.b32.xlu1 %v4673_v61, %s2595_s30 }
 0x1af   : > { %v1291_v19 = vpop.permute.xlu0 %1290 }
 0x1b0   : > { %v1379_v55 = vpop.permute.xlu1 %1378  ;;  %v1709_v49 = vsel %vm1695_vm8, %v1676_v11, %v1291_v19  ;;  %v4693_v19 = vld [vmem:[#allocation37_spill] sm:$0xff] }
 0x1b1   : > { %1310 = vrot.lane.b32.xlu0 %v4676_v34, %s2598_s12  ;;  %v1741_v48 = vsel %vm1728_vm9, %v1708_v15, %v1379_v55 }
 0x1b2   : > { %1398 = vrot.lane.b32.xlu1 %v4677_v38, %s2599_s15 }
 0x1b3   : > { %v1101_v36 = vpop.permute.xlu0 %1100 }
 0x1b4   : > { %v1381_v17 = vpop.permute.xlu1 %1380  ;;  %v1644_v52 = vsel %vm1629_vm6, %v1611_v31, %v1101_v36  ;;  %v1579_v36 = vsel %vm1565_vm4, %v1548_v58, %v4696_v16 }
 0x1b5   : > { %1026 = vrot.lane.b32.xlu0 %v4676_v34, %s2595_s30  ;;  %v1742_v1 = vsel %vm1728_vm9, %v1709_v49, %v1381_v17  ;;  %v4697_v17 = vld [vmem:[#allocation92_spill] sm:$0xff]  ;;  %v267_v49 = vld [vmem:[%s2652_s25 + $0xf8] sm:$0xff] }
 0x1b6   : > { %1120 = vrot.lane.b32.xlu1 %v4677_v38, %s2596_s28  ;;  %v1612_v56 = vsel %vm1596_vm5, %v1579_v36, %v4697_v17  ;;  %v306_v20 = vmul.f32 %v2583_v29, %v267_v49  ;;  %v4712_v49 = vld [vmem:[#allocation51_spill] sm:$0xff] }
 0x1b7   : > { %v1469_v18 = vpop.permute.xlu0 %1468 }
 0x1b8   : > { %v1103_v57 = vpop.permute.xlu1 %1102  ;;  %v1774_v54 = vsel %vm1761_vm10, %v1741_v48, %v1469_v18 }
 0x1b9   : > { %1400 = vrot.lane.b32.xlu0 %v4684_v62, %s2599_s15  ;;  %2505 = vmatprep.mubr.msk.f32.mxu0 %vm1794_vm11, %v1774_v54  ;;  %v1645_v14 = vsel %vm1629_vm6, %v1612_v56, %v1103_v57  ;;  %v4700_v54 = vld [vmem:[#allocation49_spill] sm:$0xff] }
 0x1ba   : > { %1488 = vrot.lane.b32.xlu1 %v4685_v51, %s2600_s26 }
 0x1bb   : > { %v1197_v0 = vpop.permute.xlu0 %1196 }
 0x1bc   : > { %v1471_v2 = vpop.permute.xlu1 %1470  ;;  %v1677_v47 = vsel %vm1662_vm7, %v1644_v52, %v1197_v0 }
 0x1bd   : > { %v1775_v35 = vsel %vm1761_vm10, %v1742_v1, %v1471_v2  ;;  %1122 = vrot.lane.b32.xlu0 %v4684_v62, %s2596_s28  ;;  %v4701_v1 = vld [vmem:[#allocation57_spill] sm:$0xff]  ;;  %v4702_v2 = vld [vmem:[#allocation39_spill] sm:$0xff] }
 0x1be   : > { %1216 = vrot.lane.b32.xlu1 %v4685_v51, %s2597_s7  ;;  %2506 = vmatmul.mubr.msk.f32.gmra.mxu0 %vm1794_vm11, %v1775_v35  ;;  %v266_v51 = vld [vmem:[%s2652_s25 + $0xf0] sm:$0xff]  ;;  %v1549_v0 = vsel %vm1534_vm3, %v2870_v22, %v4701_v1  ;;  %v4703_v35 = vld [vmem:[#allocation77_spill] sm:$0xff] }
 0x1bf   : > { %v1199_v43 = vpop.permute.xlu0 %1198  ;;  %v305_v22 = vmul.f32 %v2583_v29, %v266_v51 }
 0x1c0   : > { %v1293_v59 = vpop.permute.xlu1 %1292  ;;  %v1678_v32 = vsel %vm1662_vm7, %v1645_v14, %v1199_v43  ;;  %v1580_v43 = vsel %vm1565_vm4, %v1549_v0, %v4703_v35 }
 0x1c1   : > { %1490 = vrot.lane.b32.xlu0 %v4686_v8, %s2600_s26  ;;  %v1710_v55 = vsel %vm1695_vm8, %v1677_v47, %v1293_v59  ;;  %v4704_v59 = vld [vmem:[#allocation15_spill] sm:$0xff] }
 0x1c2   : > { %1218 = vrot.lane.b32.xlu1 %v4686_v8, %s2597_s7  ;;  %v1613_v8 = vsel %vm1596_vm5, %v1580_v43, %v4704_v59 }
 0x1c3   : > { %v1295_v50 = vpop.permute.xlu0 %1294 }
 0x1c4   : > { %v1383_v10 = vpop.permute.xlu1 %1382  ;;  %v1711_v15 = vsel %vm1695_vm8, %v1678_v32, %v1295_v50 }
 0x1c5   : > { %1312 = vrot.lane.b32.xlu0 %v4689_v53, %s2598_s12  ;;  %v1743_v13 = vsel %vm1728_vm9, %v1710_v55, %v1383_v10  ;;  %v2584_v55 = vld [vmem:[%s4443_s2] ss:$0 sm:$0xff] }
 0x1c6   : > { %1028 = vrot.lane.b32.xlu1 %v4689_v53, %s2595_s30 }
 0x1c7   : > { %v3964_v39 = vpop.permute.xlu0 %1010 }
 0x1c8   : > { %v1105_v40 = vpop.permute.xlu1 %1104 }
 0x1c9   : > { %1314 = vrot.lane.b32.xlu0 %v4692_v60, %s2598_s12  ;;  %v1646_v25 = vsel %vm1629_vm6, %v1613_v8, %v1105_v40  ;;  %v345_v40 = vadd.f32 %v2584_v55, %v306_v20  ;;  %v4713_v8 = vld [vmem:[#allocation59_spill] sm:$0xff] }
 0x1ca   : > { %1402 = vrot.lane.b32.xlu1 %v4693_v19, %s2599_s15  ;;  %v1551_v29 = vsel %vm1534_vm3, %v2895_v4, %v4713_v8  ;;  %v4717_v8 = vld [vmem:[#allocation61_spill] sm:$0xff] }
 0x1cb   : > { %v1385_v5 = vpop.permute.xlu0 %1384 }
 0x1cc   : > { %v1473_v63 = vpop.permute.xlu1 %1472  ;;  %v1744_v33 = vsel %vm1728_vm9, %v1711_v15, %v1385_v5 }
 0x1cd   : > { %v1776_v38 = vsel %vm1761_vm10, %v1743_v13, %v1473_v63  ;;  %1030 = vrot.lane.b32.xlu0 %v4692_v60, %s2595_s30  ;;  %v344_v13 = vadd.f32 %v2584_v55, %v305_v22  ;;  %v4707_v63 = vld [vmem:[#allocation58_spill] sm:$0xff]  ;;  %v4714_v22 = vld [vmem:[#allocation4_spill] sm:$0xff] }
 0x1ce   : > { %1124 = vrot.lane.b32.xlu1 %v4693_v19, %s2596_s28  ;;  %2508 = vmatprep.mubr.msk.f32.mxu0 %vm1794_vm11, %v1776_v38  ;;  %v4708_v38 = vld [vmem:[#allocation17_spill] sm:$0xff]  ;;  %v1582_v20 = vsel %vm1565_vm4, %v1551_v29, %v4714_v22  ;;  %v1553_v29 = vsel %vm1534_vm3, %v4656_v26, %v4717_v8 }
 0x1cf   : > { %v1107_v45 = vpop.permute.xlu0 %1106  ;;  %v1550_v24 = vsel %vm1534_vm3, %v4708_v38, %v4707_v63  ;;  %v376_v56 = vmax.f32 %v344_v13, 0.0  ;;  %v4718_v22 = vld [vmem:[#allocation5_spill] sm:$0xff] }
 0x1d0   : > { %v1201_v6 = vpop.permute.xlu1 %1200  ;;  %v1581_v58 = vsel %vm1565_vm4, %v1550_v24, %v4709_v30  ;;  %v4715_v24 = vld [vmem:[#allocation60_spill] sm:$0xff]  ;;  %v4716_v30 = vld [vmem:[#allocation79_spill] sm:$0xff] }
 0x1d1   : > { %1404 = vrot.lane.b32.xlu0 %v4698_v41, %s2599_s15  ;;  %v1679_v3 = vsel %vm1662_vm7, %v1646_v25, %v1201_v6  ;;  %v1614_v16 = vsel %vm1596_vm5, %v1581_v58, %v3964_v39  ;;  %v377_v6 = vmax.f32 %v345_v40, 0.0 }
 0x1d2   : > { %1492 = vrot.lane.b32.xlu1 %v4699_v42, %s2600_s26  ;;  %v1647_v14 = vsel %vm1629_vm6, %v1614_v16, %v1107_v45 }
 0x1d3   : > { %v1475_v7 = vpop.permute.xlu0 %1474  ;;  %v553_v59 = vrot.slane %v377_v6, 5 }
 0x1d4   : > { %v1203_v48 = vpop.permute.xlu1 %1202  ;;  %v1777_v18 = vsel %vm1761_vm10, %v1744_v33, %v1475_v7 }
 0x1d5   : > { %1126 = vrot.lane.b32.xlu0 %v4698_v41, %s2596_s28  ;;  %2509 = vmatmul.mubr.msk.f32.gmra.mxu0 %vm1794_vm11, %v1777_v18  ;;  %v1680_v32 = vsel %vm1662_vm7, %v1647_v14, %v1203_v48  ;;  %v4710_v41 = vld [vmem:[#allocation42_spill] sm:$0xff]  ;;  %v409_v18 = vrot.slane %v376_v56, 1 }
 0x1d6   : > { %1220 = vrot.lane.b32.xlu1 %v4699_v42, %s2597_s7  ;;  %v4711_v42 = vld [vmem:[#allocation50_spill] sm:$0xff] }
 0x1d7   : > { %v1297_v57 = vpop.permute.xlu0 %1296 }
 0x1d8   : > { %v4001_v27 = vpop.permute.xlu1 %1012  ;;  %v1712_v31 = vsel %vm1695_vm8, %v1679_v3, %v1297_v57  ;;  %v488_v57 = vrot.slane %v376_v56, 7 }
 0x1d9   : > { %1494 = vrot.lane.b32.xlu0 %v4700_v54, %s2600_s26  ;;  %v1615_v3 = vsel %vm1596_vm5, %v1582_v20, %v4001_v27  ;;  %v1584_v20 = vsel %vm1565_vm4, %v1553_v29, %v4718_v22 }
 0x1da   : > { %1222 = vrot.lane.b32.xlu1 %v4700_v54, %s2597_s7  ;;  %v489_v54 = vrot.slane %v377_v6, 7 }
 0x1db   : > { %v1299_v11 = vpop.permute.xlu0 %1298 }
 0x1dc   : > { %v1387_v62 = vpop.permute.xlu1 %1386  ;;  %v1713_v15 = vsel %vm1695_vm8, %v1680_v32, %v1299_v11  ;;  %v585_v11 = vsel %vm442_vm0, %v409_v18, %v488_v57  ;;  %v490_v51 = vsel %vm442_vm0, %v488_v57, %v489_v54 }
 0x1dd   : > { %1316 = vrot.lane.b32.xlu0 %v4702_v2, %s2598_s12  ;;  %v1745_v52 = vsel %vm1728_vm9, %v1712_v31, %v1387_v62  ;;  %v786_v1 = vrot.slane %v585_v11, 1  ;;  %v787_v0 = vrot.slane %v490_v51, 1  ;;  %v791_v55 = vrot.slane %v585_v11, 2 }
 0x1de   : > { %1032 = vrot.lane.b32.xlu1 %v4702_v2, %s2595_s30  ;;  %v792_v13 = vrot.slane %v490_v51, 2 }
 0x1df   : > { %v4020_v50 = vpop.permute.xlu0 %1014  ;;  %v788_v25 = vsel %vm632_vm1, %v786_v1, %v787_v0 }
 0x1e0   : > { %v1109_v10 = vpop.permute.xlu1 %1108 }
 0x1e1   : > { %1318 = vrot.lane.b32.xlu0 %v4705_v37, %s2598_s12  ;;  %v1648_v4 = vsel %vm1629_vm6, %v1615_v3, %v1109_v10  ;;  %v1552_v10 = vsel %vm1534_vm3, %v2903_v9, %v4715_v24 }
 0x1e2   : > { %1406 = vrot.lane.b32.xlu1 %v4706_v23, %s2599_s15  ;;  %v1583_v58 = vsel %vm1565_vm4, %v1552_v10, %v4716_v30 }
 0x1e3   : > { %v1389_v47 = vpop.permute.xlu0 %1388  ;;  %v1616_v56 = vsel %vm1596_vm5, %v1583_v58, %v4020_v50 }
 0x1e4   : > { %v1477_v19 = vpop.permute.xlu1 %1476  ;;  %v1746_v33 = vsel %vm1728_vm9, %v1713_v15, %v1389_v47 }
 0x1e5   : > { %v1778_v5 = vsel %vm1761_vm10, %v1745_v52, %v1477_v19  ;;  %1034 = vrot.lane.b32.xlu0 %v4705_v37, %s2595_s30  ;;  %v601_v52 = vsel %vm442_vm0, %v489_v54, %v553_v59 }
 0x1e6   : > { %1128 = vrot.lane.b32.xlu1 %v4706_v23, %s2596_s28  ;;  %2511 = vmatprep.mubr.msk.f32.mxu1 %vm1794_vm11, %v1778_v5  ;;  %v789_v40 = vrot.slane %v601_v52, 1 }
 0x1e7   : > { %v1111_v36 = vpop.permute.xlu0 %1110 }
 0x1e8   : > { %v1205_v17 = vpop.permute.xlu1 %1204  ;;  %v790_v16 = vsel %vm632_vm1, %v787_v0, %v789_v40  ;;  %v1649_v9 = vsel %vm1629_vm6, %v1616_v56, %v1111_v36 }
 0x1e9   : > { %1408 = vrot.lane.b32.xlu0 %v4710_v41, %s2599_s15  ;;  %v1681_v47 = vsel %vm1662_vm7, %v1648_v4, %v1205_v17  ;;  %v793_v17 = vsel %vm708_vm2, %v791_v55, %v792_v13 }
 0x1ea   : > { %1496 = vrot.lane.b32.xlu1 %v4711_v42, %s2600_s26 }
 0x1eb   : > { %v1479_v7 = vpop.permute.xlu0 %1478 }
 0x1ec   : > { %v1207_v39 = vpop.permute.xlu1 %1206  ;;  %v1779_v62 = vsel %vm1761_vm10, %v1746_v33, %v1479_v7 }
 0x1ed   : > { %1130 = vrot.lane.b32.xlu0 %v4710_v41, %s2596_s28  ;;  %2512 = vmatmul.mubr.msk.f32.vlgmr.msra.gmra.mxu1 %vm1794_vm11, %v1779_v62  ;;  %v1682_v32 = vsel %vm1662_vm7, %v1649_v9, %v1207_v39 }
 0x1ee   : > { %1224 = vrot.lane.b32.xlu1 %v4711_v42, %s2597_s7  ;;  %v794_v42 = vrot.slane %v601_v52, 2 }
 0x1ef   : > { %v1301_v45 = vpop.permute.xlu0 %1300 }
 0x1f0   : > { %v4063_v48 = vpop.permute.xlu1 %1016  ;;  %v1714_v19 = vsel %vm1695_vm8, %v1681_v47, %v1301_v45  ;;  %v795_v36 = vsel %vm708_vm2, %v792_v13, %v794_v42 }
 0x1f1   : > { %1498 = vrot.lane.b32.xlu0 %v4712_v49, %s2600_s26 }
 0x1f2   : > { %1226 = vrot.lane.b32.xlu1 %v4712_v49, %s2597_s7 }
 0x1f3   : > { %v1303_v35 = vpop.permute.xlu0 %1302 }
 0x1f4   : > { %v1391_v43 = vpop.permute.xlu1 %1390  ;;  %v1715_v41 = vsel %vm1695_vm8, %v1682_v32, %v1303_v35 }
 0x1f5   : > { %1320 = vrot.lane.b32.xlu0 %v585_v11, %s2598_s12  ;;  %v1747_v27 = vsel %vm1728_vm9, %v1714_v19, %v1391_v43 }
 0x1f6   : > { %1036 = vrot.lane.b32.xlu1 %v585_v11, %s2595_s30 }
 0x1f7   : > { %v4081_v23 = vpop.permute.xlu0 %1018 }
 0x1f8   : > { %v4083_v31 = vpop.permute.xlu1 %1112 }
 0x1f9   : > { %1322 = vrot.lane.b32.xlu0 %v490_v51, %s2598_s12 }
 0x1fa   : > { %1410 = vrot.lane.b32.xlu1 %v788_v25, %s2599_s15 }
 0x1fb   : > { %v1393_v5 = vpop.permute.xlu0 %1392 }
 0x1fc   : > { %v1481_v63 = vpop.permute.xlu1 %1480  ;;  %v1748_v15 = vsel %vm1728_vm9, %v1715_v41, %v1393_v5  ;;  %v4720_v5 = vld [vmem:[#allocation80_spill] sm:$0xff] }
 0x1fd   : > { %v1780_v38 = vsel %vm1761_vm10, %v1747_v27, %v1481_v63  ;;  %1038 = vrot.lane.b32.xlu0 %v490_v51, %s2595_s30  ;;  %v4719_v27 = vld [vmem:[#allocation62_spill] sm:$0xff] }
 0x1fe   : > { %1132 = vrot.lane.b32.xlu1 %v788_v25, %s2596_s28  ;;  %2514 = vmatprep.mubr.msk.f32.mxu1 %vm1794_vm11, %v1780_v38  ;;  %v1617_v25 = vsel %vm1596_vm5, %v1584_v20, %v4063_v48  ;;  %v1554_v48 = vsel %vm1534_vm3, %v2931_v28, %v4719_v27 }
 0x1ff   : > { %v1115_v6 = vpop.permute.xlu0 %1114  ;;  %v1650_v4 = vsel %vm1629_vm6, %v1617_v25, %v4083_v31  ;;  %v1585_v31 = vsel %vm1565_vm4, %v1554_v48, %v4720_v5  ;;  %v4723_v25 = vld [vmem:[#allocation64_spill] sm:$0xff] }
 0x200   : > { %v1209_v14 = vpop.permute.xlu1 %1208  ;;  %v1618_v63 = vsel %vm1596_vm5, %v1585_v31, %v4081_v23 }
 0x201   : > { %1412 = vrot.lane.b32.xlu0 %v790_v16, %s2599_s15  ;;  %v1683_v47 = vsel %vm1662_vm7, %v1650_v4, %v1209_v14  ;;  %v1651_v10 = vsel %vm1629_vm6, %v1618_v63, %v1115_v6  ;;  %v4724_v4 = vld [vmem:[#allocation82_spill] sm:$0xff] }
 0x202   : > { %1500 = vrot.lane.b32.xlu1 %v793_v17, %s2600_s26 }
 0x203   : > { %v1483_v33 = vpop.permute.xlu0 %1482 }
 0x204   : > { %v1211_v7 = vpop.permute.xlu1 %1210  ;;  %v1781_v18 = vsel %vm1761_vm10, %v1748_v15, %v1483_v33 }
 0x205   : > { %1134 = vrot.lane.b32.xlu0 %v790_v16, %s2596_s28  ;;  %2515 = vmatmul.mubr.msk.f32.gmra.mxu1 %vm1794_vm11, %v1781_v18  ;;  %v1684_v30 = vsel %vm1662_vm7, %v1651_v10, %v1211_v7 }
 0x206   : > { %1228 = vrot.lane.b32.xlu1 %v793_v17, %s2597_s7  ;;  %v2489_v50 = vpop.f32.mrf.mxu0 }
 0x207   : > { %2069 = vst.msk [vmem:[%s4117_s9 + $0x8] sm:$0xff] %vm1534_vm3, %v2489_v50  ;;  %v2170_v39 = vmul.f32 %v2489_v50, %v2489_v50  ;;  %v1305_v57 = vpop.permute.xlu0 %1304  ;;  %v2101_v45 = vsel %vm1534_vm3, %v2489_v50, 0.0 }
 0x208   : > { %v1021_v54 = vpop.permute.xlu1 %1020  ;;  %v1909_v62 = vpop.f32.mrf.mxu0  ;;  %v1716_v19 = vsel %vm1695_vm8, %v1683_v47, %v1305_v57 }
 0x209   : > { %2068 = vst.msk [vmem:[%s4117_s9] sm:$0xff] %vm1534_vm3, %v1909_v62  ;;  %v2100_v11 = vsel %vm1534_vm3, %v1909_v62, 0.0  ;;  %v2169_v51 = vmul.f32 %v1909_v62, %v1909_v62  ;;  %1502 = vrot.lane.b32.xlu0 %v795_v36, %s2600_s26  ;;  %v2202_v1 = vsel %vm1534_vm3, %v2170_v39, 0.0 }
 0x20a   : > { %1230 = vrot.lane.b32.xlu1 %v795_v36, %s2597_s7  ;;  %v2102_v49 = vadd.f32 %v2101_v45, %v2100_v11  ;;  %v4721_v45 = vld [vmem:[#allocation63_spill] sm:$0xff] }
 0x20b   : > { %v2201_v0 = vsel %vm1534_vm3, %v2169_v51, 0.0  ;;  %v1307_v35 = vpop.permute.xlu0 %1306  ;;  %v1555_v11 = vsel %vm1534_vm3, %v4659_v44, %v4721_v45  ;;  %v4722_v51 = vld [vmem:[#allocation81_spill] sm:$0xff] }
 0x20c   : > { %v1395_v43 = vpop.permute.xlu1 %1394  ;;  %v2203_v59 = vadd.f32 %v2202_v1, %v2201_v0  ;;  %v1717_v58 = vsel %vm1695_vm8, %v1684_v30, %v1307_v35 }
 0x20d   : > { %v1749_v55 = vsel %vm1728_vm9, %v1716_v19, %v1395_v43 }
 0x20f   : > { %v1023_v3 = vpop.permute.xlu0 %1022 }
 0x210   : > { %v1117_v52 = vpop.permute.xlu1 %1116 }
 0x213   : > { %v1397_v13 = vpop.permute.xlu0 %1396 }
 0x214   : > { %v1485_v26 = vpop.permute.xlu1 %1484  ;;  %v1750_v28 = vsel %vm1728_vm9, %v1717_v58, %v1397_v13 }
 0x215   : > { %v1782_v40 = vsel %vm1761_vm10, %v1749_v55, %v1485_v26 }
 0x216   : > { %2517 = vmatprep.mubr.msk.f32.mxu1 %vm1794_vm11, %v1782_v40 }
 0x217   : > { %v1119_v38 = vpop.permute.xlu0 %1118 }
 0x218   : > { %v1213_v24 = vpop.permute.xlu1 %1212 }
 0x21a   : > { %v2492_v16 = vpop.f32.mrf.mxu0 }
 0x21b   : > { %2071 = vst.msk [vmem:[%s4117_s9 + $0x18] sm:$0xff] %vm1534_vm3, %v2492_v16  ;;  %v1487_v17 = vpop.permute.xlu0 %1486  ;;  %v2172_v32 = vmul.f32 %v2492_v16, %v2492_v16  ;;  %v2105_v42 = vsel %vm1534_vm3, %v2492_v16, 0.0 }
 0x21c   : > { %v1215_v56 = vpop.permute.xlu1 %1214  ;;  %v1783_v14 = vsel %vm1761_vm10, %v1750_v28, %v1487_v17  ;;  %v1919_v9 = vpop.f32.mrf.mxu0 }
 0x21d   : > { %2070 = vst.msk [vmem:[%s4117_s9 + $0x10] sm:$0xff] %vm1534_vm3, %v1919_v9  ;;  %v2103_v23 = vsel %vm1534_vm3, %v1919_v9, 0.0  ;;  %v2171_v6 = vmul.f32 %v1919_v9, %v1919_v9  ;;  %2518 = vmatmul.mubr.msk.f32.gmra.mxu1 %vm1794_vm11, %v1783_v14  ;;  %v2206_v36 = vsel %vm1534_vm3, %v2172_v32, 0.0 }
 0x21e   : > { %v2104_v41 = vadd.f32 %v2103_v23, %v2102_v49  ;;  %v1586_v49 = vsel %vm1565_vm4, %v1555_v11, %v4722_v51 }
 0x21f   : > { %v2204_v15 = vsel %vm1534_vm3, %v2171_v6, 0.0  ;;  %v1309_v33 = vpop.permute.xlu0 %1308  ;;  %v1619_v1 = vsel %vm1596_vm5, %v1586_v49, %v1021_v54  ;;  %v1556_v54 = vsel %vm1534_vm3, %v2960_v12, %v4723_v25  ;;  %v4725_v6 = vld [vmem:[#allocation65_spill] sm:$0xff] }
 0x220   : > { %v1025_v7 = vpop.permute.xlu1 %1024  ;;  %v2205_v18 = vadd.f32 %v2204_v15, %v2203_v59  ;;  %v2106_v50 = vadd.f32 %v2105_v42, %v2104_v41  ;;  %v1652_v43 = vsel %vm1629_vm6, %v1619_v1, %v1117_v52  ;;  %v1587_v52 = vsel %vm1565_vm4, %v1556_v54, %v4724_v4  ;;  %v4726_v42 = vld [vmem:[#allocation83_spill] sm:$0xff] }
 0x221   : > { %v1685_v59 = vsel %vm1662_vm7, %v1652_v43, %v1213_v24  ;;  %v1620_v19 = vsel %vm1596_vm5, %v1587_v52, %v1023_v3  ;;  %v1557_v41 = vsel %vm1534_vm3, %v4662_v46, %v4725_v6 }
 0x222   : > { %v2207_v39 = vadd.f32 %v2206_v36, %v2205_v18  ;;  %v1718_v8 = vsel %vm1695_vm8, %v1685_v59, %v1309_v33  ;;  %v1653_v26 = vsel %vm1629_vm6, %v1620_v19, %v1119_v38  ;;  %v1588_v15 = vsel %vm1565_vm4, %v1557_v41, %v4726_v42 }
 0x223   : > { %v1311_v57 = vpop.permute.xlu0 %1310  ;;  %v1686_v27 = vsel %vm1662_vm7, %v1653_v26, %v1215_v56  ;;  %v1621_v33 = vsel %vm1596_vm5, %v1588_v15, %v1025_v7  ;;  %v4727_v7 = vld [vmem:[#allocation66_spill] sm:$0xff] }
 0x224   : > { %v1399_v62 = vpop.permute.xlu1 %1398  ;;  %v1719_v31 = vsel %vm1695_vm8, %v1686_v27, %v1311_v57  ;;  %v1558_v1 = vsel %vm1534_vm3, %v2986_v21, %v4727_v7 }
 0x225   : > { %v1751_v29 = vsel %vm1728_vm9, %v1718_v8, %v1399_v62  ;;  %v4728_v8 = vld [vmem:[#allocation84_spill] sm:$0xff] }
 0x227   : > { %v4174_v0 = vpop.permute.xlu0 %1026 }
 0x228   : > { %v1121_v35 = vpop.permute.xlu1 %1120 }
 0x229   : > { %v1654_v36 = vsel %vm1629_vm6, %v1621_v33, %v1121_v35 }
 0x22b   : > { %v1401_v22 = vpop.permute.xlu0 %1400 }
 0x22c   : > { %v1489_v44 = vpop.permute.xlu1 %1488  ;;  %v1752_v3 = vsel %vm1728_vm9, %v1719_v31, %v1401_v22 }
 0x22d   : > { %v1784_v20 = vsel %vm1761_vm10, %v1751_v29, %v1489_v44  ;;  %v1589_v29 = vsel %vm1565_vm4, %v1558_v1, %v4728_v8 }
 0x22e   : > { %2520 = vmatprep.mubr.msk.f32.mxu1 %vm1794_vm11, %v1784_v20  ;;  %v2495_v47 = vpop.f32.mrf.mxu0  ;;  %v1622_v44 = vsel %vm1596_vm5, %v1589_v29, %v4174_v0 }
 0x22f   : > { %2073 = vst.msk [vmem:[%s4117_s9 + $0x28] sm:$0xff] %vm1534_vm3, %v2495_v47  ;;  %v1123_v55 = vpop.permute.xlu0 %1122  ;;  %v2174_v48 = vmul.f32 %v2495_v47, %v2495_v47  ;;  %v2109_v24 = vsel %vm1534_vm3, %v2495_v47, 0.0 }
 0x230   : > { %v1217_v13 = vpop.permute.xlu1 %1216  ;;  %v1929_v40 = vpop.f32.mrf.mxu0  ;;  %v1655_v4 = vsel %vm1629_vm6, %v1622_v44, %v1123_v55 }
 0x231   : > { %2072 = vst.msk [vmem:[%s4117_s9 + $0x20] sm:$0xff] %vm1534_vm3, %v1929_v40  ;;  %v2107_v12 = vsel %vm1534_vm3, %v1929_v40, 0.0  ;;  %v2173_v5 = vmul.f32 %v1929_v40, %v1929_v40  ;;  %v2210_v17 = vsel %vm1534_vm3, %v2174_v48, 0.0 }
 0x232   : > { %v2108_v63 = vadd.f32 %v2107_v12, %v2106_v50 }
 0x233   : > { %v2208_v10 = vsel %vm1534_vm3, %v2173_v5, 0.0  ;;  %v1491_v30 = vpop.permute.xlu0 %1490 }
 0x234   : > { %v1219_v38 = vpop.permute.xlu1 %1218  ;;  %v2209_v58 = vadd.f32 %v2208_v10, %v2207_v39  ;;  %v1785_v16 = vsel %vm1761_vm10, %v1752_v3, %v1491_v30  ;;  %v2110_v28 = vadd.f32 %v2109_v24, %v2108_v63  ;;  %v1687_v39 = vsel %vm1662_vm7, %v1654_v36, %v1217_v13  ;;  %v4729_v3 = vld [vmem:[#allocation67_spill] sm:$0xff]  ;;  %v4730_v10 = vld [vmem:[#allocation85_spill] sm:$0xff] }
 0x235   : > { %2521 = vmatmul.mubr.msk.f32.gmra.mxu1 %vm1794_vm11, %v1785_v16  ;;  %v1688_v19 = vsel %vm1662_vm7, %v1655_v4, %v1219_v38  ;;  %v1559_v24 = vsel %vm1534_vm3, %v4673_v61, %v4729_v3 }
 0x236   : > { %v2211_v56 = vadd.f32 %v2210_v17, %v2209_v58  ;;  %v1590_v30 = vsel %vm1565_vm4, %v1559_v24, %v4730_v10 }
 0x237   : > { %v1313_v14 = vpop.permute.xlu0 %1312 }
 0x238   : > { %v1029_v9 = vpop.permute.xlu1 %1028  ;;  %v1720_v57 = vsel %vm1695_vm8, %v1687_v39, %v1313_v14 }
 0x239   : > { %v1623_v58 = vsel %vm1596_vm5, %v1590_v30, %v1029_v9 }
 0x23b   : > { %v1315_v32 = vpop.permute.xlu0 %1314 }
 0x23c   : > { %v1403_v23 = vpop.permute.xlu1 %1402  ;;  %v1721_v26 = vsel %vm1695_vm8, %v1688_v19, %v1315_v32 }
 0x23d   : > { %v1753_v45 = vsel %vm1728_vm9, %v1720_v57, %v1403_v23 }
 0x23f   : > { %v4208_v18 = vpop.permute.xlu0 %1030 }
 0x240   : > { %v1125_v50 = vpop.permute.xlu1 %1124 }
 0x241   : > { %v1656_v17 = vsel %vm1629_vm6, %v1623_v58, %v1125_v50 }
 0x242   : > { %v2498_v62 = vpop.f32.mrf.mxu0 }
 0x243   : > { %2075 = vst.msk [vmem:[%s4117_s9 + $0x38] sm:$0xff] %vm1534_vm3, %v2498_v62  ;;  %v1405_v46 = vpop.permute.xlu0 %1404  ;;  %v2176_v43 = vmul.f32 %v2498_v62, %v2498_v62  ;;  %v2113_v20 = vsel %vm1534_vm3, %v2498_v62, 0.0  ;;  %v4731_v62 = vld [vmem:[#allocation68_spill] sm:$0xff] }
 0x244   : > { %v1493_v11 = vpop.permute.xlu1 %1492  ;;  %v1939_v51 = vpop.f32.mrf.mxu0  ;;  %v1754_v0 = vsel %vm1728_vm9, %v1721_v26, %v1405_v46 }
 0x245   : > { %v1786_v49 = vsel %vm1761_vm10, %v1753_v45, %v1493_v11  ;;  %2074 = vst.msk [vmem:[%s4117_s9 + $0x30] sm:$0xff] %vm1534_vm3, %v1939_v51  ;;  %v2111_v35 = vsel %vm1534_vm3, %v1939_v51, 0.0  ;;  %v2175_v59 = vmul.f32 %v1939_v51, %v1939_v51  ;;  %v2214_v13 = vsel %vm1534_vm3, %v2176_v43, 0.0  ;;  %v4732_v11 = vld [vmem:[#allocation86_spill] sm:$0xff] }
 0x246   : > { %2523 = vmatprep.mubr.msk.f32.mxu1 %vm1794_vm11, %v1786_v49  ;;  %v2112_v22 = vadd.f32 %v2111_v35, %v2110_v28  ;;  %v1560_v45 = vsel %vm1534_vm3, %v4676_v34, %v4731_v62 }
 0x247   : > { %v2212_v25 = vsel %vm1534_vm3, %v2175_v59, 0.0  ;;  %v1127_v21 = vpop.permute.xlu0 %1126  ;;  %v1591_v51 = vsel %vm1565_vm4, %v1560_v45, %v4732_v11  ;;  %v4739_v11 = vld [vmem:[#allocation72_spill] sm:$0xff] }
 0x248   : > { %v1221_v54 = vpop.permute.xlu1 %1220  ;;  %v2213_v52 = vadd.f32 %v2212_v25, %v2211_v56  ;;  %v2114_v47 = vadd.f32 %v2113_v20, %v2112_v22  ;;  %v1624_v7 = vsel %vm1596_vm5, %v1591_v51, %v4208_v18 }
 0x249   : > { %v1689_v14 = vsel %vm1662_vm7, %v1656_v17, %v1221_v54  ;;  %v1657_v35 = vsel %vm1629_vm6, %v1624_v7, %v1127_v21  ;;  %v4740_v7 = vld [vmem:[#allocation88_spill] sm:$0xff] }
 0x24a   : > { %v2215_v40 = vadd.f32 %v2214_v13, %v2213_v52  ;;  %v4733_v52 = vld [vmem:[#allocation69_spill] sm:$0xff] }
 0x24b   : > { %v1495_v27 = vpop.permute.xlu0 %1494 }
 0x24c   : > { %v1223_v48 = vpop.permute.xlu1 %1222  ;;  %v1787_v12 = vsel %vm1761_vm10, %v1754_v0, %v1495_v27 }
 0x24d   : > { %2524 = vmatmul.mubr.msk.f32.gmra.mxu1 %vm1794_vm11, %v1787_v12  ;;  %v1690_v59 = vsel %vm1662_vm7, %v1657_v35, %v1223_v48 }
 0x24f   : > { %v4237_v55 = vpop.permute.xlu0 %1316 }
 0x250   : > { %v1033_v5 = vpop.permute.xlu1 %1032  ;;  %v1722_v6 = vsel %vm1695_vm8, %v1689_v14, %v4237_v55 }
 0x253   : > { %v4239_v31 = vpop.permute.xlu0 %1318 }
 0x254   : > { %v4241_v63 = vpop.permute.xlu1 %1406  ;;  %v1723_v34 = vsel %vm1695_vm8, %v1690_v59, %v4239_v31 }
 0x255   : > { %v1755_v41 = vsel %vm1728_vm9, %v1722_v6, %v4241_v63 }
 0x256   : > { %v2501_v38 = vpop.f32.mrf.mxu0 }
 0x257   : > { %2077 = vst.msk [vmem:[%s4117_s9 + $0x48] sm:$0xff] %vm1534_vm3, %v2501_v38  ;;  %v4251_v16 = vpop.permute.xlu0 %1034  ;;  %v2178_v32 = vmul.f32 %v2501_v38, %v2501_v38  ;;  %v2117_v42 = vsel %vm1534_vm3, %v2501_v38, 0.0 }
 0x258   : > { %v1129_v28 = vpop.permute.xlu1 %1128  ;;  %v1949_v56 = vpop.f32.mrf.mxu0 }
 0x259   : > { %2076 = vst.msk [vmem:[%s4117_s9 + $0x40] sm:$0xff] %vm1534_vm3, %v1949_v56  ;;  %v2115_v61 = vsel %vm1534_vm3, %v1949_v56, 0.0  ;;  %v2177_v23 = vmul.f32 %v1949_v56, %v1949_v56  ;;  %v2218_v46 = vsel %vm1534_vm3, %v2178_v32, 0.0 }
 0x25a   : > { %v2116_v9 = vadd.f32 %v2115_v61, %v2114_v47  ;;  %v1561_v47 = vsel %vm1534_vm3, %v4689_v53, %v4733_v52 }
 0x25b   : > { %v2216_v15 = vsel %vm1534_vm3, %v2177_v23, 0.0  ;;  %v4264_v33 = vpop.permute.xlu0 %1408  ;;  %v4735_v23 = vld [vmem:[#allocation71_spill] sm:$0xff] }
 0x25c   : > { %v4266_v50 = vpop.permute.xlu1 %1496  ;;  %v2217_v36 = vadd.f32 %v2216_v15, %v2215_v40  ;;  %v2118_v57 = vadd.f32 %v2117_v42, %v2116_v9  ;;  %v1756_v8 = vsel %vm1728_vm9, %v1723_v34, %v4264_v33  ;;  %v4734_v40 = vld [vmem:[#allocation7_spill] sm:$0xff]  ;;  %v1563_v6 = vsel %vm1534_vm3, %v4702_v2, %v4735_v23  ;;  %v4737_v42 = vld [vmem:[#allocation8_spill] sm:$0xff] }
 0x25d   : > { %v1788_v39 = vsel %vm1761_vm10, %v1755_v41, %v4266_v50  ;;  %v1592_v0 = vsel %vm1565_vm4, %v1561_v47, %v4734_v40  ;;  %v1594_v15 = vsel %vm1565_vm4, %v1563_v6, %v4737_v42 }
 0x25e   : > { %2526 = vmatprep.mubr.msk.f32.mxu1 %vm1794_vm11, %v1788_v39  ;;  %v2219_v49 = vadd.f32 %v2218_v46, %v2217_v36  ;;  %v1625_v48 = vsel %vm1596_vm5, %v1592_v0, %v1033_v5  ;;  %v4738_v36 = vld [vmem:[#allocation87_spill] sm:$0xff] }
 0x25f   : > { %v1131_v1 = vpop.permute.xlu0 %1130  ;;  %v1658_v53 = vsel %vm1629_vm6, %v1625_v48, %v1129_v28  ;;  %v4736_v28 = vld [vmem:[#allocation70_spill] sm:$0xff] }
 0x260   : > { %v1225_v43 = vpop.permute.xlu1 %1224  ;;  %v1562_v41 = vsel %vm1534_vm3, %v4692_v60, %v4736_v28  ;;  %v1564_v60 = vsel %vm1534_vm3, %v4705_v37, %v4739_v11 }
 0x261   : > { %v1691_v58 = vsel %vm1662_vm7, %v1658_v53, %v1225_v43  ;;  %v1593_v39 = vsel %vm1565_vm4, %v1562_v41, %v4738_v36  ;;  %v1595_v43 = vsel %vm1565_vm4, %v1564_v60, %v4740_v7 }
 0x262   : > { %v1626_v62 = vsel %vm1596_vm5, %v1593_v39, %v4251_v16 }
 0x263   : > { %v4285_v29 = vpop.permute.xlu0 %1498  ;;  %v1659_v51 = vsel %vm1629_vm6, %v1626_v62, %v1131_v1 }
 0x264   : > { %v1227_v22 = vpop.permute.xlu1 %1226  ;;  %v1789_v44 = vsel %vm1761_vm10, %v1756_v8, %v4285_v29 }
 0x265   : > { %2527 = vmatmul.mubr.msk.f32.gmra.mxu1 %vm1794_vm11, %v1789_v44  ;;  %v1692_v35 = vsel %vm1662_vm7, %v1659_v51, %v1227_v22 }
 0x267   : > { %v1321_v18 = vpop.permute.xlu0 %1320 }
 0x268   : > { %v1037_v20 = vpop.permute.xlu1 %1036  ;;  %v1724_v56 = vsel %vm1695_vm8, %v1691_v58, %v1321_v18 }
 0x26a   : > { %v2504_v25 = vpop.f32.mrf.mxu0 }
 0x26b   : > { %2079 = vst.msk [vmem:[%s4117_s9 + $0x58] sm:$0xff] %vm1534_vm3, %v2504_v25  ;;  %v1323_v21 = vpop.permute.xlu0 %1322  ;;  %v2180_v19 = vmul.f32 %v2504_v25, %v2504_v25  ;;  %v2121_v12 = vsel %vm1534_vm3, %v2504_v25, 0.0 }
 0x26c   : > { %v1411_v54 = vpop.permute.xlu1 %1410  ;;  %v1959_v4 = vpop.f32.mrf.mxu0  ;;  %v1725_v59 = vsel %vm1695_vm8, %v1692_v35, %v1323_v21 }
 0x26d   : > { %2078 = vst.msk [vmem:[%s4117_s9 + $0x50] sm:$0xff] %vm1534_vm3, %v1959_v4  ;;  %v2119_v13 = vsel %vm1534_vm3, %v1959_v4, 0.0  ;;  %v2179_v26 = vmul.f32 %v1959_v4, %v1959_v4  ;;  %v2222_v17 = vsel %vm1534_vm3, %v2180_v19, 0.0  ;;  %v1757_v32 = vsel %vm1728_vm9, %v1724_v56, %v1411_v54 }
 0x26e   : > { %v2120_v27 = vadd.f32 %v2119_v13, %v2118_v57  ;;  %v1627_v57 = vsel %vm1596_vm5, %v1594_v15, %v1037_v20 }
 0x26f   : > { %v2220_v3 = vsel %vm1534_vm3, %v2179_v26, 0.0  ;;  %v1039_v24 = vpop.permute.xlu0 %1038 }
 0x270   : > { %v1133_v10 = vpop.permute.xlu1 %1132  ;;  %v2221_v30 = vadd.f32 %v2220_v3, %v2219_v49  ;;  %v2122_v38 = vadd.f32 %v2121_v12, %v2120_v27  ;;  %v1628_v34 = vsel %vm1596_vm5, %v1595_v43, %v1039_v24 }
 0x271   : > { %v1660_v2 = vsel %vm1629_vm6, %v1627_v57, %v1133_v10 }
 0x272   : > { %v2223_v14 = vadd.f32 %v2222_v17, %v2221_v30 }
 0x273   : > { %v1413_v5 = vpop.permute.xlu0 %1412 }
 0x274   : > { %v1501_v61 = vpop.permute.xlu1 %1500  ;;  %v1758_v1 = vsel %vm1728_vm9, %v1725_v59, %v1413_v5 }
 0x275   : > { %v1790_v9 = vsel %vm1761_vm10, %v1757_v32, %v1501_v61 }
 0x276   : > { %2529 = vmatprep.mubr.msk.f32.mxu1 %vm1794_vm11, %v1790_v9 }
 0x277   : > { %v1135_v45 = vpop.permute.xlu0 %1134 }
 0x278   : > { %v1229_v46 = vpop.permute.xlu1 %1228  ;;  %v1661_v8 = vsel %vm1629_vm6, %v1628_v34, %v1135_v45 }
 0x279   : > { %v1693_v49 = vsel %vm1662_vm7, %v1660_v2, %v1229_v46 }
 0x27a   : > { %v1726_v16 = vsel %vm1695_vm8, %v1693_v49, %v4237_v55 }
 0x27b   : > { %v1759_v37 = vsel %vm1728_vm9, %v1726_v16, %v4241_v63  ;;  %v1503_v44 = vpop.permute.xlu0 %1502 }
 0x27c   : > { %v1231_v18 = vpop.permute.xlu1 %1230  ;;  %v1791_v22 = vsel %vm1761_vm10, %v1758_v1, %v1503_v44  ;;  %v1792_v25 = vsel %vm1761_vm10, %v1759_v37, %v4266_v50 }
 0x27d   : > { %v1694_v20 = vsel %vm1662_vm7, %v1661_v8, %v1231_v18  ;;  %2530 = vmatmul.mubr.msk.f32.gmra.mxu1 %vm1794_vm11, %v1791_v22 }
 0x27e   : > { %v1727_v55 = vsel %vm1695_vm8, %v1694_v20, %v4239_v31  ;;  %v2507_v63 = vpop.f32.mrf.mxu0  ;;  %2532 = vmatprep.mubr.msk.f32.mxu1 %vm1794_vm11, %v1792_v25 }
 0x27f   : > { %v1760_v21 = vsel %vm1728_vm9, %v1727_v55, %v4264_v33  ;;  %2081 = vst.msk [vmem:[%s4117_s9 + $0x68] sm:$0xff] %vm1534_vm3, %v2507_v63  ;;  %v2182_v52 = vmul.f32 %v2507_v63, %v2507_v63  ;;  %v2125_v19 = vsel %vm1534_vm3, %v2507_v63, 0.0 }
 0x280   : > { %v1793_v54 = vsel %vm1761_vm10, %v1760_v21, %v4285_v29  ;;  %v1969_v4 = vpop.f32.mrf.mxu0 }
 0x281   : > { %2080 = vst.msk [vmem:[%s4117_s9 + $0x60] sm:$0xff] %vm1534_vm3, %v1969_v4  ;;  %v2123_v31 = vsel %vm1534_vm3, %v1969_v4, 0.0  ;;  %v2181_v50 = vmul.f32 %v1969_v4, %v1969_v4  ;;  %2533 = vmatmul.mubr.msk.f32.gmra.mxu1 %vm1794_vm11, %v1793_v54  ;;  %v2226_v40 = vsel %vm1534_vm3, %v2182_v52, 0.0 }
 0x282   : > { %v2124_v47 = vadd.f32 %v2123_v31, %v2122_v38 }
 0x283   : > { %v2224_v33 = vsel %vm1534_vm3, %v2181_v50, 0.0 }
 0x284   : > { %v2225_v13 = vadd.f32 %v2224_v33, %v2223_v14  ;;  %v2126_v26 = vadd.f32 %v2125_v19, %v2124_v47 }
 0x286   : > { %v2227_v29 = vadd.f32 %v2226_v40, %v2225_v13 }
 0x295   : > { %v2510_v0 = vpop.f32.mrf.mxu0 }
 0x296   : > { %2083 = vst.msk [vmem:[%s4117_s9 + $0x78] sm:$0xff] %vm1534_vm3, %v2510_v0  ;;  %v2184_v48 = vmul.f32 %v2510_v0, %v2510_v0  ;;  %v2129_v10 = vsel %vm1534_vm3, %v2510_v0, 0.0 }
 0x297   : > { %v1979_v27 = vpop.f32.mrf.mxu0 }
 0x298   : > { %2082 = vst.msk [vmem:[%s4117_s9 + $0x70] sm:$0xff] %vm1534_vm3, %v1979_v27  ;;  %v2127_v12 = vsel %vm1534_vm3, %v1979_v27, 0.0  ;;  %v2183_v3 = vmul.f32 %v1979_v27, %v1979_v27  ;;  %v2230_v58 = vsel %vm1534_vm3, %v2184_v48, 0.0 }
 0x299   : > { %v2128_v24 = vadd.f32 %v2127_v12, %v2126_v26 }
 0x29a   : > { %v2228_v53 = vsel %vm1534_vm3, %v2183_v3, 0.0 }
 0x29b   : > { %v2130_v30 = vadd.f32 %v2129_v10, %v2128_v24  ;;  %v2229_v38 = vadd.f32 %v2228_v53, %v2227_v29 }
 0x29d   : > { %v2231_v17 = vadd.f32 %v2230_v58, %v2229_v38 }
 0x2ad   : > { %v2513_v56 = vpop.f32.mrf.mxu1 }
 0x2ae   : > { %2085 = vst.msk [vmem:[%s4117_s9 + $0x88] sm:$0xff] %vm1534_vm3, %v2513_v56  ;;  %v2186_v32 = vmul.f32 %v2513_v56, %v2513_v56  ;;  %v2133_v6 = vsel %vm1534_vm3, %v2513_v56, 0.0 }
 0x2af   : > { %v1989_v14 = vpop.f32.mrf.mxu1 }
 0x2b0   : > { %2084 = vst.msk [vmem:[%s4117_s9 + $0x80] sm:$0xff] %vm1534_vm3, %v1989_v14  ;;  %v2131_v5 = vsel %vm1534_vm3, %v1989_v14, 0.0  ;;  %v2185_v61 = vmul.f32 %v1989_v14, %v1989_v14  ;;  %v2234_v42 = vsel %vm1534_vm3, %v2186_v32, 0.0 }
 0x2b1   : > { %v2132_v23 = vadd.f32 %v2131_v5, %v2130_v30 }
 0x2b2   : > { %v2232_v9 = vsel %vm1534_vm3, %v2185_v61, 0.0 }
 0x2b3   : > { %v2233_v28 = vadd.f32 %v2232_v9, %v2231_v17  ;;  %v2134_v41 = vadd.f32 %v2133_v6, %v2132_v23 }
 0x2b5   : > { %v2235_v15 = vadd.f32 %v2234_v42, %v2233_v28 }
 0x2c5   : > { %v2516_v36 = vpop.f32.mrf.mxu1 }
 0x2c6   : > { %2087 = vst.msk [vmem:[%s4117_s9 + $0x98] sm:$0xff] %vm1534_vm3, %v2516_v36  ;;  %v2188_v57 = vmul.f32 %v2516_v36, %v2516_v36  ;;  %v2137_v46 = vsel %vm1534_vm3, %v2516_v36, 0.0 }
 0x2c7   : > { %v1999_v39 = vpop.f32.mrf.mxu1 }
 0x2c8   : > { %2086 = vst.msk [vmem:[%s4117_s9 + $0x90] sm:$0xff] %vm1534_vm3, %v1999_v39  ;;  %v2135_v62 = vsel %vm1534_vm3, %v1999_v39, 0.0  ;;  %v2187_v2 = vmul.f32 %v1999_v39, %v1999_v39  ;;  %v2238_v49 = vsel %vm1534_vm3, %v2188_v57, 0.0 }
 0x2c9   : > { %v2136_v45 = vadd.f32 %v2135_v62, %v2134_v41 }
 0x2ca   : > { %v2236_v11 = vsel %vm1534_vm3, %v2187_v2, 0.0 }
 0x2cb   : > { %v2237_v60 = vadd.f32 %v2236_v11, %v2235_v15  ;;  %v2138_v51 = vadd.f32 %v2137_v46, %v2136_v45 }
 0x2cd   : > { %v2239_v7 = vadd.f32 %v2238_v49, %v2237_v60 }
 0x2dd   : > { %v2519_v43 = vpop.f32.mrf.mxu1 }
 0x2de   : > { %2089 = vst.msk [vmem:[%s4117_s9 + $0xa8] sm:$0xff] %vm1534_vm3, %v2519_v43  ;;  %v2190_v16 = vmul.f32 %v2519_v43, %v2519_v43  ;;  %v2141_v1 = vsel %vm1534_vm3, %v2519_v43, 0.0 }
 0x2df   : > { %v2009_v35 = vpop.f32.mrf.mxu1 }
 0x2e0   : > { %2088 = vst.msk [vmem:[%s4117_s9 + $0xa0] sm:$0xff] %vm1534_vm3, %v2009_v35  ;;  %v2139_v59 = vsel %vm1534_vm3, %v2009_v35, 0.0  ;;  %v2189_v34 = vmul.f32 %v2009_v35, %v2009_v35  ;;  %v2242_v22 = vsel %vm1534_vm3, %v2190_v16, 0.0 }
 0x2e1   : > { %v2140_v37 = vadd.f32 %v2139_v59, %v2138_v51 }
 0x2e2   : > { %v2240_v8 = vsel %vm1534_vm3, %v2189_v34, 0.0 }
 0x2e3   : > { %v2241_v44 = vadd.f32 %v2240_v8, %v2239_v7  ;;  %v2142_v18 = vadd.f32 %v2141_v1, %v2140_v37 }
 0x2e5   : > { %v2243_v20 = vadd.f32 %v2242_v22, %v2241_v44 }
 0x2f5   : > { %v2522_v55 = vpop.f32.mrf.mxu1 }
 0x2f6   : > { %2091 = vst.msk [vmem:[%s4117_s9 + $0xb8] sm:$0xff] %vm1534_vm3, %v2522_v55  ;;  %v2192_v63 = vmul.f32 %v2522_v55, %v2522_v55  ;;  %v2145_v52 = vsel %vm1534_vm3, %v2522_v55, 0.0 }
 0x2f7   : > { %v2019_v25 = vpop.f32.mrf.mxu1 }
 0x2f8   : > { %2090 = vst.msk [vmem:[%s4117_s9 + $0xb0] sm:$0xff] %vm1534_vm3, %v2019_v25  ;;  %v2143_v21 = vsel %vm1534_vm3, %v2019_v25, 0.0  ;;  %v2191_v54 = vmul.f32 %v2019_v25, %v2019_v25  ;;  %v2246_v19 = vsel %vm1534_vm3, %v2192_v63, 0.0 }
 0x2f9   : > { %v2144_v4 = vadd.f32 %v2143_v21, %v2142_v18 }
 0x2fa   : > { %v2244_v31 = vsel %vm1534_vm3, %v2191_v54, 0.0 }
 0x2fb   : > { %v2245_v50 = vadd.f32 %v2244_v31, %v2243_v20  ;;  %v2146_v47 = vadd.f32 %v2145_v52, %v2144_v4 }
 0x2fd   : > { %v2247_v33 = vadd.f32 %v2246_v19, %v2245_v50 }
 0x30d   : > { %v2525_v13 = vpop.f32.mrf.mxu1 }
 0x30e   : > { %2093 = vst.msk [vmem:[%s4117_s9 + $0xc8] sm:$0xff] %vm1534_vm3, %v2525_v13  ;;  %v2194_v3 = vmul.f32 %v2525_v13, %v2525_v13  ;;  %v2149_v53 = vsel %vm1534_vm3, %v2525_v13, 0.0 }
 0x30f   : > { %v2029_v26 = vpop.f32.mrf.mxu1 }
 0x310   : > { %2092 = vst.msk [vmem:[%s4117_s9 + $0xc0] sm:$0xff] %vm1534_vm3, %v2029_v26  ;;  %v2193_v0 = vmul.f32 %v2029_v26, %v2029_v26  ;;  %v2147_v27 = vsel %vm1534_vm3, %v2029_v26, 0.0  ;;  %v2250_v58 = vsel %vm1534_vm3, %v2194_v3, 0.0 }
 0x311   : > { %v2148_v12 = vadd.f32 %v2147_v27, %v2146_v47 }
 0x312   : > { %v2248_v48 = vsel %vm1534_vm3, %v2193_v0, 0.0 }
 0x313   : > { %v2249_v10 = vadd.f32 %v2248_v48, %v2247_v33  ;;  %v2150_v38 = vadd.f32 %v2149_v53, %v2148_v12 }
 0x315   : > { %v2251_v14 = vadd.f32 %v2250_v58, %v2249_v10 }
 0x325   : > { %v2528_v40 = vpop.f32.mrf.mxu1 }
 0x326   : > { %2095 = vst.msk [vmem:[%s4117_s9 + $0xd8] sm:$0xff] %vm1534_vm3, %v2528_v40  ;;  %v2196_v32 = vmul.f32 %v2528_v40, %v2528_v40  ;;  %v2153_v23 = vsel %vm1534_vm3, %v2528_v40, 0.0 }
 0x327   : > { %v2039_v29 = vpop.f32.mrf.mxu1 }
 0x328   : > { %2094 = vst.msk [vmem:[%s4117_s9 + $0xd0] sm:$0xff] %vm1534_vm3, %v2039_v29  ;;  %v2195_v24 = vmul.f32 %v2039_v29, %v2039_v29  ;;  %v2151_v30 = vsel %vm1534_vm3, %v2039_v29, 0.0  ;;  %v2254_v28 = vsel %vm1534_vm3, %v2196_v32, 0.0 }
 0x329   : > { %v2152_v56 = vadd.f32 %v2151_v30, %v2150_v38 }
 0x32a   : > { %v2252_v17 = vsel %vm1534_vm3, %v2195_v24, 0.0 }
 0x32b   : > { %v2253_v5 = vadd.f32 %v2252_v17, %v2251_v14  ;;  %v2154_v9 = vadd.f32 %v2153_v23, %v2152_v56 }
 0x32d   : > { %v2255_v39 = vadd.f32 %v2254_v28, %v2253_v5 }
 0x33d   : > { %v2531_v61 = vpop.f32.mrf.mxu1 }
 0x33e   : > { %2097 = vst.msk [vmem:[%s4117_s9 + $0xe8] sm:$0xff] %vm1534_vm3, %v2531_v61  ;;  %v2198_v41 = vmul.f32 %v2531_v61, %v2531_v61  ;;  %v2157_v62 = vsel %vm1534_vm3, %v2531_v61, 0.0 }
 0x33f   : > { %v2049_v6 = vpop.f32.mrf.mxu1 }
 0x340   : > { %2096 = vst.msk [vmem:[%s4117_s9 + $0xe0] sm:$0xff] %vm1534_vm3, %v2049_v6  ;;  %v2155_v42 = vsel %vm1534_vm3, %v2049_v6, 0.0  ;;  %v2197_v15 = vmul.f32 %v2049_v6, %v2049_v6  ;;  %v2258_v60 = vsel %vm1534_vm3, %v2198_v41, 0.0 }
 0x341   : > { %v2156_v36 = vadd.f32 %v2155_v42, %v2154_v9  ;;  %v2534_v57 = vpop.f32.mrf.mxu1 }
 0x342   : > { %v2256_v2 = vsel %vm1534_vm3, %v2197_v15, 0.0  ;;  %2099 = vst.msk [vmem:[%s4117_s9 + $0xf8] sm:$0xff] %vm1534_vm3, %v2534_v57  ;;  %v2200_v51 = vmul.f32 %v2534_v57, %v2534_v57  ;;  %v2161_v16 = vsel %vm1534_vm3, %v2534_v57, 0.0 }
 0x343   : > { %v2257_v45 = vadd.f32 %v2256_v2, %v2255_v39  ;;  %v2059_v46 = vpop.f32.mrf.mxu1  ;;  %v2158_v11 = vadd.f32 %v2157_v62, %v2156_v36 }
 0x344   : > { %2098 = vst.msk [vmem:[%s4117_s9 + $0xf0] sm:$0xff] %vm1534_vm3, %v2059_v46  ;;  %v2159_v49 = vsel %vm1534_vm3, %v2059_v46, 0.0  ;;  %v2199_v7 = vmul.f32 %v2059_v46, %v2059_v46  ;;  %v2262_v1 = vsel %vm1534_vm3, %v2200_v51, 0.0 }
 0x345   : > { %v2160_v43 = vadd.f32 %v2159_v49, %v2158_v11  ;;  %v2259_v35 = vadd.f32 %v2258_v60, %v2257_v45 }
 0x346   : > { %v2260_v59 = vsel %vm1534_vm3, %v2199_v7, 0.0 }
 0x347   : > { %v2162_v34 = vadd.f32 %v2161_v16, %v2160_v43  ;;  %v2261_v37 = vadd.f32 %v2260_v59, %v2259_v35 }
 0x349   : > { %v2163_v8 = vrot.slane %v2162_v34, 4  ;;  %v2263_v44 = vadd.f32 %v2262_v1, %v2261_v37 }
 0x34b   : > { %v2164_v18 = vadd.f32 %v2163_v8, %v2162_v34  ;;  %v2264_v22 = vrot.slane %v2263_v44, 4 }
 0x34d   : > { %v2165_v20 = vrot.slane %v2164_v18, 2  ;;  %v2265_v55 = vadd.f32 %v2264_v22, %v2263_v44 }
 0x34f   : > { %v2166_v25 = vadd.f32 %v2165_v20, %v2164_v18  ;;  %v2266_v63 = vrot.slane %v2265_v55, 2 }
 0x351   : > { %v2167_v21 = vrot.slane %v2166_v25, 1  ;;  %v2267_v54 = vadd.f32 %v2266_v63, %v2265_v55 }
 0x353   : > { %v2268_v4 = vrot.slane %v2267_v54, 1  ;;  %v2168_v52 = vadd.f32 %v2167_v21, %v2166_v25 }
 0x355   : > { %v2269_v31 = vadd.f32 %v2268_v4, %v2267_v54 }
 0x357   : > { %v2270_v50 = vsel %vm442_vm0, %v2168_v52, %v2269_v31 }
 0x358   : > { %2272 = vst.msk [vmem:[%s235_s10] sm:$0x3] %vm2271_vm12, %v2270_v50 }
 0x359 PF: > { %s16_s18 = sadd.s32 1, %s2591_s18  }
 0x35a   : > { %p13_p4 = scmp.ge.s32.totalorder %s16_s18, 4  }
 0x35c   :  { %15 = sbr.rel (!%p13_p4) target bundleno = 1 (0x1), region = 78 }

</bundles_post_ra>
